<compile_context>
chip_gen: v7x
topology: tpu7x:2x2x1
jax: 0.10.0
libtpu: 0.0.40
codegen_flags: <defaults>
</compile_context>

<pallas_src>
import jax
import jax.numpy as jnp
from jax import lax
from jax.experimental import pallas as pl
from jax.experimental.pallas import tpu as pltpu

NEG_INF = -1e30
HEADS = 2

_VMEM_SPEC = pl.BlockSpec(memory_space=pltpu.MemorySpace.VMEM)


# ----------------------------------------------------------------------------
# Fused Pallas kernel: whole GATGNN forward, activations resident in VMEM.
# ----------------------------------------------------------------------------
def _gatgnn_kernel(*refs):
    (x1_ref, adjb1_ref, adjb2_ref, adjb3_ref,
     pe2_ref, po2_ref, pe3_ref, po3_ref, u32_ref, u21_ref) = refs[0:10]
    gat_refs = refs[10:26]                      # 8 layers x (fused W, bias)
    w1_ref, b1_ref, w2_ref, b2_ref, w3_ref, b3_ref = refs[26:32]
    o_ref = refs[32]

    def gat(x, adjb, idx):
        """One GATConv layer: fused matmul -> per-head masked softmax -> agg."""
        wf = gat_refs[2 * idx][...]             # [Fin, HC + 2H]
        bias = gat_refs[2 * idx + 1][...]       # [1, HC]
        hc = wf.shape[1] - 2 * HEADS
        c = hc // HEADS
        n = x.shape[0]
        ones = jnp.ones((n, 1), jnp.float32)    # hoisted out of the head loop

        xp_full = jnp.dot(x, wf, preferred_element_type=jnp.float32)
        xp = xp_full[:, :hc]                    # [N, HC] transformed features

        head_outs = []
        for h in range(HEADS):
            a_src = xp_full[:, hc + h:hc + h + 1]                   # [N, 1]
            a_dst = xp_full[:, hc + HEADS + h:hc + HEADS + h + 1]   # [N, 1]
            # srcb[i, j] = a_src[j]  (rank-1 broadcast, tiny K=1 matmul)
            srcb = lax.dot_general(ones, a_src, (((1,), (1,)), ((), ())),
                                   preferred_element_type=jnp.float32)
            e = a_dst + srcb                                        # [N, N]
            e = jnp.where(e > 0, e, 0.2 * e)                        # leaky_relu(0.2)
            e = e + adjb                                            # additive edge mask
            m = jnp.max(e, axis=1, keepdims=True)
            p = jnp.exp(e - m)
            inv_s = pl.reciprocal(jnp.sum(p, axis=1, keepdims=True), approx=True)
            alpha = p * inv_s                                       # row softmax
            head_outs.append(jnp.dot(alpha, xp[:, h * c:(h + 1) * c],
                                     preferred_element_type=jnp.float32))
        return jnp.concatenate(head_outs, axis=1) + bias

    adjb1 = adjb1_ref[...]
    adjb2 = adjb2_ref[...]
    adjb3 = adjb3_ref[...]

    # --- level 1 ---
    x1 = gat(x1_ref[...], adjb1, 0)                                  # [N1, 64]

    # --- pool to level 2 (pairwise max via selection matmuls) ---
    x2 = jnp.maximum(
        jnp.dot(pe2_ref[...], x1, preferred_element_type=jnp.float32),
        jnp.dot(po2_ref[...], x1, preferred_element_type=jnp.float32))
    x2 = gat(x2, adjb2, 1)                                           # [N2, 128]

    # --- pool to level 3 ---
    x3 = jnp.maximum(
        jnp.dot(pe3_ref[...], x2, preferred_element_type=jnp.float32),
        jnp.dot(po3_ref[...], x2, preferred_element_type=jnp.float32))
    x3 = gat(x3, adjb3, 2)                                           # [N3, 256]
    x3 = gat(x3, adjb3, 3)                                           # [N3, 256]

    # --- unpool 3 -> 2, lin5, concat, conv5 ---
    f2 = jnp.dot(u32_ref[...], x3, preferred_element_type=jnp.float32)   # [N2, 256]
    f2 = gat(f2, adjb2, 4)                                           # [N2, 128]
    x2 = gat(jnp.concatenate([x2, f2], axis=1), adjb2, 5)            # [N2, 128]

    # --- unpool 2 -> 1, lin6, concat, conv6 ---
    f1 = jnp.dot(u21_ref[...], x2, preferred_element_type=jnp.float32)   # [N1, 128]
    f1 = gat(f1, adjb1, 6)                                           # [N1, 64]
    feat = gat(jnp.concatenate([x1, f1], axis=1), adjb1, 7)          # [N1, 64]

    # --- MLP head: fc1 -> relu -> fc2 -> relu -> fc3(pad 128) -> tanh -> L2 ---
    h = jnp.maximum(
        jnp.dot(feat, w1_ref[...], preferred_element_type=jnp.float32) + b1_ref[...], 0.0)
    h = jnp.maximum(
        jnp.dot(h, w2_ref[...], preferred_element_type=jnp.float32) + b2_ref[...], 0.0)
    h = jnp.tanh(
        jnp.dot(h, w3_ref[...], preferred_element_type=jnp.float32) + b3_ref[...])
    ssq = jnp.sum(h * h, axis=1, keepdims=True)          # padded cols are exactly 0
    o_ref[...] = h * lax.rsqrt(jnp.maximum(ssq, 1e-24))  # == x / max(||x||, 1e-12)


# ----------------------------------------------------------------------------
# Plain-JAX glue: graph constants (adjacency bias, pool/unpool matrices).
# ----------------------------------------------------------------------------
def dense_adj_bias(edge_index, n):
    src, dst = edge_index[0], edge_index[1]
    adj = jnp.zeros((n, n), jnp.float32).at[dst, src].set(1.0)   # message src -> dst
    idx = jnp.arange(n)
    adj = adj.at[idx, idx].set(1.0)                              # add self-loops
    return jnp.where(adj > 0, 0.0, NEG_INF)                      # additive mask


def sel_matrix(n_out, n_in, parity):
    # M[i, 2*i + parity] = 1  (picks even / odd rows for pairwise-max pooling)
    r = jnp.arange(n_out)[:, None]
    c = jnp.arange(n_in)[None, :]
    return (c == 2 * r + parity).astype(jnp.float32)


def unpool_matrix(n_out, n_in):
    # M[j, j // 2] = 1  (repeats each pooled row twice: x_pooled[cluster])
    r = jnp.arange(n_out)[:, None]
    c = jnp.arange(n_in)[None, :]
    return (c == r // 2).astype(jnp.float32)


def build_graph_constants(edge1, n1):
    # TODO(synk): `pooling()` is not defined in the reference source; this uses
    # a deterministic fixed-factor (cluster = id // 2) max pooling, not graclus.
    adjb1 = dense_adj_bias(edge1, n1)
    n2 = n1 // 2
    clust2 = jnp.arange(n1, dtype=jnp.int32) // 2
    edge2 = clust2[edge1]
    adjb2 = dense_adj_bias(edge2, n2)
    n3 = n2 // 2
    clust3 = jnp.arange(n2, dtype=jnp.int32) // 2
    edge3 = clust3[edge2]
    adjb3 = dense_adj_bias(edge3, n3)
    pe2, po2 = sel_matrix(n2, n1, 0), sel_matrix(n2, n1, 1)
    pe3, po3 = sel_matrix(n3, n2, 0), sel_matrix(n3, n2, 1)
    u32 = unpool_matrix(n2, n3)
    u21 = unpool_matrix(n1, n2)
    return adjb1, adjb2, adjb3, pe2, po2, pe3, po3, u32, u21


# ----------------------------------------------------------------------------
# Parameter init (fused-weight packing done once at init time).
# ----------------------------------------------------------------------------
def init_gat_params(key, fin, c, h=HEADS):
    hc = h * c
    k1, k2, k3 = jax.random.split(key, 3)
    lim_w = (6.0 / (fin + hc)) ** 0.5
    w = jax.random.uniform(k1, (fin, hc), jnp.float32, -lim_w, lim_w)
    lim_a = (6.0 / (c + 1)) ** 0.5
    att_src = jax.random.uniform(k2, (h, c), jnp.float32, -lim_a, lim_a)
    att_dst = jax.random.uniform(k3, (h, c), jnp.float32, -lim_a, lim_a)
    eye = jnp.eye(h, dtype=jnp.float32)
    # block-diagonal maps so xp @ blk gives per-head logits
    asrc_blk = (att_src[:, :, None] * eye[:, None, :]).reshape(hc, h)
    adst_blk = (att_dst[:, :, None] * eye[:, None, :]).reshape(hc, h)
    # fused projection:  x @ [ W | W@asrc | W@adst ]  -> one MXU matmul / layer
    wf = jnp.concatenate([w, w @ asrc_blk, w @ adst_blk], axis=1)    # [Fin, HC+2H]
    bias = jnp.zeros((1, hc), jnp.float32)
    return wf, bias


def init_linear(key, fin, fout):
    k1, k2 = jax.random.split(key)
    lim = 1.0 / (fin ** 0.5)
    w = jax.random.uniform(k1, (fin, fout), jnp.float32, -lim, lim)
    b = jax.random.uniform(k2, (1, fout), jnp.float32, -lim, lim)
    return w, b


def init_params(key):
    ks = jax.random.split(key, 11)
    params = {
        "conv1": init_gat_params(ks[0], 6, 32),
        "conv2": init_gat_params(ks[1], 64, 64),
        "conv3": init_gat_params(ks[2], 128, 128),
        "conv4": init_gat_params(ks[3], 256, 128),
        "lin5": init_gat_params(ks[4], 256, 64),
        "conv5": init_gat_params(ks[5], 256, 64),
        "lin6": init_gat_params(ks[6], 128, 32),
        "conv6": init_gat_params(ks[7], 128, 32),
        "fc1": init_linear(ks[8], 64, 512),
        "fc2": init_linear(ks[9], 512, 128),
    }
    # fc3 zero-padded to a lane-dense 128-wide output slab (sliced in wrapper);
    # padded tanh(0)=0 columns do not affect the L2 normalization.
    w3, b3 = init_linear(ks[10], 128, 3)
    w3p = jnp.zeros((128, 128), jnp.float32).at[:, :3].set(w3)
    b3p = jnp.zeros((1, 128), jnp.float32).at[:, :3].set(b3)
    params["fc3"] = (w3p, b3p)
    return params


# ----------------------------------------------------------------------------
# Full forward: ONE pallas_call for the entire network.
# ----------------------------------------------------------------------------
_GAT_ORDER = ("conv1", "conv2", "conv3", "conv4", "lin5", "conv5", "lin6", "conv6")


def gatgnn_forward(x1, edge1, params):
    n1 = x1.shape[0]
    consts = build_graph_constants(edge1, n1)

    gat_flat = []
    for name in _GAT_ORDER:
        wf, b = params[name]
        gat_flat += [wf, b]

    inputs = (x1,) + consts + tuple(gat_flat) + (
        params["fc1"][0], params["fc1"][1],
        params["fc2"][0], params["fc2"][1],
        params["fc3"][0], params["fc3"][1],
    )

    out_pad = pl.pallas_call(
        _gatgnn_kernel,
        out_shape=jax.ShapeDtypeStruct((n1, 128), jnp.float32),
        in_specs=[_VMEM_SPEC] * len(inputs),
        out_specs=_VMEM_SPEC,
    )(*inputs)
    return out_pad[:, :3]


# ----------------------------------------------------------------------------
if __name__ == "__main__":
    key = jax.random.PRNGKey(0)
    k_x, k_p = jax.random.split(key)

    N1 = 16
    x1 = jax.random.normal(k_x, (N1, 6), jnp.float32)

    # deterministic directed edge set: ring (both directions) + chords (+5)
    idx = jnp.arange(N1, dtype=jnp.int32)
    src = jnp.concatenate([idx, idx, idx])
    dst = jnp.concatenate([(idx + 1) % N1, (idx - 1) % N1, (idx + 5) % N1])
    edge1 = jnp.stack([src, dst]).astype(jnp.int32)                  # [2, 48]

    params = init_params(k_p)

    fwd = jax.jit(gatgnn_forward)
    out = fwd(x1, edge1, params)
    jax.block_until_ready(out)

    assert out.shape == (N1, 3) and out.dtype == jnp.float32
    assert bool(jnp.all(jnp.isfinite(out)))
    print("KERNEL_OK")
</pallas_src>

<mosaic_0001>
module attributes {stable_mosaic.version = 11 : i64} {
  func.func @_gatgnn_kernel(%arg0: memref<16x6xf32, #tpu.memory_space<vmem>>, %arg1: memref<16x16xf32, #tpu.memory_space<vmem>>, %arg2: memref<8x8xf32, #tpu.memory_space<vmem>>, %arg3: memref<4x4xf32, #tpu.memory_space<vmem>>, %arg4: memref<8x16xf32, #tpu.memory_space<vmem>>, %arg5: memref<8x16xf32, #tpu.memory_space<vmem>>, %arg6: memref<4x8xf32, #tpu.memory_space<vmem>>, %arg7: memref<4x8xf32, #tpu.memory_space<vmem>>, %arg8: memref<8x4xf32, #tpu.memory_space<vmem>>, %arg9: memref<16x8xf32, #tpu.memory_space<vmem>>, %arg10: memref<6x68xf32, #tpu.memory_space<vmem>>, %arg11: memref<1x64xf32, #tpu.memory_space<vmem>>, %arg12: memref<64x132xf32, #tpu.memory_space<vmem>>, %arg13: memref<1x128xf32, #tpu.memory_space<vmem>>, %arg14: memref<128x260xf32, #tpu.memory_space<vmem>>, %arg15: memref<1x256xf32, #tpu.memory_space<vmem>>, %arg16: memref<256x260xf32, #tpu.memory_space<vmem>>, %arg17: memref<1x256xf32, #tpu.memory_space<vmem>>, %arg18: memref<256x132xf32, #tpu.memory_space<vmem>>, %arg19: memref<1x128xf32, #tpu.memory_space<vmem>>, %arg20: memref<256x132xf32, #tpu.memory_space<vmem>>, %arg21: memref<1x128xf32, #tpu.memory_space<vmem>>, %arg22: memref<128x68xf32, #tpu.memory_space<vmem>>, %arg23: memref<1x64xf32, #tpu.memory_space<vmem>>, %arg24: memref<128x68xf32, #tpu.memory_space<vmem>>, %arg25: memref<1x64xf32, #tpu.memory_space<vmem>>, %arg26: memref<64x512xf32, #tpu.memory_space<vmem>>, %arg27: memref<1x512xf32, #tpu.memory_space<vmem>>, %arg28: memref<512x128xf32, #tpu.memory_space<vmem>>, %arg29: memref<1x128xf32, #tpu.memory_space<vmem>>, %arg30: memref<128x128xf32, #tpu.memory_space<vmem>>, %arg31: memref<1x128xf32, #tpu.memory_space<vmem>>, %arg32: memref<16x128xf32, #tpu.memory_space<vmem>>) attributes {dimension_semantics = [], scalar_prefetch = 0 : i64, scratch_operands = 0 : i64, tpu.core_type = #tpu.core_type<tc>} {
    %c0 = arith.constant 0 : index
    %c0_0 = arith.constant 0 : index
    %0 = vector.load %arg1[%c0, %c0_0] : memref<16x16xf32, #tpu.memory_space<vmem>>, vector<16x16xf32>
    %1 = vector.shape_cast %0 : vector<16x16xf32> to vector<16x16xf32>
    %c0_1 = arith.constant 0 : index
    %c0_2 = arith.constant 0 : index
    %2 = vector.load %arg2[%c0_1, %c0_2] : memref<8x8xf32, #tpu.memory_space<vmem>>, vector<8x8xf32>
    %3 = vector.shape_cast %2 : vector<8x8xf32> to vector<8x8xf32>
    %c0_3 = arith.constant 0 : index
    %c0_4 = arith.constant 0 : index
    %4 = vector.load %arg3[%c0_3, %c0_4] : memref<4x4xf32, #tpu.memory_space<vmem>>, vector<4x4xf32>
    %5 = vector.shape_cast %4 : vector<4x4xf32> to vector<4x4xf32>
    %c0_5 = arith.constant 0 : index
    %c0_6 = arith.constant 0 : index
    %6 = vector.load %arg0[%c0_5, %c0_6] : memref<16x6xf32, #tpu.memory_space<vmem>>, vector<16x6xf32>
    %c0_7 = arith.constant 0 : index
    %c0_8 = arith.constant 0 : index
    %7 = vector.load %arg10[%c0_7, %c0_8] : memref<6x68xf32, #tpu.memory_space<vmem>>, vector<6x68xf32>
    %c0_9 = arith.constant 0 : index
    %c0_10 = arith.constant 0 : index
    %8 = vector.load %arg11[%c0_9, %c0_10] : memref<1x64xf32, #tpu.memory_space<vmem>>, vector<1x64xf32>
    %cst = arith.constant 1.000000e+00 : f32
    %9 = vector.broadcast %cst : f32 to vector<16x1xf32>
    %cst_11 = arith.constant dense<0.000000e+00> : vector<16x68xf32>
    %10 = tpu.matmul %6, %7, %cst_11 {dimension_numbers = #tpu.dot_dimension_numbers<[1], [0], [0], [1], [0, 0, 1, 1], [], []>} : vector<16x6xf32>, vector<6x68xf32>, vector<16x68xf32> -> vector<16x68xf32>
    %11 = vector.extract_strided_slice %10 {offsets = [0, 0], sizes = [16, 64], strides = [1, 1]} : vector<16x68xf32> to vector<16x64xf32>
    %12 = vector.extract_strided_slice %10 {offsets = [0, 64], sizes = [16, 1], strides = [1, 1]} : vector<16x68xf32> to vector<16x1xf32>
    %13 = vector.extract_strided_slice %10 {offsets = [0, 66], sizes = [16, 1], strides = [1, 1]} : vector<16x68xf32> to vector<16x1xf32>
    %cst_12 = arith.constant dense<0.000000e+00> : vector<16x16xf32>
    %14 = tpu.matmul %9, %12, %cst_12 {dimension_numbers = #tpu.dot_dimension_numbers<[1], [1], [0], [0], [0, 0, 1, 0], [], []>} : vector<16x1xf32>, vector<16x1xf32>, vector<16x16xf32> -> vector<16x16xf32>
    %15 = vector.broadcast %13 : vector<16x1xf32> to vector<16x16xf32>
    %16 = arith.addf %15, %14 : vector<16x16xf32>
    %cst_13 = arith.constant 0.000000e+00 : f32
    %17 = vector.broadcast %cst_13 : f32 to vector<16x16xf32>
    %18 = arith.cmpf ogt, %16, %17 : vector<16x16xf32>
    %cst_14 = arith.constant 2.000000e-01 : f32
    %19 = vector.broadcast %cst_14 : f32 to vector<16x16xf32>
    %20 = arith.mulf %19, %16 : vector<16x16xf32>
    %21 = arith.select %18, %16, %20 : vector<16x16xi1>, vector<16x16xf32>
    %22 = arith.addf %21, %1 : vector<16x16xf32>
    %cst_15 = arith.constant dense<0xFF800000> : vector<16xf32>
    %23 = vector.multi_reduction <maximumf>, %22, %cst_15 [1] : vector<16x16xf32> to vector<16xf32>
    %24 = vector.shape_cast %23 : vector<16xf32> to vector<16x1xf32>
    %25 = vector.broadcast %24 : vector<16x1xf32> to vector<16x16xf32>
    %26 = arith.subf %22, %25 : vector<16x16xf32>
    %27 = math.exp %26 : vector<16x16xf32>
    %cst_16 = arith.constant dense<0.000000e+00> : vector<16xf32>
    %28 = vector.multi_reduction <add>, %27, %cst_16 [1] : vector<16x16xf32> to vector<16xf32>
    %29 = vector.shape_cast %28 : vector<16xf32> to vector<16x1xf32>
    %30 = tpu.reciprocal %29 {approx = true} : vector<16x1xf32> -> vector<16x1xf32>
    %31 = vector.broadcast %30 : vector<16x1xf32> to vector<16x16xf32>
    %32 = arith.mulf %27, %31 : vector<16x16xf32>
    %33 = vector.extract_strided_slice %11 {offsets = [0, 0], sizes = [16, 32], strides = [1, 1]} : vector<16x64xf32> to vector<16x32xf32>
    %cst_17 = arith.constant dense<0.000000e+00> : vector<16x32xf32>
    %34 = tpu.matmul %32, %33, %cst_17 {dimension_numbers = #tpu.dot_dimension_numbers<[1], [0], [0], [1], [0, 0, 1, 1], [], []>} : vector<16x16xf32>, vector<16x32xf32>, vector<16x32xf32> -> vector<16x32xf32>
    %35 = vector.extract_strided_slice %10 {offsets = [0, 65], sizes = [16, 1], strides = [1, 1]} : vector<16x68xf32> to vector<16x1xf32>
    %36 = vector.extract_strided_slice %10 {offsets = [0, 67], sizes = [16, 1], strides = [1, 1]} : vector<16x68xf32> to vector<16x1xf32>
    %cst_18 = arith.constant dense<0.000000e+00> : vector<16x16xf32>
    %37 = tpu.matmul %9, %35, %cst_18 {dimension_numbers = #tpu.dot_dimension_numbers<[1], [1], [0], [0], [0, 0, 1, 0], [], []>} : vector<16x1xf32>, vector<16x1xf32>, vector<16x16xf32> -> vector<16x16xf32>
    %38 = vector.broadcast %36 : vector<16x1xf32> to vector<16x16xf32>
    %39 = arith.addf %38, %37 : vector<16x16xf32>
    %cst_19 = arith.constant 0.000000e+00 : f32
    %40 = vector.broadcast %cst_19 : f32 to vector<16x16xf32>
    %41 = arith.cmpf ogt, %39, %40 : vector<16x16xf32>
    %cst_20 = arith.constant 2.000000e-01 : f32
    %42 = vector.broadcast %cst_20 : f32 to vector<16x16xf32>
    %43 = arith.mulf %42, %39 : vector<16x16xf32>
    %44 = arith.select %41, %39, %43 : vector<16x16xi1>, vector<16x16xf32>
    %45 = arith.addf %44, %1 : vector<16x16xf32>
    %cst_21 = arith.constant dense<0xFF800000> : vector<16xf32>
    %46 = vector.multi_reduction <maximumf>, %45, %cst_21 [1] : vector<16x16xf32> to vector<16xf32>
    %47 = vector.shape_cast %46 : vector<16xf32> to vector<16x1xf32>
    %48 = vector.broadcast %47 : vector<16x1xf32> to vector<16x16xf32>
    %49 = arith.subf %45, %48 : vector<16x16xf32>
    %50 = math.exp %49 : vector<16x16xf32>
    %cst_22 = arith.constant dense<0.000000e+00> : vector<16xf32>
    %51 = vector.multi_reduction <add>, %50, %cst_22 [1] : vector<16x16xf32> to vector<16xf32>
    %52 = vector.shape_cast %51 : vector<16xf32> to vector<16x1xf32>
    %53 = tpu.reciprocal %52 {approx = true} : vector<16x1xf32> -> vector<16x1xf32>
    %54 = vector.broadcast %53 : vector<16x1xf32> to vector<16x16xf32>
    %55 = arith.mulf %50, %54 : vector<16x16xf32>
    %56 = vector.extract_strided_slice %11 {offsets = [0, 32], sizes = [16, 32], strides = [1, 1]} : vector<16x64xf32> to vector<16x32xf32>
    %cst_23 = arith.constant dense<0.000000e+00> : vector<16x32xf32>
    %57 = tpu.matmul %55, %56, %cst_23 {dimension_numbers = #tpu.dot_dimension_numbers<[1], [0], [0], [1], [0, 0, 1, 1], [], []>} : vector<16x16xf32>, vector<16x32xf32>, vector<16x32xf32> -> vector<16x32xf32>
    %58 = tpu.concatenate %34, %57 in 1 : vector<16x32xf32>, vector<16x32xf32> -> vector<16x64xf32>
    %59 = vector.broadcast %8 : vector<1x64xf32> to vector<16x64xf32>
    %60 = arith.addf %58, %59 : vector<16x64xf32>
    %c0_24 = arith.constant 0 : index
    %c0_25 = arith.constant 0 : index
    %61 = vector.load %arg4[%c0_24, %c0_25] : memref<8x16xf32, #tpu.memory_space<vmem>>, vector<8x16xf32>
    %cst_26 = arith.constant dense<0.000000e+00> : vector<8x64xf32>
    %62 = tpu.matmul %61, %60, %cst_26 {dimension_numbers = #tpu.dot_dimension_numbers<[1], [0], [0], [1], [0, 0, 1, 1], [], []>} : vector<8x16xf32>, vector<16x64xf32>, vector<8x64xf32> -> vector<8x64xf32>
    %c0_27 = arith.constant 0 : index
    %c0_28 = arith.constant 0 : index
    %63 = vector.load %arg5[%c0_27, %c0_28] : memref<8x16xf32, #tpu.memory_space<vmem>>, vector<8x16xf32>
    %cst_29 = arith.constant dense<0.000000e+00> : vector<8x64xf32>
    %64 = tpu.matmul %63, %60, %cst_29 {dimension_numbers = #tpu.dot_dimension_numbers<[1], [0], [0], [1], [0, 0, 1, 1], [], []>} : vector<8x16xf32>, vector<16x64xf32>, vector<8x64xf32> -> vector<8x64xf32>
    %65 = arith.maximumf %62, %64 : vector<8x64xf32>
    %c0_30 = arith.constant 0 : index
    %c0_31 = arith.constant 0 : index
    %66 = vector.load %arg12[%c0_30, %c0_31] : memref<64x132xf32, #tpu.memory_space<vmem>>, vector<64x132xf32>
    %c0_32 = arith.constant 0 : index
    %c0_33 = arith.constant 0 : index
    %67 = vector.load %arg13[%c0_32, %c0_33] : memref<1x128xf32, #tpu.memory_space<vmem>>, vector<1x128xf32>
    %cst_34 = arith.constant 1.000000e+00 : f32
    %68 = vector.broadcast %cst_34 : f32 to vector<8x1xf32>
    %cst_35 = arith.constant dense<0.000000e+00> : vector<8x132xf32>
    %69 = tpu.matmul %65, %66, %cst_35 {dimension_numbers = #tpu.dot_dimension_numbers<[1], [0], [0], [1], [0, 0, 1, 1], [], []>} : vector<8x64xf32>, vector<64x132xf32>, vector<8x132xf32> -> vector<8x132xf32>
    %70 = vector.extract_strided_slice %69 {offsets = [0, 0], sizes = [8, 128], strides = [1, 1]} : vector<8x132xf32> to vector<8x128xf32>
    %71 = vector.extract_strided_slice %69 {offsets = [0, 128], sizes = [8, 1], strides = [1, 1]} : vector<8x132xf32> to vector<8x1xf32>
    %72 = vector.extract_strided_slice %69 {offsets = [0, 130], sizes = [8, 1], strides = [1, 1]} : vector<8x132xf32> to vector<8x1xf32>
    %cst_36 = arith.constant dense<0.000000e+00> : vector<8x8xf32>
    %73 = tpu.matmul %68, %71, %cst_36 {dimension_numbers = #tpu.dot_dimension_numbers<[1], [1], [0], [0], [0, 0, 1, 0], [], []>} : vector<8x1xf32>, vector<8x1xf32>, vector<8x8xf32> -> vector<8x8xf32>
    %74 = vector.broadcast %72 : vector<8x1xf32> to vector<8x8xf32>
    %75 = arith.addf %74, %73 : vector<8x8xf32>
    %cst_37 = arith.constant 0.000000e+00 : f32
    %76 = vector.broadcast %cst_37 : f32 to vector<8x8xf32>
    %77 = arith.cmpf ogt, %75, %76 : vector<8x8xf32>
    %cst_38 = arith.constant 2.000000e-01 : f32
    %78 = vector.broadcast %cst_38 : f32 to vector<8x8xf32>
    %79 = arith.mulf %78, %75 : vector<8x8xf32>
    %80 = arith.select %77, %75, %79 : vector<8x8xi1>, vector<8x8xf32>
    %81 = arith.addf %80, %3 : vector<8x8xf32>
    %cst_39 = arith.constant dense<0xFF800000> : vector<8xf32>
    %82 = vector.multi_reduction <maximumf>, %81, %cst_39 [1] : vector<8x8xf32> to vector<8xf32>
    %83 = vector.shape_cast %82 : vector<8xf32> to vector<8x1xf32>
    %84 = vector.broadcast %83 : vector<8x1xf32> to vector<8x8xf32>
    %85 = arith.subf %81, %84 : vector<8x8xf32>
    %86 = math.exp %85 : vector<8x8xf32>
    %cst_40 = arith.constant dense<0.000000e+00> : vector<8xf32>
    %87 = vector.multi_reduction <add>, %86, %cst_40 [1] : vector<8x8xf32> to vector<8xf32>
    %88 = vector.shape_cast %87 : vector<8xf32> to vector<8x1xf32>
    %89 = tpu.reciprocal %88 {approx = true} : vector<8x1xf32> -> vector<8x1xf32>
    %90 = vector.broadcast %89 : vector<8x1xf32> to vector<8x8xf32>
    %91 = arith.mulf %86, %90 : vector<8x8xf32>
    %92 = vector.extract_strided_slice %70 {offsets = [0, 0], sizes = [8, 64], strides = [1, 1]} : vector<8x128xf32> to vector<8x64xf32>
    %cst_41 = arith.constant dense<0.000000e+00> : vector<8x64xf32>
    %93 = tpu.matmul %91, %92, %cst_41 {dimension_numbers = #tpu.dot_dimension_numbers<[1], [0], [0], [1], [0, 0, 1, 1], [], []>} : vector<8x8xf32>, vector<8x64xf32>, vector<8x64xf32> -> vector<8x64xf32>
    %94 = vector.extract_strided_slice %69 {offsets = [0, 129], sizes = [8, 1], strides = [1, 1]} : vector<8x132xf32> to vector<8x1xf32>
    %95 = vector.extract_strided_slice %69 {offsets = [0, 131], sizes = [8, 1], strides = [1, 1]} : vector<8x132xf32> to vector<8x1xf32>
    %cst_42 = arith.constant dense<0.000000e+00> : vector<8x8xf32>
    %96 = tpu.matmul %68, %94, %cst_42 {dimension_numbers = #tpu.dot_dimension_numbers<[1], [1], [0], [0], [0, 0, 1, 0], [], []>} : vector<8x1xf32>, vector<8x1xf32>, vector<8x8xf32> -> vector<8x8xf32>
    %97 = vector.broadcast %95 : vector<8x1xf32> to vector<8x8xf32>
    %98 = arith.addf %97, %96 : vector<8x8xf32>
    %cst_43 = arith.constant 0.000000e+00 : f32
    %99 = vector.broadcast %cst_43 : f32 to vector<8x8xf32>
    %100 = arith.cmpf ogt, %98, %99 : vector<8x8xf32>
    %cst_44 = arith.constant 2.000000e-01 : f32
    %101 = vector.broadcast %cst_44 : f32 to vector<8x8xf32>
    %102 = arith.mulf %101, %98 : vector<8x8xf32>
    %103 = arith.select %100, %98, %102 : vector<8x8xi1>, vector<8x8xf32>
    %104 = arith.addf %103, %3 : vector<8x8xf32>
    %cst_45 = arith.constant dense<0xFF800000> : vector<8xf32>
    %105 = vector.multi_reduction <maximumf>, %104, %cst_45 [1] : vector<8x8xf32> to vector<8xf32>
    %106 = vector.shape_cast %105 : vector<8xf32> to vector<8x1xf32>
    %107 = vector.broadcast %106 : vector<8x1xf32> to vector<8x8xf32>
    %108 = arith.subf %104, %107 : vector<8x8xf32>
    %109 = math.exp %108 : vector<8x8xf32>
    %cst_46 = arith.constant dense<0.000000e+00> : vector<8xf32>
    %110 = vector.multi_reduction <add>, %109, %cst_46 [1] : vector<8x8xf32> to vector<8xf32>
    %111 = vector.shape_cast %110 : vector<8xf32> to vector<8x1xf32>
    %112 = tpu.reciprocal %111 {approx = true} : vector<8x1xf32> -> vector<8x1xf32>
    %113 = vector.broadcast %112 : vector<8x1xf32> to vector<8x8xf32>
    %114 = arith.mulf %109, %113 : vector<8x8xf32>
    %115 = vector.extract_strided_slice %70 {offsets = [0, 64], sizes = [8, 64], strides = [1, 1]} : vector<8x128xf32> to vector<8x64xf32>
    %cst_47 = arith.constant dense<0.000000e+00> : vector<8x64xf32>
    %116 = tpu.matmul %114, %115, %cst_47 {dimension_numbers = #tpu.dot_dimension_numbers<[1], [0], [0], [1], [0, 0, 1, 1], [], []>} : vector<8x8xf32>, vector<8x64xf32>, vector<8x64xf32> -> vector<8x64xf32>
    %117 = tpu.concatenate %93, %116 in 1 : vector<8x64xf32>, vector<8x64xf32> -> vector<8x128xf32>
    %118 = vector.broadcast %67 : vector<1x128xf32> to vector<8x128xf32>
    %119 = arith.addf %117, %118 : vector<8x128xf32>
    %c0_48 = arith.constant 0 : index
    %c0_49 = arith.constant 0 : index
    %120 = vector.load %arg6[%c0_48, %c0_49] : memref<4x8xf32, #tpu.memory_space<vmem>>, vector<4x8xf32>
    %cst_50 = arith.constant dense<0.000000e+00> : vector<4x128xf32>
    %121 = tpu.matmul %120, %119, %cst_50 {dimension_numbers = #tpu.dot_dimension_numbers<[1], [0], [0], [1], [0, 0, 1, 1], [], []>} : vector<4x8xf32>, vector<8x128xf32>, vector<4x128xf32> -> vector<4x128xf32>
    %c0_51 = arith.constant 0 : index
    %c0_52 = arith.constant 0 : index
    %122 = vector.load %arg7[%c0_51, %c0_52] : memref<4x8xf32, #tpu.memory_space<vmem>>, vector<4x8xf32>
    %cst_53 = arith.constant dense<0.000000e+00> : vector<4x128xf32>
    %123 = tpu.matmul %122, %119, %cst_53 {dimension_numbers = #tpu.dot_dimension_numbers<[1], [0], [0], [1], [0, 0, 1, 1], [], []>} : vector<4x8xf32>, vector<8x128xf32>, vector<4x128xf32> -> vector<4x128xf32>
    %124 = arith.maximumf %121, %123 : vector<4x128xf32>
    %c0_54 = arith.constant 0 : index
    %c0_55 = arith.constant 0 : index
    %125 = vector.load %arg14[%c0_54, %c0_55] : memref<128x260xf32, #tpu.memory_space<vmem>>, vector<128x260xf32>
    %c0_56 = arith.constant 0 : index
    %c0_57 = arith.constant 0 : index
    %126 = vector.load %arg15[%c0_56, %c0_57] : memref<1x256xf32, #tpu.memory_space<vmem>>, vector<1x256xf32>
    %cst_58 = arith.constant 1.000000e+00 : f32
    %127 = vector.broadcast %cst_58 : f32 to vector<4x1xf32>
    %cst_59 = arith.constant dense<0.000000e+00> : vector<4x260xf32>
    %128 = tpu.matmul %124, %125, %cst_59 {dimension_numbers = #tpu.dot_dimension_numbers<[1], [0], [0], [1], [0, 0, 1, 1], [], []>} : vector<4x128xf32>, vector<128x260xf32>, vector<4x260xf32> -> vector<4x260xf32>
    %129 = vector.extract_strided_slice %128 {offsets = [0, 0], sizes = [4, 256], strides = [1, 1]} : vector<4x260xf32> to vector<4x256xf32>
    %130 = vector.extract_strided_slice %128 {offsets = [0, 256], sizes = [4, 1], strides = [1, 1]} : vector<4x260xf32> to vector<4x1xf32>
    %131 = vector.extract_strided_slice %128 {offsets = [0, 258], sizes = [4, 1], strides = [1, 1]} : vector<4x260xf32> to vector<4x1xf32>
    %cst_60 = arith.constant dense<0.000000e+00> : vector<4x4xf32>
    %132 = tpu.matmul %127, %130, %cst_60 {dimension_numbers = #tpu.dot_dimension_numbers<[1], [1], [0], [0], [0, 0, 1, 0], [], []>} : vector<4x1xf32>, vector<4x1xf32>, vector<4x4xf32> -> vector<4x4xf32>
    %133 = vector.broadcast %131 : vector<4x1xf32> to vector<4x4xf32>
    %134 = arith.addf %133, %132 : vector<4x4xf32>
    %cst_61 = arith.constant 0.000000e+00 : f32
    %135 = vector.broadcast %cst_61 : f32 to vector<4x4xf32>
    %136 = arith.cmpf ogt, %134, %135 : vector<4x4xf32>
    %cst_62 = arith.constant 2.000000e-01 : f32
    %137 = vector.broadcast %cst_62 : f32 to vector<4x4xf32>
    %138 = arith.mulf %137, %134 : vector<4x4xf32>
    %139 = arith.select %136, %134, %138 : vector<4x4xi1>, vector<4x4xf32>
    %140 = arith.addf %139, %5 : vector<4x4xf32>
    %cst_63 = arith.constant dense<0xFF800000> : vector<4xf32>
    %141 = vector.multi_reduction <maximumf>, %140, %cst_63 [1] : vector<4x4xf32> to vector<4xf32>
    %142 = vector.shape_cast %141 : vector<4xf32> to vector<4x1xf32>
    %143 = vector.broadcast %142 : vector<4x1xf32> to vector<4x4xf32>
    %144 = arith.subf %140, %143 : vector<4x4xf32>
    %145 = math.exp %144 : vector<4x4xf32>
    %cst_64 = arith.constant dense<0.000000e+00> : vector<4xf32>
    %146 = vector.multi_reduction <add>, %145, %cst_64 [1] : vector<4x4xf32> to vector<4xf32>
    %147 = vector.shape_cast %146 : vector<4xf32> to vector<4x1xf32>
    %148 = tpu.reciprocal %147 {approx = true} : vector<4x1xf32> -> vector<4x1xf32>
    %149 = vector.broadcast %148 : vector<4x1xf32> to vector<4x4xf32>
    %150 = arith.mulf %145, %149 : vector<4x4xf32>
    %151 = vector.extract_strided_slice %129 {offsets = [0, 0], sizes = [4, 128], strides = [1, 1]} : vector<4x256xf32> to vector<4x128xf32>
    %cst_65 = arith.constant dense<0.000000e+00> : vector<4x128xf32>
    %152 = tpu.matmul %150, %151, %cst_65 {dimension_numbers = #tpu.dot_dimension_numbers<[1], [0], [0], [1], [0, 0, 1, 1], [], []>} : vector<4x4xf32>, vector<4x128xf32>, vector<4x128xf32> -> vector<4x128xf32>
    %153 = vector.extract_strided_slice %128 {offsets = [0, 257], sizes = [4, 1], strides = [1, 1]} : vector<4x260xf32> to vector<4x1xf32>
    %154 = vector.extract_strided_slice %128 {offsets = [0, 259], sizes = [4, 1], strides = [1, 1]} : vector<4x260xf32> to vector<4x1xf32>
    %cst_66 = arith.constant dense<0.000000e+00> : vector<4x4xf32>
    %155 = tpu.matmul %127, %153, %cst_66 {dimension_numbers = #tpu.dot_dimension_numbers<[1], [1], [0], [0], [0, 0, 1, 0], [], []>} : vector<4x1xf32>, vector<4x1xf32>, vector<4x4xf32> -> vector<4x4xf32>
    %156 = vector.broadcast %154 : vector<4x1xf32> to vector<4x4xf32>
    %157 = arith.addf %156, %155 : vector<4x4xf32>
    %cst_67 = arith.constant 0.000000e+00 : f32
    %158 = vector.broadcast %cst_67 : f32 to vector<4x4xf32>
    %159 = arith.cmpf ogt, %157, %158 : vector<4x4xf32>
    %cst_68 = arith.constant 2.000000e-01 : f32
    %160 = vector.broadcast %cst_68 : f32 to vector<4x4xf32>
    %161 = arith.mulf %160, %157 : vector<4x4xf32>
    %162 = arith.select %159, %157, %161 : vector<4x4xi1>, vector<4x4xf32>
    %163 = arith.addf %162, %5 : vector<4x4xf32>
    %cst_69 = arith.constant dense<0xFF800000> : vector<4xf32>
    %164 = vector.multi_reduction <maximumf>, %163, %cst_69 [1] : vector<4x4xf32> to vector<4xf32>
    %165 = vector.shape_cast %164 : vector<4xf32> to vector<4x1xf32>
    %166 = vector.broadcast %165 : vector<4x1xf32> to vector<4x4xf32>
    %167 = arith.subf %163, %166 : vector<4x4xf32>
    %168 = math.exp %167 : vector<4x4xf32>
    %cst_70 = arith.constant dense<0.000000e+00> : vector<4xf32>
    %169 = vector.multi_reduction <add>, %168, %cst_70 [1] : vector<4x4xf32> to vector<4xf32>
    %170 = vector.shape_cast %169 : vector<4xf32> to vector<4x1xf32>
    %171 = tpu.reciprocal %170 {approx = true} : vector<4x1xf32> -> vector<4x1xf32>
    %172 = vector.broadcast %171 : vector<4x1xf32> to vector<4x4xf32>
    %173 = arith.mulf %168, %172 : vector<4x4xf32>
    %174 = vector.extract_strided_slice %129 {offsets = [0, 128], sizes = [4, 128], strides = [1, 1]} : vector<4x256xf32> to vector<4x128xf32>
    %cst_71 = arith.constant dense<0.000000e+00> : vector<4x128xf32>
    %175 = tpu.matmul %173, %174, %cst_71 {dimension_numbers = #tpu.dot_dimension_numbers<[1], [0], [0], [1], [0, 0, 1, 1], [], []>} : vector<4x4xf32>, vector<4x128xf32>, vector<4x128xf32> -> vector<4x128xf32>
    %176 = tpu.concatenate %152, %175 in 1 : vector<4x128xf32>, vector<4x128xf32> -> vector<4x256xf32>
    %177 = vector.broadcast %126 : vector<1x256xf32> to vector<4x256xf32>
    %178 = arith.addf %176, %177 : vector<4x256xf32>
    %c0_72 = arith.constant 0 : index
    %c0_73 = arith.constant 0 : index
    %179 = vector.load %arg16[%c0_72, %c0_73] : memref<256x260xf32, #tpu.memory_space<vmem>>, vector<256x260xf32>
    %c0_74 = arith.constant 0 : index
    %c0_75 = arith.constant 0 : index
    %180 = vector.load %arg17[%c0_74, %c0_75] : memref<1x256xf32, #tpu.memory_space<vmem>>, vector<1x256xf32>
    %cst_76 = arith.constant 1.000000e+00 : f32
    %181 = vector.broadcast %cst_76 : f32 to vector<4x1xf32>
    %cst_77 = arith.constant dense<0.000000e+00> : vector<4x260xf32>
    %182 = tpu.matmul %178, %179, %cst_77 {dimension_numbers = #tpu.dot_dimension_numbers<[1], [0], [0], [1], [0, 0, 1, 1], [], []>} : vector<4x256xf32>, vector<256x260xf32>, vector<4x260xf32> -> vector<4x260xf32>
    %183 = vector.extract_strided_slice %182 {offsets = [0, 0], sizes = [4, 256], strides = [1, 1]} : vector<4x260xf32> to vector<4x256xf32>
    %184 = vector.extract_strided_slice %182 {offsets = [0, 256], sizes = [4, 1], strides = [1, 1]} : vector<4x260xf32> to vector<4x1xf32>
    %185 = vector.extract_strided_slice %182 {offsets = [0, 258], sizes = [4, 1], strides = [1, 1]} : vector<4x260xf32> to vector<4x1xf32>
    %cst_78 = arith.constant dense<0.000000e+00> : vector<4x4xf32>
    %186 = tpu.matmul %181, %184, %cst_78 {dimension_numbers = #tpu.dot_dimension_numbers<[1], [1], [0], [0], [0, 0, 1, 0], [], []>} : vector<4x1xf32>, vector<4x1xf32>, vector<4x4xf32> -> vector<4x4xf32>
    %187 = vector.broadcast %185 : vector<4x1xf32> to vector<4x4xf32>
    %188 = arith.addf %187, %186 : vector<4x4xf32>
    %cst_79 = arith.constant 0.000000e+00 : f32
    %189 = vector.broadcast %cst_79 : f32 to vector<4x4xf32>
    %190 = arith.cmpf ogt, %188, %189 : vector<4x4xf32>
    %cst_80 = arith.constant 2.000000e-01 : f32
    %191 = vector.broadcast %cst_80 : f32 to vector<4x4xf32>
    %192 = arith.mulf %191, %188 : vector<4x4xf32>
    %193 = arith.select %190, %188, %192 : vector<4x4xi1>, vector<4x4xf32>
    %194 = arith.addf %193, %5 : vector<4x4xf32>
    %cst_81 = arith.constant dense<0xFF800000> : vector<4xf32>
    %195 = vector.multi_reduction <maximumf>, %194, %cst_81 [1] : vector<4x4xf32> to vector<4xf32>
    %196 = vector.shape_cast %195 : vector<4xf32> to vector<4x1xf32>
    %197 = vector.broadcast %196 : vector<4x1xf32> to vector<4x4xf32>
    %198 = arith.subf %194, %197 : vector<4x4xf32>
    %199 = math.exp %198 : vector<4x4xf32>
    %cst_82 = arith.constant dense<0.000000e+00> : vector<4xf32>
    %200 = vector.multi_reduction <add>, %199, %cst_82 [1] : vector<4x4xf32> to vector<4xf32>
    %201 = vector.shape_cast %200 : vector<4xf32> to vector<4x1xf32>
    %202 = tpu.reciprocal %201 {approx = true} : vector<4x1xf32> -> vector<4x1xf32>
    %203 = vector.broadcast %202 : vector<4x1xf32> to vector<4x4xf32>
    %204 = arith.mulf %199, %203 : vector<4x4xf32>
    %205 = vector.extract_strided_slice %183 {offsets = [0, 0], sizes = [4, 128], strides = [1, 1]} : vector<4x256xf32> to vector<4x128xf32>
    %cst_83 = arith.constant dense<0.000000e+00> : vector<4x128xf32>
    %206 = tpu.matmul %204, %205, %cst_83 {dimension_numbers = #tpu.dot_dimension_numbers<[1], [0], [0], [1], [0, 0, 1, 1], [], []>} : vector<4x4xf32>, vector<4x128xf32>, vector<4x128xf32> -> vector<4x128xf32>
    %207 = vector.extract_strided_slice %182 {offsets = [0, 257], sizes = [4, 1], strides = [1, 1]} : vector<4x260xf32> to vector<4x1xf32>
    %208 = vector.extract_strided_slice %182 {offsets = [0, 259], sizes = [4, 1], strides = [1, 1]} : vector<4x260xf32> to vector<4x1xf32>
    %cst_84 = arith.constant dense<0.000000e+00> : vector<4x4xf32>
    %209 = tpu.matmul %181, %207, %cst_84 {dimension_numbers = #tpu.dot_dimension_numbers<[1], [1], [0], [0], [0, 0, 1, 0], [], []>} : vector<4x1xf32>, vector<4x1xf32>, vector<4x4xf32> -> vector<4x4xf32>
    %210 = vector.broadcast %208 : vector<4x1xf32> to vector<4x4xf32>
    %211 = arith.addf %210, %209 : vector<4x4xf32>
    %cst_85 = arith.constant 0.000000e+00 : f32
    %212 = vector.broadcast %cst_85 : f32 to vector<4x4xf32>
    %213 = arith.cmpf ogt, %211, %212 : vector<4x4xf32>
    %cst_86 = arith.constant 2.000000e-01 : f32
    %214 = vector.broadcast %cst_86 : f32 to vector<4x4xf32>
    %215 = arith.mulf %214, %211 : vector<4x4xf32>
    %216 = arith.select %213, %211, %215 : vector<4x4xi1>, vector<4x4xf32>
    %217 = arith.addf %216, %5 : vector<4x4xf32>
    %cst_87 = arith.constant dense<0xFF800000> : vector<4xf32>
    %218 = vector.multi_reduction <maximumf>, %217, %cst_87 [1] : vector<4x4xf32> to vector<4xf32>
    %219 = vector.shape_cast %218 : vector<4xf32> to vector<4x1xf32>
    %220 = vector.broadcast %219 : vector<4x1xf32> to vector<4x4xf32>
    %221 = arith.subf %217, %220 : vector<4x4xf32>
    %222 = math.exp %221 : vector<4x4xf32>
    %cst_88 = arith.constant dense<0.000000e+00> : vector<4xf32>
    %223 = vector.multi_reduction <add>, %222, %cst_88 [1] : vector<4x4xf32> to vector<4xf32>
    %224 = vector.shape_cast %223 : vector<4xf32> to vector<4x1xf32>
    %225 = tpu.reciprocal %224 {approx = true} : vector<4x1xf32> -> vector<4x1xf32>
    %226 = vector.broadcast %225 : vector<4x1xf32> to vector<4x4xf32>
    %227 = arith.mulf %222, %226 : vector<4x4xf32>
    %228 = vector.extract_strided_slice %183 {offsets = [0, 128], sizes = [4, 128], strides = [1, 1]} : vector<4x256xf32> to vector<4x128xf32>
    %cst_89 = arith.constant dense<0.000000e+00> : vector<4x128xf32>
    %229 = tpu.matmul %227, %228, %cst_89 {dimension_numbers = #tpu.dot_dimension_numbers<[1], [0], [0], [1], [0, 0, 1, 1], [], []>} : vector<4x4xf32>, vector<4x128xf32>, vector<4x128xf32> -> vector<4x128xf32>
    %230 = tpu.concatenate %206, %229 in 1 : vector<4x128xf32>, vector<4x128xf32> -> vector<4x256xf32>
    %231 = vector.broadcast %180 : vector<1x256xf32> to vector<4x256xf32>
    %232 = arith.addf %230, %231 : vector<4x256xf32>
    %c0_90 = arith.constant 0 : index
    %c0_91 = arith.constant 0 : index
    %233 = vector.load %arg8[%c0_90, %c0_91] : memref<8x4xf32, #tpu.memory_space<vmem>>, vector<8x4xf32>
    %cst_92 = arith.constant dense<0.000000e+00> : vector<8x256xf32>
    %234 = tpu.matmul %233, %232, %cst_92 {dimension_numbers = #tpu.dot_dimension_numbers<[1], [0], [0], [1], [0, 0, 1, 1], [], []>} : vector<8x4xf32>, vector<4x256xf32>, vector<8x256xf32> -> vector<8x256xf32>
    %c0_93 = arith.constant 0 : index
    %c0_94 = arith.constant 0 : index
    %235 = vector.load %arg18[%c0_93, %c0_94] : memref<256x132xf32, #tpu.memory_space<vmem>>, vector<256x132xf32>
    %c0_95 = arith.constant 0 : index
    %c0_96 = arith.constant 0 : index
    %236 = vector.load %arg19[%c0_95, %c0_96] : memref<1x128xf32, #tpu.memory_space<vmem>>, vector<1x128xf32>
    %cst_97 = arith.constant 1.000000e+00 : f32
    %237 = vector.broadcast %cst_97 : f32 to vector<8x1xf32>
    %cst_98 = arith.constant dense<0.000000e+00> : vector<8x132xf32>
    %238 = tpu.matmul %234, %235, %cst_98 {dimension_numbers = #tpu.dot_dimension_numbers<[1], [0], [0], [1], [0, 0, 1, 1], [], []>} : vector<8x256xf32>, vector<256x132xf32>, vector<8x132xf32> -> vector<8x132xf32>
    %239 = vector.extract_strided_slice %238 {offsets = [0, 0], sizes = [8, 128], strides = [1, 1]} : vector<8x132xf32> to vector<8x128xf32>
    %240 = vector.extract_strided_slice %238 {offsets = [0, 128], sizes = [8, 1], strides = [1, 1]} : vector<8x132xf32> to vector<8x1xf32>
    %241 = vector.extract_strided_slice %238 {offsets = [0, 130], sizes = [8, 1], strides = [1, 1]} : vector<8x132xf32> to vector<8x1xf32>
    %cst_99 = arith.constant dense<0.000000e+00> : vector<8x8xf32>
    %242 = tpu.matmul %237, %240, %cst_99 {dimension_numbers = #tpu.dot_dimension_numbers<[1], [1], [0], [0], [0, 0, 1, 0], [], []>} : vector<8x1xf32>, vector<8x1xf32>, vector<8x8xf32> -> vector<8x8xf32>
    %243 = vector.broadcast %241 : vector<8x1xf32> to vector<8x8xf32>
    %244 = arith.addf %243, %242 : vector<8x8xf32>
    %cst_100 = arith.constant 0.000000e+00 : f32
    %245 = vector.broadcast %cst_100 : f32 to vector<8x8xf32>
    %246 = arith.cmpf ogt, %244, %245 : vector<8x8xf32>
    %cst_101 = arith.constant 2.000000e-01 : f32
    %247 = vector.broadcast %cst_101 : f32 to vector<8x8xf32>
    %248 = arith.mulf %247, %244 : vector<8x8xf32>
    %249 = arith.select %246, %244, %248 : vector<8x8xi1>, vector<8x8xf32>
    %250 = arith.addf %249, %3 : vector<8x8xf32>
    %cst_102 = arith.constant dense<0xFF800000> : vector<8xf32>
    %251 = vector.multi_reduction <maximumf>, %250, %cst_102 [1] : vector<8x8xf32> to vector<8xf32>
    %252 = vector.shape_cast %251 : vector<8xf32> to vector<8x1xf32>
    %253 = vector.broadcast %252 : vector<8x1xf32> to vector<8x8xf32>
    %254 = arith.subf %250, %253 : vector<8x8xf32>
    %255 = math.exp %254 : vector<8x8xf32>
    %cst_103 = arith.constant dense<0.000000e+00> : vector<8xf32>
    %256 = vector.multi_reduction <add>, %255, %cst_103 [1] : vector<8x8xf32> to vector<8xf32>
    %257 = vector.shape_cast %256 : vector<8xf32> to vector<8x1xf32>
    %258 = tpu.reciprocal %257 {approx = true} : vector<8x1xf32> -> vector<8x1xf32>
    %259 = vector.broadcast %258 : vector<8x1xf32> to vector<8x8xf32>
    %260 = arith.mulf %255, %259 : vector<8x8xf32>
    %261 = vector.extract_strided_slice %239 {offsets = [0, 0], sizes = [8, 64], strides = [1, 1]} : vector<8x128xf32> to vector<8x64xf32>
    %cst_104 = arith.constant dense<0.000000e+00> : vector<8x64xf32>
    %262 = tpu.matmul %260, %261, %cst_104 {dimension_numbers = #tpu.dot_dimension_numbers<[1], [0], [0], [1], [0, 0, 1, 1], [], []>} : vector<8x8xf32>, vector<8x64xf32>, vector<8x64xf32> -> vector<8x64xf32>
    %263 = vector.extract_strided_slice %238 {offsets = [0, 129], sizes = [8, 1], strides = [1, 1]} : vector<8x132xf32> to vector<8x1xf32>
    %264 = vector.extract_strided_slice %238 {offsets = [0, 131], sizes = [8, 1], strides = [1, 1]} : vector<8x132xf32> to vector<8x1xf32>
    %cst_105 = arith.constant dense<0.000000e+00> : vector<8x8xf32>
    %265 = tpu.matmul %237, %263, %cst_105 {dimension_numbers = #tpu.dot_dimension_numbers<[1], [1], [0], [0], [0, 0, 1, 0], [], []>} : vector<8x1xf32>, vector<8x1xf32>, vector<8x8xf32> -> vector<8x8xf32>
    %266 = vector.broadcast %264 : vector<8x1xf32> to vector<8x8xf32>
    %267 = arith.addf %266, %265 : vector<8x8xf32>
    %cst_106 = arith.constant 0.000000e+00 : f32
    %268 = vector.broadcast %cst_106 : f32 to vector<8x8xf32>
    %269 = arith.cmpf ogt, %267, %268 : vector<8x8xf32>
    %cst_107 = arith.constant 2.000000e-01 : f32
    %270 = vector.broadcast %cst_107 : f32 to vector<8x8xf32>
    %271 = arith.mulf %270, %267 : vector<8x8xf32>
    %272 = arith.select %269, %267, %271 : vector<8x8xi1>, vector<8x8xf32>
    %273 = arith.addf %272, %3 : vector<8x8xf32>
    %cst_108 = arith.constant dense<0xFF800000> : vector<8xf32>
    %274 = vector.multi_reduction <maximumf>, %273, %cst_108 [1] : vector<8x8xf32> to vector<8xf32>
    %275 = vector.shape_cast %274 : vector<8xf32> to vector<8x1xf32>
    %276 = vector.broadcast %275 : vector<8x1xf32> to vector<8x8xf32>
    %277 = arith.subf %273, %276 : vector<8x8xf32>
    %278 = math.exp %277 : vector<8x8xf32>
    %cst_109 = arith.constant dense<0.000000e+00> : vector<8xf32>
    %279 = vector.multi_reduction <add>, %278, %cst_109 [1] : vector<8x8xf32> to vector<8xf32>
    %280 = vector.shape_cast %279 : vector<8xf32> to vector<8x1xf32>
    %281 = tpu.reciprocal %280 {approx = true} : vector<8x1xf32> -> vector<8x1xf32>
    %282 = vector.broadcast %281 : vector<8x1xf32> to vector<8x8xf32>
    %283 = arith.mulf %278, %282 : vector<8x8xf32>
    %284 = vector.extract_strided_slice %239 {offsets = [0, 64], sizes = [8, 64], strides = [1, 1]} : vector<8x128xf32> to vector<8x64xf32>
    %cst_110 = arith.constant dense<0.000000e+00> : vector<8x64xf32>
    %285 = tpu.matmul %283, %284, %cst_110 {dimension_numbers = #tpu.dot_dimension_numbers<[1], [0], [0], [1], [0, 0, 1, 1], [], []>} : vector<8x8xf32>, vector<8x64xf32>, vector<8x64xf32> -> vector<8x64xf32>
    %286 = tpu.concatenate %262, %285 in 1 : vector<8x64xf32>, vector<8x64xf32> -> vector<8x128xf32>
    %287 = vector.broadcast %236 : vector<1x128xf32> to vector<8x128xf32>
    %288 = arith.addf %286, %287 : vector<8x128xf32>
    %289 = tpu.concatenate %119, %288 in 1 : vector<8x128xf32>, vector<8x128xf32> -> vector<8x256xf32>
    %c0_111 = arith.constant 0 : index
    %c0_112 = arith.constant 0 : index
    %290 = vector.load %arg20[%c0_111, %c0_112] : memref<256x132xf32, #tpu.memory_space<vmem>>, vector<256x132xf32>
    %c0_113 = arith.constant 0 : index
    %c0_114 = arith.constant 0 : index
    %291 = vector.load %arg21[%c0_113, %c0_114] : memref<1x128xf32, #tpu.memory_space<vmem>>, vector<1x128xf32>
    %cst_115 = arith.constant 1.000000e+00 : f32
    %292 = vector.broadcast %cst_115 : f32 to vector<8x1xf32>
    %cst_116 = arith.constant dense<0.000000e+00> : vector<8x132xf32>
    %293 = tpu.matmul %289, %290, %cst_116 {dimension_numbers = #tpu.dot_dimension_numbers<[1], [0], [0], [1], [0, 0, 1, 1], [], []>} : vector<8x256xf32>, vector<256x132xf32>, vector<8x132xf32> -> vector<8x132xf32>
    %294 = vector.extract_strided_slice %293 {offsets = [0, 0], sizes = [8, 128], strides = [1, 1]} : vector<8x132xf32> to vector<8x128xf32>
    %295 = vector.extract_strided_slice %293 {offsets = [0, 128], sizes = [8, 1], strides = [1, 1]} : vector<8x132xf32> to vector<8x1xf32>
    %296 = vector.extract_strided_slice %293 {offsets = [0, 130], sizes = [8, 1], strides = [1, 1]} : vector<8x132xf32> to vector<8x1xf32>
    %cst_117 = arith.constant dense<0.000000e+00> : vector<8x8xf32>
    %297 = tpu.matmul %292, %295, %cst_117 {dimension_numbers = #tpu.dot_dimension_numbers<[1], [1], [0], [0], [0, 0, 1, 0], [], []>} : vector<8x1xf32>, vector<8x1xf32>, vector<8x8xf32> -> vector<8x8xf32>
    %298 = vector.broadcast %296 : vector<8x1xf32> to vector<8x8xf32>
    %299 = arith.addf %298, %297 : vector<8x8xf32>
    %cst_118 = arith.constant 0.000000e+00 : f32
    %300 = vector.broadcast %cst_118 : f32 to vector<8x8xf32>
    %301 = arith.cmpf ogt, %299, %300 : vector<8x8xf32>
    %cst_119 = arith.constant 2.000000e-01 : f32
    %302 = vector.broadcast %cst_119 : f32 to vector<8x8xf32>
    %303 = arith.mulf %302, %299 : vector<8x8xf32>
    %304 = arith.select %301, %299, %303 : vector<8x8xi1>, vector<8x8xf32>
    %305 = arith.addf %304, %3 : vector<8x8xf32>
    %cst_120 = arith.constant dense<0xFF800000> : vector<8xf32>
    %306 = vector.multi_reduction <maximumf>, %305, %cst_120 [1] : vector<8x8xf32> to vector<8xf32>
    %307 = vector.shape_cast %306 : vector<8xf32> to vector<8x1xf32>
    %308 = vector.broadcast %307 : vector<8x1xf32> to vector<8x8xf32>
    %309 = arith.subf %305, %308 : vector<8x8xf32>
    %310 = math.exp %309 : vector<8x8xf32>
    %cst_121 = arith.constant dense<0.000000e+00> : vector<8xf32>
    %311 = vector.multi_reduction <add>, %310, %cst_121 [1] : vector<8x8xf32> to vector<8xf32>
    %312 = vector.shape_cast %311 : vector<8xf32> to vector<8x1xf32>
    %313 = tpu.reciprocal %312 {approx = true} : vector<8x1xf32> -> vector<8x1xf32>
    %314 = vector.broadcast %313 : vector<8x1xf32> to vector<8x8xf32>
    %315 = arith.mulf %310, %314 : vector<8x8xf32>
    %316 = vector.extract_strided_slice %294 {offsets = [0, 0], sizes = [8, 64], strides = [1, 1]} : vector<8x128xf32> to vector<8x64xf32>
    %cst_122 = arith.constant dense<0.000000e+00> : vector<8x64xf32>
    %317 = tpu.matmul %315, %316, %cst_122 {dimension_numbers = #tpu.dot_dimension_numbers<[1], [0], [0], [1], [0, 0, 1, 1], [], []>} : vector<8x8xf32>, vector<8x64xf32>, vector<8x64xf32> -> vector<8x64xf32>
    %318 = vector.extract_strided_slice %293 {offsets = [0, 129], sizes = [8, 1], strides = [1, 1]} : vector<8x132xf32> to vector<8x1xf32>
    %319 = vector.extract_strided_slice %293 {offsets = [0, 131], sizes = [8, 1], strides = [1, 1]} : vector<8x132xf32> to vector<8x1xf32>
    %cst_123 = arith.constant dense<0.000000e+00> : vector<8x8xf32>
    %320 = tpu.matmul %292, %318, %cst_123 {dimension_numbers = #tpu.dot_dimension_numbers<[1], [1], [0], [0], [0, 0, 1, 0], [], []>} : vector<8x1xf32>, vector<8x1xf32>, vector<8x8xf32> -> vector<8x8xf32>
    %321 = vector.broadcast %319 : vector<8x1xf32> to vector<8x8xf32>
    %322 = arith.addf %321, %320 : vector<8x8xf32>
    %cst_124 = arith.constant 0.000000e+00 : f32
    %323 = vector.broadcast %cst_124 : f32 to vector<8x8xf32>
    %324 = arith.cmpf ogt, %322, %323 : vector<8x8xf32>
    %cst_125 = arith.constant 2.000000e-01 : f32
    %325 = vector.broadcast %cst_125 : f32 to vector<8x8xf32>
    %326 = arith.mulf %325, %322 : vector<8x8xf32>
    %327 = arith.select %324, %322, %326 : vector<8x8xi1>, vector<8x8xf32>
    %328 = arith.addf %327, %3 : vector<8x8xf32>
    %cst_126 = arith.constant dense<0xFF800000> : vector<8xf32>
    %329 = vector.multi_reduction <maximumf>, %328, %cst_126 [1] : vector<8x8xf32> to vector<8xf32>
    %330 = vector.shape_cast %329 : vector<8xf32> to vector<8x1xf32>
    %331 = vector.broadcast %330 : vector<8x1xf32> to vector<8x8xf32>
    %332 = arith.subf %328, %331 : vector<8x8xf32>
    %333 = math.exp %332 : vector<8x8xf32>
    %cst_127 = arith.constant dense<0.000000e+00> : vector<8xf32>
    %334 = vector.multi_reduction <add>, %333, %cst_127 [1] : vector<8x8xf32> to vector<8xf32>
    %335 = vector.shape_cast %334 : vector<8xf32> to vector<8x1xf32>
    %336 = tpu.reciprocal %335 {approx = true} : vector<8x1xf32> -> vector<8x1xf32>
    %337 = vector.broadcast %336 : vector<8x1xf32> to vector<8x8xf32>
    %338 = arith.mulf %333, %337 : vector<8x8xf32>
    %339 = vector.extract_strided_slice %294 {offsets = [0, 64], sizes = [8, 64], strides = [1, 1]} : vector<8x128xf32> to vector<8x64xf32>
    %cst_128 = arith.constant dense<0.000000e+00> : vector<8x64xf32>
    %340 = tpu.matmul %338, %339, %cst_128 {dimension_numbers = #tpu.dot_dimension_numbers<[1], [0], [0], [1], [0, 0, 1, 1], [], []>} : vector<8x8xf32>, vector<8x64xf32>, vector<8x64xf32> -> vector<8x64xf32>
    %341 = tpu.concatenate %317, %340 in 1 : vector<8x64xf32>, vector<8x64xf32> -> vector<8x128xf32>
    %342 = vector.broadcast %291 : vector<1x128xf32> to vector<8x128xf32>
    %343 = arith.addf %341, %342 : vector<8x128xf32>
    %c0_129 = arith.constant 0 : index
    %c0_130 = arith.constant 0 : index
    %344 = vector.load %arg9[%c0_129, %c0_130] : memref<16x8xf32, #tpu.memory_space<vmem>>, vector<16x8xf32>
    %cst_131 = arith.constant dense<0.000000e+00> : vector<16x128xf32>
    %345 = tpu.matmul %344, %343, %cst_131 {dimension_numbers = #tpu.dot_dimension_numbers<[1], [0], [0], [1], [0, 0, 1, 1], [], []>} : vector<16x8xf32>, vector<8x128xf32>, vector<16x128xf32> -> vector<16x128xf32>
    %c0_132 = arith.constant 0 : index
    %c0_133 = arith.constant 0 : index
    %346 = vector.load %arg22[%c0_132, %c0_133] : memref<128x68xf32, #tpu.memory_space<vmem>>, vector<128x68xf32>
    %c0_134 = arith.constant 0 : index
    %c0_135 = arith.constant 0 : index
    %347 = vector.load %arg23[%c0_134, %c0_135] : memref<1x64xf32, #tpu.memory_space<vmem>>, vector<1x64xf32>
    %cst_136 = arith.constant 1.000000e+00 : f32
    %348 = vector.broadcast %cst_136 : f32 to vector<16x1xf32>
    %cst_137 = arith.constant dense<0.000000e+00> : vector<16x68xf32>
    %349 = tpu.matmul %345, %346, %cst_137 {dimension_numbers = #tpu.dot_dimension_numbers<[1], [0], [0], [1], [0, 0, 1, 1], [], []>} : vector<16x128xf32>, vector<128x68xf32>, vector<16x68xf32> -> vector<16x68xf32>
    %350 = vector.extract_strided_slice %349 {offsets = [0, 0], sizes = [16, 64], strides = [1, 1]} : vector<16x68xf32> to vector<16x64xf32>
    %351 = vector.extract_strided_slice %349 {offsets = [0, 64], sizes = [16, 1], strides = [1, 1]} : vector<16x68xf32> to vector<16x1xf32>
    %352 = vector.extract_strided_slice %349 {offsets = [0, 66], sizes = [16, 1], strides = [1, 1]} : vector<16x68xf32> to vector<16x1xf32>
    %cst_138 = arith.constant dense<0.000000e+00> : vector<16x16xf32>
    %353 = tpu.matmul %348, %351, %cst_138 {dimension_numbers = #tpu.dot_dimension_numbers<[1], [1], [0], [0], [0, 0, 1, 0], [], []>} : vector<16x1xf32>, vector<16x1xf32>, vector<16x16xf32> -> vector<16x16xf32>
    %354 = vector.broadcast %352 : vector<16x1xf32> to vector<16x16xf32>
    %355 = arith.addf %354, %353 : vector<16x16xf32>
    %cst_139 = arith.constant 0.000000e+00 : f32
    %356 = vector.broadcast %cst_139 : f32 to vector<16x16xf32>
    %357 = arith.cmpf ogt, %355, %356 : vector<16x16xf32>
    %cst_140 = arith.constant 2.000000e-01 : f32
    %358 = vector.broadcast %cst_140 : f32 to vector<16x16xf32>
    %359 = arith.mulf %358, %355 : vector<16x16xf32>
    %360 = arith.select %357, %355, %359 : vector<16x16xi1>, vector<16x16xf32>
    %361 = arith.addf %360, %1 : vector<16x16xf32>
    %cst_141 = arith.constant dense<0xFF800000> : vector<16xf32>
    %362 = vector.multi_reduction <maximumf>, %361, %cst_141 [1] : vector<16x16xf32> to vector<16xf32>
    %363 = vector.shape_cast %362 : vector<16xf32> to vector<16x1xf32>
    %364 = vector.broadcast %363 : vector<16x1xf32> to vector<16x16xf32>
    %365 = arith.subf %361, %364 : vector<16x16xf32>
    %366 = math.exp %365 : vector<16x16xf32>
    %cst_142 = arith.constant dense<0.000000e+00> : vector<16xf32>
    %367 = vector.multi_reduction <add>, %366, %cst_142 [1] : vector<16x16xf32> to vector<16xf32>
    %368 = vector.shape_cast %367 : vector<16xf32> to vector<16x1xf32>
    %369 = tpu.reciprocal %368 {approx = true} : vector<16x1xf32> -> vector<16x1xf32>
    %370 = vector.broadcast %369 : vector<16x1xf32> to vector<16x16xf32>
    %371 = arith.mulf %366, %370 : vector<16x16xf32>
    %372 = vector.extract_strided_slice %350 {offsets = [0, 0], sizes = [16, 32], strides = [1, 1]} : vector<16x64xf32> to vector<16x32xf32>
    %cst_143 = arith.constant dense<0.000000e+00> : vector<16x32xf32>
    %373 = tpu.matmul %371, %372, %cst_143 {dimension_numbers = #tpu.dot_dimension_numbers<[1], [0], [0], [1], [0, 0, 1, 1], [], []>} : vector<16x16xf32>, vector<16x32xf32>, vector<16x32xf32> -> vector<16x32xf32>
    %374 = vector.extract_strided_slice %349 {offsets = [0, 65], sizes = [16, 1], strides = [1, 1]} : vector<16x68xf32> to vector<16x1xf32>
    %375 = vector.extract_strided_slice %349 {offsets = [0, 67], sizes = [16, 1], strides = [1, 1]} : vector<16x68xf32> to vector<16x1xf32>
    %cst_144 = arith.constant dense<0.000000e+00> : vector<16x16xf32>
    %376 = tpu.matmul %348, %374, %cst_144 {dimension_numbers = #tpu.dot_dimension_numbers<[1], [1], [0], [0], [0, 0, 1, 0], [], []>} : vector<16x1xf32>, vector<16x1xf32>, vector<16x16xf32> -> vector<16x16xf32>
    %377 = vector.broadcast %375 : vector<16x1xf32> to vector<16x16xf32>
    %378 = arith.addf %377, %376 : vector<16x16xf32>
    %cst_145 = arith.constant 0.000000e+00 : f32
    %379 = vector.broadcast %cst_145 : f32 to vector<16x16xf32>
    %380 = arith.cmpf ogt, %378, %379 : vector<16x16xf32>
    %cst_146 = arith.constant 2.000000e-01 : f32
    %381 = vector.broadcast %cst_146 : f32 to vector<16x16xf32>
    %382 = arith.mulf %381, %378 : vector<16x16xf32>
    %383 = arith.select %380, %378, %382 : vector<16x16xi1>, vector<16x16xf32>
    %384 = arith.addf %383, %1 : vector<16x16xf32>
    %cst_147 = arith.constant dense<0xFF800000> : vector<16xf32>
    %385 = vector.multi_reduction <maximumf>, %384, %cst_147 [1] : vector<16x16xf32> to vector<16xf32>
    %386 = vector.shape_cast %385 : vector<16xf32> to vector<16x1xf32>
    %387 = vector.broadcast %386 : vector<16x1xf32> to vector<16x16xf32>
    %388 = arith.subf %384, %387 : vector<16x16xf32>
    %389 = math.exp %388 : vector<16x16xf32>
    %cst_148 = arith.constant dense<0.000000e+00> : vector<16xf32>
    %390 = vector.multi_reduction <add>, %389, %cst_148 [1] : vector<16x16xf32> to vector<16xf32>
    %391 = vector.shape_cast %390 : vector<16xf32> to vector<16x1xf32>
    %392 = tpu.reciprocal %391 {approx = true} : vector<16x1xf32> -> vector<16x1xf32>
    %393 = vector.broadcast %392 : vector<16x1xf32> to vector<16x16xf32>
    %394 = arith.mulf %389, %393 : vector<16x16xf32>
    %395 = vector.extract_strided_slice %350 {offsets = [0, 32], sizes = [16, 32], strides = [1, 1]} : vector<16x64xf32> to vector<16x32xf32>
    %cst_149 = arith.constant dense<0.000000e+00> : vector<16x32xf32>
    %396 = tpu.matmul %394, %395, %cst_149 {dimension_numbers = #tpu.dot_dimension_numbers<[1], [0], [0], [1], [0, 0, 1, 1], [], []>} : vector<16x16xf32>, vector<16x32xf32>, vector<16x32xf32> -> vector<16x32xf32>
    %397 = tpu.concatenate %373, %396 in 1 : vector<16x32xf32>, vector<16x32xf32> -> vector<16x64xf32>
    %398 = vector.broadcast %347 : vector<1x64xf32> to vector<16x64xf32>
    %399 = arith.addf %397, %398 : vector<16x64xf32>
    %400 = tpu.concatenate %60, %399 in 1 : vector<16x64xf32>, vector<16x64xf32> -> vector<16x128xf32>
    %c0_150 = arith.constant 0 : index
    %c0_151 = arith.constant 0 : index
    %401 = vector.load %arg24[%c0_150, %c0_151] : memref<128x68xf32, #tpu.memory_space<vmem>>, vector<128x68xf32>
    %c0_152 = arith.constant 0 : index
    %c0_153 = arith.constant 0 : index
    %402 = vector.load %arg25[%c0_152, %c0_153] : memref<1x64xf32, #tpu.memory_space<vmem>>, vector<1x64xf32>
    %cst_154 = arith.constant 1.000000e+00 : f32
    %403 = vector.broadcast %cst_154 : f32 to vector<16x1xf32>
    %cst_155 = arith.constant dense<0.000000e+00> : vector<16x68xf32>
    %404 = tpu.matmul %400, %401, %cst_155 {dimension_numbers = #tpu.dot_dimension_numbers<[1], [0], [0], [1], [0, 0, 1, 1], [], []>} : vector<16x128xf32>, vector<128x68xf32>, vector<16x68xf32> -> vector<16x68xf32>
    %405 = vector.extract_strided_slice %404 {offsets = [0, 0], sizes = [16, 64], strides = [1, 1]} : vector<16x68xf32> to vector<16x64xf32>
    %406 = vector.extract_strided_slice %404 {offsets = [0, 64], sizes = [16, 1], strides = [1, 1]} : vector<16x68xf32> to vector<16x1xf32>
    %407 = vector.extract_strided_slice %404 {offsets = [0, 66], sizes = [16, 1], strides = [1, 1]} : vector<16x68xf32> to vector<16x1xf32>
    %cst_156 = arith.constant dense<0.000000e+00> : vector<16x16xf32>
    %408 = tpu.matmul %403, %406, %cst_156 {dimension_numbers = #tpu.dot_dimension_numbers<[1], [1], [0], [0], [0, 0, 1, 0], [], []>} : vector<16x1xf32>, vector<16x1xf32>, vector<16x16xf32> -> vector<16x16xf32>
    %409 = vector.broadcast %407 : vector<16x1xf32> to vector<16x16xf32>
    %410 = arith.addf %409, %408 : vector<16x16xf32>
    %cst_157 = arith.constant 0.000000e+00 : f32
    %411 = vector.broadcast %cst_157 : f32 to vector<16x16xf32>
    %412 = arith.cmpf ogt, %410, %411 : vector<16x16xf32>
    %cst_158 = arith.constant 2.000000e-01 : f32
    %413 = vector.broadcast %cst_158 : f32 to vector<16x16xf32>
    %414 = arith.mulf %413, %410 : vector<16x16xf32>
    %415 = arith.select %412, %410, %414 : vector<16x16xi1>, vector<16x16xf32>
    %416 = arith.addf %415, %1 : vector<16x16xf32>
    %cst_159 = arith.constant dense<0xFF800000> : vector<16xf32>
    %417 = vector.multi_reduction <maximumf>, %416, %cst_159 [1] : vector<16x16xf32> to vector<16xf32>
    %418 = vector.shape_cast %417 : vector<16xf32> to vector<16x1xf32>
    %419 = vector.broadcast %418 : vector<16x1xf32> to vector<16x16xf32>
    %420 = arith.subf %416, %419 : vector<16x16xf32>
    %421 = math.exp %420 : vector<16x16xf32>
    %cst_160 = arith.constant dense<0.000000e+00> : vector<16xf32>
    %422 = vector.multi_reduction <add>, %421, %cst_160 [1] : vector<16x16xf32> to vector<16xf32>
    %423 = vector.shape_cast %422 : vector<16xf32> to vector<16x1xf32>
    %424 = tpu.reciprocal %423 {approx = true} : vector<16x1xf32> -> vector<16x1xf32>
    %425 = vector.broadcast %424 : vector<16x1xf32> to vector<16x16xf32>
    %426 = arith.mulf %421, %425 : vector<16x16xf32>
    %427 = vector.extract_strided_slice %405 {offsets = [0, 0], sizes = [16, 32], strides = [1, 1]} : vector<16x64xf32> to vector<16x32xf32>
    %cst_161 = arith.constant dense<0.000000e+00> : vector<16x32xf32>
    %428 = tpu.matmul %426, %427, %cst_161 {dimension_numbers = #tpu.dot_dimension_numbers<[1], [0], [0], [1], [0, 0, 1, 1], [], []>} : vector<16x16xf32>, vector<16x32xf32>, vector<16x32xf32> -> vector<16x32xf32>
    %429 = vector.extract_strided_slice %404 {offsets = [0, 65], sizes = [16, 1], strides = [1, 1]} : vector<16x68xf32> to vector<16x1xf32>
    %430 = vector.extract_strided_slice %404 {offsets = [0, 67], sizes = [16, 1], strides = [1, 1]} : vector<16x68xf32> to vector<16x1xf32>
    %cst_162 = arith.constant dense<0.000000e+00> : vector<16x16xf32>
    %431 = tpu.matmul %403, %429, %cst_162 {dimension_numbers = #tpu.dot_dimension_numbers<[1], [1], [0], [0], [0, 0, 1, 0], [], []>} : vector<16x1xf32>, vector<16x1xf32>, vector<16x16xf32> -> vector<16x16xf32>
    %432 = vector.broadcast %430 : vector<16x1xf32> to vector<16x16xf32>
    %433 = arith.addf %432, %431 : vector<16x16xf32>
    %cst_163 = arith.constant 0.000000e+00 : f32
    %434 = vector.broadcast %cst_163 : f32 to vector<16x16xf32>
    %435 = arith.cmpf ogt, %433, %434 : vector<16x16xf32>
    %cst_164 = arith.constant 2.000000e-01 : f32
    %436 = vector.broadcast %cst_164 : f32 to vector<16x16xf32>
    %437 = arith.mulf %436, %433 : vector<16x16xf32>
    %438 = arith.select %435, %433, %437 : vector<16x16xi1>, vector<16x16xf32>
    %439 = arith.addf %438, %1 : vector<16x16xf32>
    %cst_165 = arith.constant dense<0xFF800000> : vector<16xf32>
    %440 = vector.multi_reduction <maximumf>, %439, %cst_165 [1] : vector<16x16xf32> to vector<16xf32>
    %441 = vector.shape_cast %440 : vector<16xf32> to vector<16x1xf32>
    %442 = vector.broadcast %441 : vector<16x1xf32> to vector<16x16xf32>
    %443 = arith.subf %439, %442 : vector<16x16xf32>
    %444 = math.exp %443 : vector<16x16xf32>
    %cst_166 = arith.constant dense<0.000000e+00> : vector<16xf32>
    %445 = vector.multi_reduction <add>, %444, %cst_166 [1] : vector<16x16xf32> to vector<16xf32>
    %446 = vector.shape_cast %445 : vector<16xf32> to vector<16x1xf32>
    %447 = tpu.reciprocal %446 {approx = true} : vector<16x1xf32> -> vector<16x1xf32>
    %448 = vector.broadcast %447 : vector<16x1xf32> to vector<16x16xf32>
    %449 = arith.mulf %444, %448 : vector<16x16xf32>
    %450 = vector.extract_strided_slice %405 {offsets = [0, 32], sizes = [16, 32], strides = [1, 1]} : vector<16x64xf32> to vector<16x32xf32>
    %cst_167 = arith.constant dense<0.000000e+00> : vector<16x32xf32>
    %451 = tpu.matmul %449, %450, %cst_167 {dimension_numbers = #tpu.dot_dimension_numbers<[1], [0], [0], [1], [0, 0, 1, 1], [], []>} : vector<16x16xf32>, vector<16x32xf32>, vector<16x32xf32> -> vector<16x32xf32>
    %452 = tpu.concatenate %428, %451 in 1 : vector<16x32xf32>, vector<16x32xf32> -> vector<16x64xf32>
    %453 = vector.broadcast %402 : vector<1x64xf32> to vector<16x64xf32>
    %454 = arith.addf %452, %453 : vector<16x64xf32>
    %c0_168 = arith.constant 0 : index
    %c0_169 = arith.constant 0 : index
    %455 = vector.load %arg26[%c0_168, %c0_169] : memref<64x512xf32, #tpu.memory_space<vmem>>, vector<64x512xf32>
    %cst_170 = arith.constant dense<0.000000e+00> : vector<16x512xf32>
    %456 = tpu.matmul %454, %455, %cst_170 {dimension_numbers = #tpu.dot_dimension_numbers<[1], [0], [0], [1], [0, 0, 1, 1], [], []>} : vector<16x64xf32>, vector<64x512xf32>, vector<16x512xf32> -> vector<16x512xf32>
    %c0_171 = arith.constant 0 : index
    %c0_172 = arith.constant 0 : index
    %457 = vector.load %arg27[%c0_171, %c0_172] : memref<1x512xf32, #tpu.memory_space<vmem>>, vector<1x512xf32>
    %458 = vector.broadcast %457 : vector<1x512xf32> to vector<16x512xf32>
    %459 = arith.addf %456, %458 : vector<16x512xf32>
    %cst_173 = arith.constant 0.000000e+00 : f32
    %460 = vector.broadcast %cst_173 : f32 to vector<16x512xf32>
    %461 = arith.maximumf %459, %460 : vector<16x512xf32>
    %c0_174 = arith.constant 0 : index
    %c0_175 = arith.constant 0 : index
    %462 = vector.load %arg28[%c0_174, %c0_175] : memref<512x128xf32, #tpu.memory_space<vmem>>, vector<512x128xf32>
    %cst_176 = arith.constant dense<0.000000e+00> : vector<16x128xf32>
    %463 = tpu.matmul %461, %462, %cst_176 {dimension_numbers = #tpu.dot_dimension_numbers<[1], [0], [0], [1], [0, 0, 1, 1], [], []>} : vector<16x512xf32>, vector<512x128xf32>, vector<16x128xf32> -> vector<16x128xf32>
    %c0_177 = arith.constant 0 : index
    %c0_178 = arith.constant 0 : index
    %464 = vector.load %arg29[%c0_177, %c0_178] : memref<1x128xf32, #tpu.memory_space<vmem>>, vector<1x128xf32>
    %465 = vector.broadcast %464 : vector<1x128xf32> to vector<16x128xf32>
    %466 = arith.addf %463, %465 : vector<16x128xf32>
    %cst_179 = arith.constant 0.000000e+00 : f32
    %467 = vector.broadcast %cst_179 : f32 to vector<16x128xf32>
    %468 = arith.maximumf %466, %467 : vector<16x128xf32>
    %c0_180 = arith.constant 0 : index
    %c0_181 = arith.constant 0 : index
    %469 = vector.load %arg30[%c0_180, %c0_181] : memref<128x128xf32, #tpu.memory_space<vmem>>, vector<128x128xf32>
    %cst_182 = arith.constant dense<0.000000e+00> : vector<16x128xf32>
    %470 = tpu.matmul %468, %469, %cst_182 {dimension_numbers = #tpu.dot_dimension_numbers<[1], [0], [0], [1], [0, 0, 1, 1], [], []>} : vector<16x128xf32>, vector<128x128xf32>, vector<16x128xf32> -> vector<16x128xf32>
    %c0_183 = arith.constant 0 : index
    %c0_184 = arith.constant 0 : index
    %471 = vector.load %arg31[%c0_183, %c0_184] : memref<1x128xf32, #tpu.memory_space<vmem>>, vector<1x128xf32>
    %472 = vector.broadcast %471 : vector<1x128xf32> to vector<16x128xf32>
    %473 = arith.addf %470, %472 : vector<16x128xf32>
    %474 = math.tanh %473 : vector<16x128xf32>
    %475 = arith.mulf %474, %474 : vector<16x128xf32>
    %cst_185 = arith.constant dense<0.000000e+00> : vector<16xf32>
    %476 = vector.multi_reduction <add>, %475, %cst_185 [1] : vector<16x128xf32> to vector<16xf32>
    %477 = vector.shape_cast %476 : vector<16xf32> to vector<16x1xf32>
    %cst_186 = arith.constant 1.000000e-24 : f32
    %478 = vector.broadcast %cst_186 : f32 to vector<16x1xf32>
    %479 = arith.maximumf %477, %478 : vector<16x1xf32>
    %480 = math.rsqrt %479 : vector<16x1xf32>
    %481 = vector.broadcast %480 : vector<16x1xf32> to vector<16x128xf32>
    %482 = arith.mulf %474, %481 : vector<16x128xf32>
    %c0_187 = arith.constant 0 : index
    %c0_188 = arith.constant 0 : index
    %483 = vector.load %arg32[%c0_187, %c0_188] : memref<16x128xf32, #tpu.memory_space<vmem>>, vector<16x128xf32>
    tpu.vector_store %arg32[%c0_187, %c0_188], %482 {strides = array<i32>} : memref<16x128xf32, #tpu.memory_space<vmem>>, vector<16x128xf32>,
    return
  }
}

</mosaic_0001>

<bundles_post_ra>
// kernel: gatgnn_forward.1
= control target key start
LH: loop header
LB: loop body
LE: loop exit
PB: predicated region body
PF: predicated region fallthrough
CT: control target
= control target key end

     0   :  { %s6837_s3 = smov 10   ;;  %vm149_vm0 = vcmask 1045504   ;;  %vm142_vm1 = vcmask 48128   ;;  %v6838_v3 = vmov 67   ;;  %v6839_v4 = vmov 66   ;;  %s6841_s10 = smov 64   ;;  %s7847_s0 = inlined_call_operand.smem [shape: u32[33], index: -1, kind: input, shape index: {}] }
   0x1   :  { %s5311_s6 = sld [smem:[%s7847_s0 + %s6837_s3]]   ;;  %6681 = vset.pattern.permute.xlu1 %v6838_v3  ;;  %6683 = vset.pattern.permute.xlu0 %v6839_v4  ;;  %vm234_vm2 = vcmask 7168   ;;  %v6840_v9 = vmov 1.0   ;;  %s6842_s11 = smov 63   ;;  %vm335_vm8 = vcmask 130048   ;;  %vm6846_vm9 = vmmov 0  }
   0x2   :  { %s1_s9 = sld [smem:[%s7847_s0]]   ;;  %vm6905_vm3 = vmpackc.low %vm234_vm2, %vm234_vm2  ;;  %s6843_s12 = smov 1   ;;  %vm657_vm10 = vcmask 261120   ;;  %vm834_vm11 = vcmask 523264   ;;  %vm991_vm13 = vcmask 64512   ;;  %vm1696_vm15 = vcmask 1043456  }
   0x3   :  { %s6926_s15 = sld [smem:[%s7847_s0 + %s6843_s12]]   ;;  %s6844_s16 = smov 96  }
   0x4   :  { %s6848_s17 = smov 32   ;;  %s6849_s18 = smov 11  }
   0x5   :  { %s5312_s21 = sld [smem:[%s7847_s0 + %s6849_s18]]   ;;  %s6850_s22 = smov 12  }
   0x6   :  { %s6958_s25 = sld [smem:[%s7847_s0 + %s6850_s22]]   ;;  %s6851_s26 = smov 4  }
   0x7   :  { %v140_v0 = vld [vmem:[%s5311_s6] sm:$0x3f]  ;;  %s5305_s29 = sld [smem:[%s7847_s0 + %s6851_s26]]   ;;  %s6852_s30 = smov 5  }
   0x8   :  { %v138_v1 = vld [vmem:[%s1_s9] sm:$0xff]  ;;  %v139_v2 = vld [vmem:[%s1_s9 + $0x8] sm:$0xff]  ;;  %5715 = vmatprep.subr.msk.mxu1 %vm149_vm0, %v140_v0  ;;  %s5306_s3 = sld [smem:[%s7847_s0 + %s6852_s30]]   ;;  %s6854_s4 = smov 2  }
   0x9   :  { %5717 = vmatprep.mubr.msk.f32.mxu1 %vm142_vm1, %v138_v1  ;;  %5716 = vmatpush3.msk.msra.mxu1 %vm149_vm0, %v140_v0  ;;  %v135_v35 = vld [vmem:[%s6926_s15 + $0x8] sm:$0xff]  ;;  %v134_v37 = vld [vmem:[%s6926_s15] sm:$0xff]  ;;  %s7011_s7 = sld [smem:[%s7847_s0 + %s6854_s4]]   ;;  %s6855_s8 = smov 127  }
   0xa   :  { %5718 = vmatmul.mubr.msk.f32.vlgmr.msra.gmra.mrb[0].mxu1 %vm142_vm1, %v139_v2  ;;  %s6857_s9 = smov 13   ;;  %s6858_s18 = smov 14   ;;  %vm1680_vm1 = vcmask 27648  }
   0xb   :  { %5724 = vmatprep.mubr.msk.f32.mxu1 %vm234_vm2, %v6840_v9  ;;  %s5314_s14 = sld [smem:[%s7847_s0 + %s6857_s9]]   ;;  %s6859_s22 = smov 6  }
   0xc   :  { %s6860_s26 = smov 7   ;;  %s6861_s30 = smov 3  }
   0xd   :  { %s6862_s4 = smov 16   ;;  %s6863_s12 = smov 15  }
   0xe   :  { %s7158_s9 = sld [smem:[%s7847_s0 + %s6862_s4]]   ;;  %s6864_s19 = smov 17  }
   0xf   :  { %s6865_s23 = smov 18   ;;  %s6866_s27 = smov 8  }
  0x10   :  { %s6868_s4 = smov 19  }
  0xdd   :  { %v5719_v5 = vpop.f32.mrb[0].mxu1 }
  0xde   :  { %v219_v6 = vpop.f32.mrb[1].mxu1 }
  0xdf   :  { %523 = vperm.xlu1 %6681, %v219_v6   ;;  %v6894_v7 = vpack.i.bf16 %v5719_v5, %v219_v6  ;;  %v6079_v8 = vpack.c.bf16 %v5719_v5, %v219_v6 }
  0xe1   :  { %6672 = vrot.lane.b32.xlu0 %v6894_v7, %s6841_s10  ;;  %6080 = vmatprep.subr.bf16.mxu0 %v6079_v8 }
  0xe2   :  { %6082 = vmatpush3.bf16.msra.mxu0 %v6079_v8 }
  0xe3   :  { %527 = vperm.xlu1 %6681, %v5719_v5  }
  0xe5   :  { %6677 = vrot.lane.b32.xlu0 %v6894_v7, %s6842_s11 }
  0xe7   :  { %6682 = vset.pattern.permute.xlu1 %v6839_v4 }
  0xe8   :  { %322 = vperm.xlu1 %6682, %v5719_v5  }
  0xe9   :  { %318 = vperm.xlu0 %6683, %v219_v6  }
 0x153   :  { %v6673_v10 = vpop.permute.xlu0 %6672 }
 0x154   :  { %v6675_v11 = vunpack.i.h.bf16 %v6673_v10  ;;  %v6674_v12 = vunpack.i.l.bf16 %v6673_v10 }
 0x156   :  { %v6073_v14 = vpack.c.bf16 %v6675_v11, %v6674_v12 }
 0x157   :  { %v6678_v15 = vpop.permute.xlu0 %6677 }
 0x158   :  { %v6680_v16 = vunpack.i.h.bf16 %v6678_v15  ;;  %v6679_v17 = vunpack.i.l.bf16 %v6678_v15  ;;  %6075 = vmatprep.subr.msk.bf16.mxu1 %vm6905_vm3, %v6073_v14 }
 0x159   :  { %6078 = vmatpush3.bf16.xpose.msk.msra.mxu1 %vm6905_vm3, %v6073_v14 }
 0x15a   :  { %v6083_v18 = vpack.c.bf16 %v6680_v16, %v6679_v17 }
 0x15c   :  { %6085 = vmatprep.subr.msk.bf16.mxu1 %vm6905_vm3, %v6083_v18 }
 0x15e   :  { %v524_v19 = vpop.permute.xlu1 %523 }
 0x160   :  { %5725 = vmatmul.mubr.msk.f32.vlgmr.msra.gmra.mrb[2].mxu1 %vm234_vm2, %v6840_v9 }
 0x161   :  { %6088 = vmatpush3.bf16.xpose.msk.msra.mxu1 %vm6905_vm3, %v6083_v18  ;;  %5738 = vmatprep.mubr.msk.f32.mxu1 %vm234_vm2, %v6840_v9 }
 0x162   :  { %v528_v20 = vpop.permute.xlu1 %527 }
 0x167   :  { %v323_v24 = vpop.permute.xlu1 %322 }
 0x168   :  { %5739 = vmatmul.mubr.msk.f32.vlgmr.msra.gmra.mrb[4].mxu1 %vm234_vm2, %v6840_v9  ;;  %v319_v23 = vpop.permute.xlu0 %318 }
 0x233   :  { %v5726_v21 = vpop.f32.mrb[2].mxu1 }
 0x234   :  { %v308_v22 = vpop.f32.mrb[3].mxu1  ;;  %v326_v26 = vadd.f32 %v5726_v21, %v323_v24 }
 0x235   :  { %v325_v25 = vadd.f32 %v319_v23, %v308_v22 }
 0x236   :  { %v330_v31 = vmul.f32 0.2, %v326_v26  ;;  %vm328_vm5 = vcmp.gt.f32.partialorder %v326_v26, 0.0 }
 0x237   :  { %v329_v28 = vmul.f32 0.2, %v325_v25  ;;  %vm327_vm4 = vcmp.gt.f32.partialorder %v325_v25, 0.0 }
 0x238   :  { %v332_v41 = vsel %vm328_vm5, %v326_v26, %v330_v31  ;;  %v6847_v26 = vmov 0.0   ;;  %v5349_v31 = vld [vmem:[%s5312_s21] ss:$0 sm:$0xff]  ;;  %s7043_s21 = sld [smem:[%s7847_s0 + %s6858_s18]]   ;;  %vm1692_vm5 = vcmask 31744  }
 0x239   :  { %v331_v38 = vsel %vm327_vm4, %v325_v25, %v329_v28  ;;  %v334_v46 = vadd.f32 %v332_v41, %v135_v35  ;;  %v6845_v25 = vmov 0.0|0.0   ;;  %v817_v41 = vld [vmem:[%s6958_s25] sm:$0xff]  ;;  %s5316_s18 = sld [smem:[%s7847_s0 + %s6863_s12]]  }
 0x23a   :  { %v333_v44 = vadd.f32 %v331_v38, %v134_v37  ;;  %6096 = vmatprep.subr.bf16.mxu0 %v6845_v25 }
 0x23b   :  { %v5740_v27 = vpop.f32.mrb[4].mxu1  ;;  %v339_v48 = vsel %vm335_vm8, %v334_v46, -inf }
 0x23c   :  { %v531_v29 = vadd.f32 %v5740_v27, %v528_v20  ;;  %v513_v30 = vpop.f32.mrb[5].mxu1  ;;  %v336_v47 = vsel %vm335_vm8, %v333_v44, -inf }
 0x23d   :  { %v530_v32 = vadd.f32 %v524_v19, %v513_v30 }
 0x23e   :  { %vm533_vm6 = vcmp.gt.f32.partialorder %v531_v29, 0.0  ;;  %v535_v33 = vmul.f32 0.2, %v531_v29 }
 0x23f   :  { %vm532_vm7 = vcmp.gt.f32.partialorder %v530_v32, 0.0  ;;  %v534_v34 = vmul.f32 0.2, %v530_v32 }
 0x240   :  { %v537_v36 = vsel %vm533_vm6, %v531_v29, %v535_v33 }
 0x241   :  { %v539_v39 = vadd.f32 %v537_v36, %v135_v35  ;;  %v536_v40 = vsel %vm532_vm7, %v530_v32, %v534_v34  ;;  %v818_v35 = vld [vmem:[%s6958_s25 + $0x8] sm:$0xff]  ;;  %v820_v36 = vld [vmem:[%s6958_s25 + $0x18] sm:$0xff] }
 0x242   :  { %v538_v42 = vadd.f32 %v536_v40, %v134_v37  ;;  %v6099_v40 = vpack.c.bf16 %v820_v36, %v818_v35 }
 0x243   :  { %v543_v43 = vsel %vm335_vm8, %v539_v39, -inf }
 0x244   :  { %544 = vmax.xlane.f32.xlu0 %v543_v43  ;;  %v540_v45 = vsel %vm335_vm8, %v538_v42, -inf }
 0x245   :  { %541 = vmax.xlane.f32.xlu1 %v540_v45  ;;  %v824_v45 = vld [vmem:[%s6958_s25 + $0x38] sm:$0xff] }
 0x248   :  { %337 = vmax.xlane.f32.xlu0 %v336_v47  ;;  %v742_v47 = vld [vmem:[%s5306_s3] sm:$0xff]  ;;  %s5304_s3 = sld [smem:[%s7847_s0 + %s6861_s30]]  }
 0x249   :  { %340 = vmax.xlane.f32.xlu1 %v339_v48  ;;  %s5309_s30 = sld [smem:[%s7847_s0 + %s6866_s27]]  }
 0x2d1   :  { %v545_v49 = vpop.xlane.xlu0 %544 }
 0x2d2   :  { %v547_v50 = vsub.f32 %v539_v39, %v545_v49  ;;  %v542_v51 = vpop.xlane.xlu1 %541 }
 0x2d3   :  { %v546_v52 = vsub.f32 %v538_v42, %v542_v51  ;;  %v819_v42 = vld [vmem:[%s6958_s25 + $0x10] sm:$0xff] }
 0x2d4   :  { %v550_v53 = vmul.f32 1.442695, %v547_v50  ;;  %v6101_v48 = vpack.c.bf16 %v819_v42, %v817_v41  ;;  %v821_v50 = vld [vmem:[%s6958_s25 + $0x20] sm:$0xff]  ;;  %v823_v51 = vld [vmem:[%s6958_s25 + $0x30] sm:$0xff] }
 0x2d5   :  { %v548_v54 = vmul.f32 1.442695, %v546_v52  ;;  %v338_v55 = vpop.xlane.xlu0 %337  ;;  %v826_v52 = vld [vmem:[%s6958_s25 + $0x48] sm:$0xff] }
 0x2d6   :  { %6738 = vpow2.f32 %v550_v53  ;;  %v342_v56 = vsub.f32 %v333_v44, %v338_v55  ;;  %v341_v57 = vpop.xlane.xlu1 %340  ;;  %v822_v44 = vld [vmem:[%s6958_s25 + $0x28] sm:$0xff]  ;;  %v828_v53 = vld [vmem:[%s6958_s25 + $0x58] sm:$0xff] }
 0x2d7   :  { %6740 = vpow2.f32 %v548_v54  ;;  %v343_v58 = vsub.f32 %v334_v46, %v341_v57  ;;  %v668_v46 = vld [vmem:[%s5305_s29] sm:$0xff]  ;;  %v6103_v49 = vpack.c.bf16 %v824_v45, %v822_v44  ;;  %v6105_v54 = vpack.c.bf16 %v823_v51, %v821_v50  ;;  %v827_v57 = vld [vmem:[%s6958_s25 + $0x50] sm:$0xff]  ;;  %s5308_s29 = sld [smem:[%s7847_s0 + %s6860_s26]]  }
 0x2d8   :  { %v344_v59 = vmul.f32 1.442695, %v342_v56  ;;  %v6107_v55 = vpack.c.bf16 %v828_v53, %v826_v52  ;;  %v825_v56 = vld [vmem:[%s6958_s25 + $0x40] sm:$0xff]  ;;  %s7312_s26 = sld [smem:[%s7847_s0 + %s6865_s23]]  }
 0x2d9   :  { %v346_v60 = vmul.f32 1.442695, %v343_v58  ;;  %v830_v58 = vld [vmem:[%s6958_s25 + $0x68] sm:$0xff] }
 0x2da   :  { %6742 = vpow2.f32 %v344_v59  ;;  %v832_v59 = vld [vmem:[%s6958_s25 + $0x78] sm:$0xff] }
 0x2db   :  { %6744 = vpow2.f32 %v346_v60  ;;  %v6109_v60 = vpack.c.bf16 %v827_v57, %v825_v56  ;;  %v5359_v57 = vld [vmem:[%s5314_s14] ss:$0 sm:$0xff] }
 0x2e0   :  { %v6739_v61 = vpop.eup %6738 }
 0x2e1   :  { %v6741_v62 = vpop.eup %6740  ;;  %v555_v63 = vsel %vm335_vm8, %v6739_v61, 0.0 }
 0x2e2   :  { %556 = vadd.xlane.f32.xlu1 %v555_v63  ;;  %v552_v0 = vsel %vm335_vm8, %v6741_v62, 0.0  ;;  %v831_v63 = vld [vmem:[%s6958_s25 + $0x70] sm:$0xff] }
 0x2e3   :  { %553 = vadd.xlane.f32.xlu0 %v552_v0 }
 0x2e4   :  { %v6743_v1 = vpop.eup %6742 }
 0x2e5   :  { %v348_v2 = vsel %vm335_vm8, %v6743_v1, 0.0  ;;  %v6745_v5 = vpop.eup %6744 }
 0x2e6   :  { %349 = vadd.xlane.f32.xlu1 %v348_v2  ;;  %v351_v6 = vsel %vm335_vm8, %v6745_v5, 0.0 }
 0x2ea   :  { %352 = vadd.xlane.f32.xlu1 %v351_v6 }
 0x2f9   :  { %6685 = vrot.lane.b32.xlu0 %v6894_v7, %s6844_s16 }
 0x36f   :  { %v557_v8 = vpop.xlane.xlu1 %556 }
 0x370   :  { %6746 = vrcp.f32 %v557_v8  ;;  %v554_v10 = vpop.xlane.xlu0 %553 }
 0x371   :  { %6748 = vrcp.f32 %v554_v10  ;;  %v6853_v10 = vmov 2  }
 0x372   :  { %6689 = vset.pattern.permute.xlu0 %v6853_v10 }
 0x373   :  { %v350_v11 = vpop.xlane.xlu1 %349 }
 0x374   :  { %6750 = vrcp.f32 %v350_v11  ;;  %v6686_v12 = vpop.permute.xlu0 %6685 }
 0x375   :  { %v6688_v14 = vunpack.i.h.bf16 %v6686_v12  ;;  %v6687_v15 = vunpack.i.l.bf16 %v6686_v12 }
 0x377   :  { %v6089_v16 = vpack.c.bf16 %v6688_v14, %v6687_v15  ;;  %v353_v17 = vpop.xlane.xlu1 %352 }
 0x378   :  { %6752 = vrcp.f32 %v353_v17 }
 0x379   :  { %6090 = vmatprep.subr.bf16.mxu1 %v6089_v16 }
 0x37a   :  { %v6747_v18 = vpop.eup %6746  ;;  %6092 = vmatpush3.bf16.msra.mxu1 %v6089_v16 }
 0x37b   :  { %v6749_v19 = vpop.eup %6748  ;;  %v561_v21 = vmul.f32 %v6747_v18, %v6739_v61  ;;  %6093 = vmatprep.subr.bf16.mxu1 %v6845_v25  ;;  %v6111_v61 = vpack.c.bf16 %v832_v59, %v830_v58  ;;  %v1409_v58 = vld [vmem:[%s7043_s21 + $0x8] sm:$0xff]  ;;  %v1412_v59 = vld [vmem:[%s7043_s21 + $0x20] sm:$0xff] }
 0x37c   :  { %v560_v20 = vmul.f32 %v6749_v19, %v6741_v62  ;;  %v829_v62 = vld [vmem:[%s6958_s25 + $0x60] sm:$0xff]  ;;  %s5307_s25 = sld [smem:[%s7847_s0 + %s6859_s22]]  }
 0x37d   :  { %v6113_v0 = vpack.c.bf16 %v831_v63, %v829_v62  ;;  %v136_v19 = vld [vmem:[%s7011_s7] sm:$0xff]  ;;  %v1411_v62 = vld [vmem:[%s7043_s21 + $0x18] sm:$0xff]  ;;  %v1410_v63 = vld [vmem:[%s7043_s21 + $0x10] sm:$0xff]  ;;  %s5318_s22 = sld [smem:[%s7847_s0 + %s6864_s19]]  }
 0x37e   :  { %v6751_v22 = vpop.eup %6750  ;;  %5745 = vmatprep.mubr.msk.f32.mxu1 %vm335_vm8, %v560_v20 }
 0x37f   :  { %5746 = vmatmul.mubr.msk.f32.vlgmr.msra.gmra.mrb[6].mxu1 %vm335_vm8, %v561_v21  ;;  %v356_v7 = vmul.f32 %v6751_v22, %v6743_v1 }
 0x380   :  { %5752 = vmatprep.mubr.msk.f32.mxu1 %vm6846_vm9, %v6847_v26 }
 0x381   :  { %5731 = vmatprep.mubr.msk.f32.mxu0 %vm335_vm8, %v356_v7  ;;  %v6856_v7 = vmov 3  }
 0x382   :  { %v6753_v23 = vpop.eup %6752  ;;  %6692 = vset.pattern.permute.xlu1 %v6856_v7 }
 0x383   :  { %v357_v24 = vmul.f32 %v6753_v23, %v6745_v5 }
 0x385   :  { %5732 = vmatmul.mubr.msk.f32.vlgmr.msra.gmra.mrb[0].mxu0 %vm335_vm8, %v357_v24 }
 0x386   :  { %5759 = vmatprep.mubr.msk.f32.mxu0 %vm6846_vm9, %v6847_v26 }
 0x452   :  { %v5747_v27 = vpop.f32.mrb[6].mxu1 }
 0x453   :  { %653 = vrot.lane.b32.xlu0 %v5747_v27, %s6848_s17  ;;  %v640_v28 = vpop.f32.mrb[7].mxu1 }
 0x454   :  { %651 = vrot.lane.b32.xlu1 %v640_v28, %s6848_s17 }
 0x458   :  { %v5733_v29 = vpop.f32.mrb[0].mxu0 }
 0x459   :  { %v430_v30 = vpop.f32.mrb[1].mxu0 }
 0x4c5   :  { %v654_v32 = vpop.permute.xlu0 %653 }
 0x4c6   :  { %v659_v33 = vsel %vm657_vm10, %v5733_v29, %v654_v32  ;;  %v652_v34 = vpop.permute.xlu1 %651 }
 0x4c7   :  { %v6969_v37 = vadd.f32 %v5349_v31, %v659_v33  ;;  %v658_v38 = vsel %vm657_vm10, %v430_v30, %v652_v34 }
 0x4c8   :  { %v6972_v39 = vadd.f32 %v5349_v31, %v658_v38 }
 0x4ca   :  { %v6094_v43 = vpack.c.bf16 %v6969_v37, %v6972_v39 }
 0x4cc   :  { %6095 = vmatpush3.bf16.msra.mxu1 %v6094_v43  ;;  %6098 = vmatpush3.bf16.msra.mxu0 %v6094_v43 }
 0x4cd   :  { %6100 = vmatprep.subr.bf16.mxu1 %v6099_v40  ;;  %5762 = vmatprep.subr.mxu0 %v6847_v26 }
 0x4cf   :  { %5753 = vmatmul.mubr.msk.f32.vlgmr.msra.gmra.mrb[8].mxu1 %vm335_vm8, %v668_v46  ;;  %5760 = vmatmul.mubr.msk.f32.vlgmr.msra.gmra.mrb[2].mxu0 %vm335_vm8, %v742_v47 }
 0x4d0   :  { %6102 = vmatpush1.bf16.msra.mxu1 %v6101_v48  ;;  %902 = vmatprep.mubr.f32.mxu1 %v6847_v26 }
 0x4d1   :  { %6104 = vmatprep.subr.bf16.mxu1 %v6103_v49  ;;  %5764 = vmatprep.mubr.msk.f32.mxu0 %vm6846_vm9, %v6847_v26 }
 0x4d4   :  { %6106 = vmatpush1.bf16.msra.mxu1 %v6105_v54 }
 0x4d5   :  { %6108 = vmatprep.subr.bf16.mxu1 %v6107_v55 }
 0x4d8   :  { %6110 = vmatpush1.bf16.msra.mxu1 %v6109_v60  ;;  %v1408_v60 = vld [vmem:[%s7043_s21] sm:$0xff] }
 0x4d9   :  { %6112 = vmatprep.subr.bf16.mxu1 %v6111_v61 }
 0x4dc   :  { %6114 = vmatpush1.bf16.msra.mxu1 %v6113_v0  ;;  %v1413_v0 = vld [vmem:[%s7043_s21 + $0x28] sm:$0xff] }
 0x4dd   :  { %5782 = vmatprep.subr.mxu1 %v6847_v26 }
 0x5a2   :  { %v738_v1 = vpop.f32.mrb[8].mxu1  ;;  %v812_v2 = vpop.f32.mrb[2].mxu0 }
 0x5a3   :  { %v816_v5 = vmax.f32 %v738_v1, %v812_v2  ;;  %v5754_v6 = vpop.f32.mrb[9].mxu1  ;;  %v5761_v8 = vpop.f32.mrb[3].mxu0  ;;  %v1415_v2 = vld [vmem:[%s7043_s21 + $0x38] sm:$0xff] }
 0x5a4   :  { %v1259_v8 = vld [vmem:[%s5307_s25] sm:$0xf] }
 0x5a5   :  { %5352 = vmatmul.mubr.msk.f32.vlgmr.msra.gmra.mrb[10].mxu1 %vm834_vm11, %v816_v5  ;;  %v1418_v5 = vld [vmem:[%s7043_s21 + $0x50] sm:$0xff] }
 0x5a6   :  { %5784 = vmatprep.mubr.msk.f32.mxu1 %vm6846_vm9, %v6847_v26 }
 0x678   :  { %v904_v11 = vpop.f32.mrb[10].mxu1 }
 0x679   :  { %v906_v12 = vpop.f32.mrb[11].mxu1 }
 0x67a   :  { %983 = vperm.xlu0 %6689, %v906_v12   ;;  %5763 = vmatpush3.xpose.msk.msra.mxu0 %vm234_vm2, %v906_v12 }
 0x67b   :  { %5767 = vmatprep.subr.mxu0 %v6847_v26 }
 0x67d   :  { %5765 = vmatmul.mubr.msk.f32.vlgmr.msra.gmra.mrb[4].mxu0 %vm234_vm2, %v6840_v9 }
 0x67e   :  { %5768 = vmatpush3.msra.mxu0 %v904_v11  ;;  %5769 = vmatprep.mubr.msk.f32.mxu0 %vm6846_vm9, %v6847_v26 }
 0x67f   :  { %5772 = vmatprep.subr.mxu0 %v6847_v26  ;;  %6690 = vset.pattern.permute.xlu0 %v6856_v7 }
 0x6f9   :  { %v984_v14 = vpop.permute.xlu0 %983 }
 0x750   :  { %v978_v15 = vpop.f32.mrb[4].mxu0 }
 0x751   :  { %v986_v16 = vadd.f32 %v984_v14, %v978_v15  ;;  %v5766_v17 = vpop.f32.mrb[5].mxu0  ;;  %v6117_v14 = vpack.c.bf16 %v1411_v62, %v1408_v60  ;;  %v6148_v15 = vpack.c.bf16 %v1413_v0, %v1410_v63  ;;  %v1443_v60 = vld [vmem:[%s7043_s21 + $0x118] sm:$0xff]  ;;  %v1448_v62 = vld [vmem:[%s7043_s21 + $0x140] sm:$0xff] }
 0x752   :  { %v6119_v17 = vpack.c.bf16 %v1418_v5, %v1415_v2  ;;  %v1447_v5 = vld [vmem:[%s7043_s21 + $0x138] sm:$0xff] }
 0x753   :  { %vm987_vm12 = vcmp.gt.f32.partialorder %v986_v16, 0.0  ;;  %v988_v18 = vmul.f32 0.2, %v986_v16 }
 0x755   :  { %v989_v20 = vsel %vm987_vm12, %v986_v16, %v988_v18  ;;  %v1414_v16 = vld [vmem:[%s7043_s21 + $0x30] sm:$0xff]  ;;  %v1417_v18 = vld [vmem:[%s7043_s21 + $0x48] sm:$0xff] }
 0x756   :  { %v990_v21 = vadd.f32 %v989_v20, %v136_v19  ;;  %v1419_v20 = vld [vmem:[%s7043_s21 + $0x58] sm:$0xff] }
 0x758   :  { %v992_v22 = vsel %vm991_vm13, %v990_v21, -inf }
 0x759   :  { %993 = vmax.xlane.f32.xlu1 %v992_v22  ;;  %v1424_v22 = vld [vmem:[%s7043_s21 + $0x80] sm:$0xff] }
 0x76a   :  { %1076 = vrot.lane.b32.xlu1 %v906_v12, %s6855_s8 }
 0x7e6   :  { %v994_v23 = vpop.xlane.xlu1 %993 }
 0x7e7   :  { %v995_v24 = vsub.f32 %v990_v21, %v994_v23  ;;  %v1421_v21 = vld [vmem:[%s7043_s21 + $0x68] sm:$0xff]  ;;  %v6121_v23 = vpack.c.bf16 %v1417_v18, %v1414_v16  ;;  %v1450_v18 = vld [vmem:[%s7043_s21 + $0x150] sm:$0xff] }
 0x7e9   :  { %v996_v27 = vmul.f32 1.442695, %v995_v24 }
 0x7ea   :  { %v1077_v33 = vpop.permute.xlu1 %1076 }
 0x7eb   :  { %6754 = vpow2.f32 %v996_v27  ;;  %v1420_v27 = vld [vmem:[%s7043_s21 + $0x60] sm:$0xff] }
 0x7f5   :  { %v6755_v28 = vpop.eup %6754 }
 0x7f6   :  { %v998_v29 = vsel %vm991_vm13, %v6755_v28, 0.0 }
 0x7f7   :  { %999 = vadd.xlane.f32.xlu0 %v998_v29  ;;  %v1423_v29 = vld [vmem:[%s7043_s21 + $0x78] sm:$0xff] }
 0x80d   :  { %1151 = vperm.xlu0 %6690, %v906_v12   ;;  %v6115_v12 = vpack.c.bf16 %v1412_v59, %v1409_v58  ;;  %v1441_v58 = vld [vmem:[%s7043_s21 + $0x108] sm:$0xff]  ;;  %v1440_v59 = vld [vmem:[%s7043_s21 + $0x100] sm:$0xff] }
 0x80e   :  { %v6163_v0 = vpack.c.bf16 %v1443_v60, %v1440_v59 }
 0x811   :  { %6691 = vset.pattern.permute.xlu0 %v6853_v10 }
 0x884   :  { %v1000_v30 = vpop.xlane.xlu0 %999 }
 0x885   :  { %6756 = vrcp.f32 %v1000_v30  ;;  %v1422_v30 = vld [vmem:[%s7043_s21 + $0x70] sm:$0xff] }
 0x88c   :  { %v1152_v36 = vpop.permute.xlu0 %1151 }
 0x88f   :  { %v6757_v31 = vpop.eup %6756 }
 0x890   :  { %v1002_v32 = vmul.f32 %v6757_v31, %v6755_v28  ;;  %v6123_v28 = vpack.c.bf16 %v1424_v22, %v1421_v21  ;;  %v1425_v31 = vld [vmem:[%s7043_s21 + $0x88] sm:$0xff]  ;;  %v1455_v22 = vld [vmem:[%s7043_s21 + $0x178] sm:$0xff] }
 0x892   :  { %5770 = vmatmul.mubr.msk.f32.vlgmr.msra.gmra.mrb[6].mxu0 %vm991_vm13, %v1002_v32  ;;  %v1427_v32 = vld [vmem:[%s7043_s21 + $0x98] sm:$0xff] }
 0x893   :  { %5773 = vmatpush3.xpose.msk.msra.mxu0 %vm234_vm2, %v1077_v33  ;;  %5774 = vmatprep.mubr.msk.f32.mxu0 %vm6846_vm9, %v6847_v26  ;;  %v1430_v33 = vld [vmem:[%s7043_s21 + $0xb0] sm:$0xff] }
 0x894   :  { %5777 = vmatprep.subr.mxu0 %v6847_v26 }
 0x896   :  { %5775 = vmatmul.mubr.msk.f32.vlgmr.msra.gmra.mrb[8].mxu0 %vm234_vm2, %v6840_v9 }
 0x897   :  { %5779 = vmatprep.mubr.msk.f32.mxu0 %vm6846_vm9, %v6847_v26 }
 0x965   :  { %v1072_v34 = vpop.f32.mrb[6].mxu0 }
 0x966   :  { %v5771_v35 = vpop.f32.mrb[7].mxu0 }
 0x967   :  { %v6154_v35 = vpack.c.bf16 %v1425_v31, %v1422_v30 }
 0x969   :  { %v1146_v38 = vpop.f32.mrb[8].mxu0 }
 0x96a   :  { %v1154_v40 = vadd.f32 %v1152_v36, %v1146_v38  ;;  %v5776_v41 = vpop.f32.mrb[9].mxu0  ;;  %v1426_v36 = vld [vmem:[%s7043_s21 + $0x90] sm:$0xff]  ;;  %v6127_v38 = vpack.c.bf16 %v1430_v33, %v1427_v32 }
 0x96b   :  { %v1428_v41 = vld [vmem:[%s7043_s21 + $0xa0] sm:$0xff] }
 0x96c   :  { %vm1155_vm14 = vcmp.gt.f32.partialorder %v1154_v40, 0.0  ;;  %v1156_v42 = vmul.f32 0.2, %v1154_v40 }
 0x96e   :  { %v1157_v43 = vsel %vm1155_vm14, %v1154_v40, %v1156_v42  ;;  %v1429_v40 = vld [vmem:[%s7043_s21 + $0xa8] sm:$0xff]  ;;  %v1431_v42 = vld [vmem:[%s7043_s21 + $0xb8] sm:$0xff] }
 0x96f   :  { %v1158_v44 = vadd.f32 %v1157_v43, %v136_v19  ;;  %v1416_v19 = vld [vmem:[%s7043_s21 + $0x40] sm:$0xff]  ;;  %v1433_v43 = vld [vmem:[%s7043_s21 + $0xc8] sm:$0xff] }
 0x970   :  { %v6151_v24 = vpack.c.bf16 %v1419_v20, %v1416_v19  ;;  %v1453_v19 = vld [vmem:[%s7043_s21 + $0x168] sm:$0xff]  ;;  %v1452_v20 = vld [vmem:[%s7043_s21 + $0x160] sm:$0xff] }
 0x971   :  { %v1159_v45 = vsel %vm991_vm13, %v1158_v44, -inf  ;;  %v6145_v21 = vpack.c.bf16 %v1453_v19, %v1450_v18  ;;  %v1959_v19 = vld [vmem:[%s7158_s9 + $0x30] sm:$0xff] }
 0x972   :  { %1160 = vmax.xlane.f32.xlu1 %v1159_v45  ;;  %v6129_v45 = vpack.c.bf16 %v1429_v40, %v1426_v36 }
 0x983   :  { %1171 = vrot.lane.b32.xlu1 %v904_v11, %s6841_s10  ;;  %v1333_v11 = vld [vmem:[%s5308_s29] sm:$0xf]  ;;  %s6873_s29 = smov 23  }
 0x984   :  { %s5324_s1 = sld [smem:[%s7847_s0 + %s6873_s29]]  }
 0x9ff   :  { %v1161_v46 = vpop.xlane.xlu1 %1160 }
 0xa00   :  { %v1162_v47 = vsub.f32 %v1158_v44, %v1161_v46  ;;  %v1436_v44 = vld [vmem:[%s7043_s21 + $0xe0] sm:$0xff]  ;;  %v6157_v46 = vpack.c.bf16 %v1431_v42, %v1428_v41 }
 0xa01   :  { %v7140_v42 = vld [vmem:[%s5304_s3] sm:$0xf] }
 0xa02   :  { %v1163_v48 = vmul.f32 1.442695, %v1162_v47  ;;  %v1432_v47 = vld [vmem:[%s7043_s21 + $0xc0] sm:$0xff] }
 0xa03   :  { %v1172_v49 = vpop.permute.xlu1 %1171 }
 0xa04   :  { %6758 = vpow2.f32 %v1163_v48  ;;  %5778 = vmatpush3.msra.mxu0 %v1172_v49  ;;  %v6131_v48 = vpack.c.bf16 %v1436_v44, %v1433_v43  ;;  %v1435_v49 = vld [vmem:[%s7043_s21 + $0xd8] sm:$0xff] }
 0xa05   :  { %5787 = vmatprep.subr.mxu0 %v6847_v26 }
 0xa0e   :  { %v6759_v50 = vpop.eup %6758 }
 0xa0f   :  { %v1165_v51 = vsel %vm991_vm13, %v6759_v50, 0.0 }
 0xa10   :  { %1166 = vadd.xlane.f32.xlu0 %v1165_v51  ;;  %v1437_v51 = vld [vmem:[%s7043_s21 + $0xe8] sm:$0xff] }
 0xa9d   :  { %v1167_v52 = vpop.xlane.xlu0 %1166 }
 0xa9e   :  { %6760 = vrcp.f32 %v1167_v52  ;;  %v1439_v52 = vld [vmem:[%s7043_s21 + $0xf8] sm:$0xff] }
 0xaa8   :  { %v6761_v53 = vpop.eup %6760 }
 0xaa9   :  { %v1169_v54 = vmul.f32 %v6761_v53, %v6759_v50  ;;  %v1434_v50 = vld [vmem:[%s7043_s21 + $0xd0] sm:$0xff] }
 0xaaa   :  { %v1442_v53 = vld [vmem:[%s7043_s21 + $0x110] sm:$0xff] }
 0xaab   :  { %5780 = vmatmul.mubr.msk.f32.vlgmr.msra.gmra.mrb[10].mxu0 %vm991_vm13, %v1169_v54  ;;  %v6133_v54 = vpack.c.bf16 %v1435_v49, %v1432_v47 }
 0xaac   :  { %5789 = vmatprep.mubr.msk.f32.mxu0 %vm6846_vm9, %v6847_v26 }
 0xb7e   :  { %v1243_v55 = vpop.f32.mrb[10].mxu0 }
 0xb7f   :  { %1248 = vrot.lane.b32.xlu1 %v1243_v55, %s6841_s10  ;;  %v5781_v56 = vpop.f32.mrb[11].mxu0  ;;  %v6160_v55 = vpack.c.bf16 %v1437_v51, %v1434_v50 }
 0xb80   :  { %v1438_v56 = vld [vmem:[%s7043_s21 + $0xf0] sm:$0xff] }
 0xb81   :  { %v6137_v63 = vpack.c.bf16 %v1441_v58, %v1438_v56 }
 0xbf1   :  { %v1249_v61 = vpop.permute.xlu1 %1248 }
 0xbf2   :  { %v1251_v1 = vsel %vm834_vm11, %v1072_v34, %v1249_v61  ;;  %v6125_v34 = vpack.c.bf16 %v1423_v29, %v1420_v27  ;;  %v1445_v61 = vld [vmem:[%s7043_s21 + $0x128] sm:$0xff] }
 0xbf3   :  { %v7060_v6 = vadd.f32 %v5359_v57, %v1251_v1  ;;  %v6135_v57 = vpack.c.bf16 %v1442_v53, %v1439_v52  ;;  %v1444_v1 = vld [vmem:[%s7043_s21 + $0x120] sm:$0xff]  ;;  %v6139_v2 = vpack.c.bf16 %v1448_v62, %v1445_v61 }
 0xbf5   :  { %5783 = vmatpush3.msra.mxu1 %v7060_v6  ;;  %5788 = vmatpush3.msra.mxu0 %v7060_v6 }
 0xbf6   :  { %5785 = vmatmul.mubr.msk.f32.vlgmr.msra.gmra.mrb[12].mxu1 %vm991_vm13, %v1259_v8  ;;  %5790 = vmatmul.mubr.msk.f32.vlgmr.msra.gmra.mrb[12].mxu0 %vm991_vm13, %v1333_v11  ;;  %v1446_v8 = vld [vmem:[%s7043_s21 + $0x130] sm:$0xff]  ;;  %v1449_v11 = vld [vmem:[%s7043_s21 + $0x148] sm:$0xff] }
 0xbf7   :  { %6116 = vmatprep.subr.bf16.mxu1 %v6115_v12  ;;  %6147 = vmatprep.subr.bf16.mxu0 %v6845_v25  ;;  %v1451_v12 = vld [vmem:[%s7043_s21 + $0x158] sm:$0xff]  ;;  %v6166_v16 = vpack.c.bf16 %v1449_v11, %v1446_v8  ;;  %v1957_v8 = vld [vmem:[%s7158_s9 + $0x20] sm:$0xff] }
 0xbf8   :  { %6118 = vmatpush1.bf16.msra.mxu1 %v6117_v14  ;;  %6149 = vmatpush3.bf16.msra.mxu0 %v6148_v15  ;;  %v1454_v14 = vld [vmem:[%s7043_s21 + $0x170] sm:$0xff]  ;;  %v6141_v15 = vpack.c.bf16 %v1447_v5, %v1444_v1  ;;  %v1954_v5 = vld [vmem:[%s7158_s9 + $0x8] sm:$0xff]  ;;  %v1953_v11 = vld [vmem:[%s7158_s9] sm:$0xff] }
 0xbf9   :  { %6120 = vmatprep.subr.bf16.mxu1 %v6119_v17  ;;  %6150 = vmatprep.subr.bf16.mxu0 %v6845_v25  ;;  %v6143_v17 = vpack.c.bf16 %v1454_v14, %v1451_v12  ;;  %v6171_v12 = vpack.c.bf16 %v1957_v8, %v1954_v5  ;;  %v1956_v14 = vld [vmem:[%s7158_s9 + $0x18] sm:$0xff]  ;;  %v1999_v8 = vld [vmem:[%s7158_s9 + $0x170] sm:$0xff] }
 0xbfa   :  { %1521 = vmatprep.mubr.f32.mxu1 %v6847_v26  ;;  %5824 = vmatprep.mubr.msk.f32.mxu0 %vm6846_vm9, %v6847_v26 }
 0xbfc   :  { %6122 = vmatpush1.bf16.msra.mxu1 %v6121_v23  ;;  %6152 = vmatpush3.bf16.msra.mxu0 %v6151_v24  ;;  %v6169_v23 = vpack.c.bf16 %v1455_v22, %v1452_v20  ;;  %v1962_v20 = vld [vmem:[%s7158_s9 + $0x48] sm:$0xff]  ;;  %v1969_v22 = vld [vmem:[%s7158_s9 + $0x80] sm:$0xff] }
 0xbfd   :  { %6124 = vmatprep.subr.bf16.mxu1 %v6123_v28  ;;  %6153 = vmatprep.subr.bf16.mxu0 %v6845_v25 }
 0xc00   :  { %6126 = vmatpush1.bf16.msra.mxu1 %v6125_v34  ;;  %6155 = vmatpush3.bf16.msra.mxu0 %v6154_v35 }
 0xc01   :  { %6128 = vmatprep.subr.bf16.mxu1 %v6127_v38  ;;  %6156 = vmatprep.subr.bf16.mxu0 %v6845_v25 }
 0xc04   :  { %6130 = vmatpush1.bf16.msra.mxu1 %v6129_v45  ;;  %6158 = vmatpush3.bf16.msra.mxu0 %v6157_v46 }
 0xc05   :  { %6132 = vmatprep.subr.bf16.mxu1 %v6131_v48  ;;  %6159 = vmatprep.subr.bf16.mxu0 %v6845_v25 }
 0xc08   :  { %6134 = vmatpush1.bf16.msra.mxu1 %v6133_v54  ;;  %6161 = vmatpush3.bf16.msra.mxu0 %v6160_v55 }
 0xc09   :  { %6136 = vmatprep.subr.bf16.mxu1 %v6135_v57  ;;  %6162 = vmatprep.subr.bf16.mxu0 %v6845_v25 }
 0xc0c   :  { %6138 = vmatpush1.bf16.msra.mxu1 %v6137_v63  ;;  %6164 = vmatpush3.bf16.msra.mxu0 %v6163_v0 }
 0xc0d   :  { %6140 = vmatprep.subr.bf16.mxu1 %v6139_v2  ;;  %6165 = vmatprep.subr.bf16.mxu0 %v6845_v25 }
 0xc10   :  { %6142 = vmatpush1.bf16.msra.mxu1 %v6141_v15  ;;  %6167 = vmatpush3.bf16.msra.mxu0 %v6166_v16  ;;  %v1960_v15 = vld [vmem:[%s7158_s9 + $0x38] sm:$0xff]  ;;  %v1963_v16 = vld [vmem:[%s7158_s9 + $0x50] sm:$0xff] }
 0xc11   :  { %6144 = vmatprep.subr.bf16.mxu1 %v6143_v17  ;;  %6168 = vmatprep.subr.bf16.mxu0 %v6845_v25  ;;  %v6173_v17 = vpack.c.bf16 %v1956_v14, %v1953_v11  ;;  %v6175_v18 = vpack.c.bf16 %v1963_v16, %v1960_v15  ;;  %v1964_v14 = vld [vmem:[%s7158_s9 + $0x58] sm:$0xff]  ;;  %v2015_v15 = vld [vmem:[%s7158_s9 + $0x1f0] sm:$0xff]  ;;  %v2018_v16 = vld [vmem:[%s7158_s9 + $0x208] sm:$0xff] }
 0xc14   :  { %6146 = vmatpush1.bf16.msra.mxu1 %v6145_v21  ;;  %6170 = vmatpush3.bf16.msra.mxu0 %v6169_v23  ;;  %v1966_v21 = vld [vmem:[%s7158_s9 + $0x68] sm:$0xff]  ;;  %v6177_v23 = vpack.c.bf16 %v1962_v20, %v1959_v19  ;;  %v1995_v19 = vld [vmem:[%s7158_s9 + $0x150] sm:$0xff] }
 0xc15   :  { %5827 = vmatprep.subr.mxu1 %v6847_v26  ;;  %5832 = vmatprep.subr.mxu0 %v6847_v26  ;;  %v2002_v20 = vld [vmem:[%s7158_s9 + $0x188] sm:$0xff] }
 0xcc9   :  { %v1329_v24 = vpop.f32.mrb[12].mxu1  ;;  %v1403_v27 = vpop.f32.mrb[12].mxu0 }
 0xcca   :  { %v1407_v28 = vmax.f32 %v1329_v24, %v1403_v27  ;;  %v5786_v29 = vpop.f32.mrb[13].mxu1  ;;  %v5791_v30 = vpop.f32.mrb[13].mxu0  ;;  %v6179_v24 = vpack.c.bf16 %v1969_v22, %v1966_v21  ;;  %v1965_v27 = vld [vmem:[%s7158_s9 + $0x60] sm:$0xff] }
 0xccb   :  { %v1972_v29 = vld [vmem:[%s7158_s9 + $0x98] sm:$0xff]  ;;  %v1975_v30 = vld [vmem:[%s7158_s9 + $0xb0] sm:$0xff]  ;;  %v2005_v22 = vld [vmem:[%s7158_s9 + $0x1a0] sm:$0xff] }
 0xccc   :  { %1522 = vmatmul.mubr.f32.vlgmr.msra.gmra.mrb[14].mxu1 %v1407_v28  ;;  %5825 = vmatmul.mubr.f32.vlgmr.msra.gmra.mrb[14].mxu0 %v1407_v28  ;;  %v1968_v28 = vld [vmem:[%s7158_s9 + $0x78] sm:$0xff] }
 0xccd   :  { %5829 = vmatprep.mubr.msk.f32.mxu1 %vm6846_vm9, %v6847_v26  ;;  %5834 = vmatprep.mubr.msk.f32.mxu0 %vm6846_vm9, %v6847_v26 }
 0xd9f   :  { %v1523_v25 = vpop.f32.mrb[14].mxu1  ;;  %v1594_v31 = vpop.f32.mrb[14].mxu0 }
 0xda0   :  { %v1525_v32 = vpop.f32.mrb[15].mxu1  ;;  %5833 = vmatpush3.msk.msra.mxu0 %vm1696_vm15, %v1523_v25  ;;  %1672 = vperm.xlu0 %6691, %v1594_v31   ;;  %v5826_v33 = vpop.f32.mrb[15].mxu0  ;;  %v6181_v25 = vpack.c.bf16 %v1968_v28, %v1965_v27  ;;  %v1970_v27 = vld [vmem:[%s7158_s9 + $0x88] sm:$0xff]  ;;  %v2021_v28 = vld [vmem:[%s7158_s9 + $0x220] sm:$0xff] }
 0xda1   :  { %1770 = vrot.lane.b32.xlu1 %v1594_v31, %s6855_s8  ;;  %5828 = vmatpush3.xpose.msk.msra.mxu1 %vm234_vm2, %v1594_v31  ;;  %v1974_v33 = vld [vmem:[%s7158_s9 + $0xa8] sm:$0xff] }
 0xda2   :  { %5837 = vmatprep.subr.mxu1 %v6847_v26  ;;  %5842 = vmatprep.subr.mxu0 %v6847_v26 }
 0xda4   :  { %5830 = vmatmul.mubr.msk.f32.vlgmr.msra.gmra.mrb[16].mxu1 %vm234_vm2, %v6840_v9  ;;  %6694 = vset.pattern.permute.xlu0 %v6856_v7 }
 0xda5   :  { %1845 = vperm.xlu1 %6692, %v1594_v31   ;;  %5839 = vmatprep.mubr.msk.f32.mxu1 %vm6846_vm9, %v6847_v26  ;;  %v6183_v31 = vpack.c.bf16 %v1975_v30, %v1972_v29  ;;  %v2024_v29 = vld [vmem:[%s7158_s9 + $0x238] sm:$0xff] }
 0xda9   :  { %6693 = vset.pattern.permute.xlu1 %v6853_v10 }
 0xe13   :  { %v1771_v34 = vpop.permute.xlu1 %1770 }
 0xe14   :  { %5838 = vmatpush3.xpose.msk.msra.mxu1 %vm234_vm2, %v1771_v34 }
 0xe15   :  { %6172 = vmatprep.subr.bf16.mxu1 %v6171_v12  ;;  %v1961_v12 = vld [vmem:[%s7158_s9 + $0x40] sm:$0xff] }
 0xe16   :  { %v6241_v21 = vpack.c.bf16 %v1964_v14, %v1961_v12  ;;  %v2019_v14 = vld [vmem:[%s7158_s9 + $0x210] sm:$0xff] }
 0xe17   :  { %5840 = vmatmul.mubr.msk.f32.vlgmr.msra.gmra.mrb[18].mxu1 %vm234_vm2, %v6840_v9 }
 0xe18   :  { %6174 = vmatpush1.bf16.msra.mxu1 %v6173_v17 }
 0xe19   :  { %6176 = vmatprep.subr.bf16.mxu1 %v6175_v18 }
 0xe1c   :  { %6178 = vmatpush1.bf16.msra.mxu1 %v6177_v23  ;;  %v6243_v23 = vpack.c.bf16 %v2018_v16, %v2015_v15  ;;  %v2022_v15 = vld [vmem:[%s7158_s9 + $0x228] sm:$0xff] }
 0xe1d   :  { %6180 = vmatprep.subr.bf16.mxu1 %v6179_v24  ;;  %v1967_v24 = vld [vmem:[%s7158_s9 + $0x70] sm:$0xff]  ;;  %v2026_v16 = vld [vmem:[%s7158_s9 + $0x248] sm:$0xff] }
 0xe1f   :  { %v1673_v35 = vpop.permute.xlu0 %1672 }
 0xe20   :  { %6182 = vmatpush1.bf16.msra.mxu1 %v6181_v25  ;;  %v6203_v25 = vpack.c.bf16 %v2005_v22, %v2002_v20  ;;  %v1994_v20 = vld [vmem:[%s7158_s9 + $0x148] sm:$0xff] }
 0xe21   :  { %6184 = vmatprep.subr.bf16.mxu1 %v6183_v31  ;;  %v2001_v31 = vld [vmem:[%s7158_s9 + $0x180] sm:$0xff] }
 0xe24   :  { %v1846_v46 = vpop.permute.xlu1 %1845 }
 0xe77   :  { %v1667_v36 = vpop.f32.mrb[16].mxu1 }
 0xe78   :  { %v1675_v38 = vadd.f32 %v1673_v35, %v1667_v36  ;;  %v5831_v40 = vpop.f32.mrb[17].mxu1  ;;  %v1978_v35 = vld [vmem:[%s7158_s9 + $0xc8] sm:$0xff]  ;;  %v1981_v36 = vld [vmem:[%s7158_s9 + $0xe0] sm:$0xff] }
 0xe79   :  { %v2006_v40 = vld [vmem:[%s7158_s9 + $0x1a8] sm:$0xff] }
 0xe7a   :  { %vm1676_vm0 = vcmp.gt.f32.partialorder %v1675_v38, 0.0  ;;  %v1677_v41 = vmul.f32 0.2, %v1675_v38 }
 0xe7c   :  { %v1678_v43 = vsel %vm1676_vm0, %v1675_v38, %v1677_v41  ;;  %v2003_v38 = vld [vmem:[%s7158_s9 + $0x190] sm:$0xff] }
 0xe7d   :  { %v1679_v44 = vadd.f32 %v1678_v43, %v7140_v42  ;;  %v6235_v43 = vpack.c.bf16 %v2006_v40, %v2003_v38  ;;  %v1973_v38 = vld [vmem:[%s7158_s9 + $0xa0] sm:$0xff]  ;;  %v1976_v40 = vld [vmem:[%s7158_s9 + $0xb8] sm:$0xff] }
 0xe7f   :  { %v1681_v45 = vsel %vm1680_vm1, %v1679_v44, -inf }
 0xe80   :  { %1682 = vmax.xlane.f32.xlu1 %v1681_v45  ;;  %v1977_v45 = vld [vmem:[%s7158_s9 + $0xc0] sm:$0xff] }
 0xeea   :  { %v1840_v47 = vpop.f32.mrb[18].mxu1 }
 0xeeb   :  { %v1848_v48 = vadd.f32 %v1846_v46, %v1840_v47  ;;  %v5841_v49 = vpop.f32.mrb[19].mxu1  ;;  %v1980_v46 = vld [vmem:[%s7158_s9 + $0xd8] sm:$0xff] }
 0xeec   :  { %v1984_v47 = vld [vmem:[%s7158_s9 + $0xf8] sm:$0xff]  ;;  %v6189_v49 = vpack.c.bf16 %v1980_v46, %v1977_v45  ;;  %v2007_v46 = vld [vmem:[%s7158_s9 + $0x1b0] sm:$0xff] }
 0xeed   :  { %vm1849_vm4 = vcmp.gt.f32.partialorder %v1848_v48, 0.0  ;;  %v1850_v50 = vmul.f32 0.2, %v1848_v48 }
 0xeef   :  { %v1851_v51 = vsel %vm1849_vm4, %v1848_v48, %v1850_v50  ;;  %v1987_v48 = vld [vmem:[%s7158_s9 + $0x110] sm:$0xff] }
 0xef0   :  { %v1852_v52 = vadd.f32 %v1851_v51, %v7140_v42  ;;  %v6191_v50 = vpack.c.bf16 %v1987_v48, %v1984_v47  ;;  %v1983_v51 = vld [vmem:[%s7158_s9 + $0xf0] sm:$0xff]  ;;  %v2010_v47 = vld [vmem:[%s7158_s9 + $0x1c8] sm:$0xff] }
 0xef1   :  { %v2014_v48 = vld [vmem:[%s7158_s9 + $0x1e8] sm:$0xff] }
 0xef2   :  { %v1853_v53 = vsel %vm1680_vm1, %v1852_v52, -inf }
 0xef3   :  { %1854 = vmax.xlane.f32.xlu1 %v1853_v53  ;;  %v1990_v53 = vld [vmem:[%s7158_s9 + $0x128] sm:$0xff] }
 0xf0d   :  { %v1683_v54 = vpop.xlane.xlu1 %1682 }
 0xf0e   :  { %v1684_v55 = vsub.f32 %v1679_v44, %v1683_v54  ;;  %v6187_v44 = vpack.c.bf16 %v1981_v36, %v1978_v35  ;;  %v1993_v54 = vld [vmem:[%s7158_s9 + $0x140] sm:$0xff]  ;;  %v2011_v35 = vld [vmem:[%s7158_s9 + $0x1d0] sm:$0xff]  ;;  %v6247_v36 = vpack.c.bf16 %v2024_v29, %v2021_v28  ;;  %v2032_v28 = vld [vmem:[%s7158_s9 + $0x278] sm:$0xff] }
 0xf0f   :  { %v2035_v29 = vld [vmem:[%s7158_s9 + $0x290] sm:$0xff] }
 0xf10   :  { %v1685_v56 = vmul.f32 1.442695, %v1684_v55  ;;  %v1955_v55 = vld [vmem:[%s7158_s9 + $0x10] sm:$0xff] }
 0xf12   :  { %6762 = vpow2.f32 %v1685_v56  ;;  %v1958_v56 = vld [vmem:[%s7158_s9 + $0x28] sm:$0xff] }
 0xf1c   :  { %v6763_v57 = vpop.eup %6762 }
 0xf1d   :  { %v1687_v58 = vsel %vm1680_vm1, %v6763_v57, 0.0 }
 0xf1e   :  { %1688 = vadd.xlane.f32.xlu0 %v1687_v58  ;;  %v2012_v58 = vld [vmem:[%s7158_s9 + $0x1d8] sm:$0xff] }
 0xf80   :  { %v1855_v59 = vpop.xlane.xlu1 %1854 }
 0xf81   :  { %v1856_v60 = vsub.f32 %v1852_v52, %v1855_v59  ;;  %v1986_v52 = vld [vmem:[%s7158_s9 + $0x108] sm:$0xff] }
 0xf82   :  { %v6193_v59 = vpack.c.bf16 %v1986_v52, %v1983_v51  ;;  %v1979_v52 = vld [vmem:[%s7158_s9 + $0xd0] sm:$0xff] }
 0xf83   :  { %v1857_v61 = vmul.f32 1.442695, %v1856_v60 }
 0xf85   :  { %6764 = vpow2.f32 %v1857_v61  ;;  %v6195_v61 = vpack.c.bf16 %v1993_v54, %v1990_v53  ;;  %v1982_v53 = vld [vmem:[%s7158_s9 + $0xe8] sm:$0xff]  ;;  %v2033_v54 = vld [vmem:[%s7158_s9 + $0x280] sm:$0xff] }
 0xf8f   :  { %v7147_v62 = vpop.eup %6764 }
 0xf90   :  { %v1859_v63 = vsel %vm1680_vm1, %v7147_v62, 0.0 }
 0xf91   :  { %1860 = vadd.xlane.f32.xlu1 %v1859_v63  ;;  %v1989_v63 = vld [vmem:[%s7158_s9 + $0x120] sm:$0xff] }
 0xfab   :  { %v1689_v0 = vpop.xlane.xlu0 %1688 }
 0xfac   :  { %6766 = vrcp.f32 %v1689_v0  ;;  %v1992_v0 = vld [vmem:[%s7158_s9 + $0x138] sm:$0xff] }
 0xfad   :  { %v6197_v17 = vpack.c.bf16 %v1992_v0, %v1989_v63  ;;  %v2023_v63 = vld [vmem:[%s7158_s9 + $0x230] sm:$0xff] }
 0xfb6   :  { %v6767_v1 = vpop.eup %6766 }
 0xfb7   :  { %v1691_v2 = vmul.f32 %v6767_v1, %v6763_v57  ;;  %v2009_v57 = vld [vmem:[%s7158_s9 + $0x1c0] sm:$0xff]  ;;  %v1996_v1 = vld [vmem:[%s7158_s9 + $0x158] sm:$0xff] }
 0xfb8   :  { %v6239_v11 = vpack.c.bf16 %v2012_v58, %v2009_v57  ;;  %v6199_v18 = vpack.c.bf16 %v1999_v8, %v1996_v1  ;;  %v2013_v58 = vld [vmem:[%s7158_s9 + $0x1e0] sm:$0xff]  ;;  %v2042_v8 = vld [vmem:[%s7158_s9 + $0x2c8] sm:$0xff] }
 0xfb9   :  { %5835 = vmatmul.mubr.msk.f32.vlgmr.msra.gmra.mrb[16].mxu0 %vm1692_vm5, %v1691_v2  ;;  %v6237_v2 = vpack.c.bf16 %v1958_v56, %v1955_v55  ;;  %v2036_v55 = vld [vmem:[%s7158_s9 + $0x298] sm:$0xff]  ;;  %v6209_v56 = vpack.c.bf16 %v2010_v47, %v2007_v46  ;;  %v1985_v1 = vld [vmem:[%s7158_s9 + $0x100] sm:$0xff] }
 0xfba   :  { %5843 = vmatpush3.msk.msra.mxu0 %vm1696_vm15, %v1525_v32  ;;  %5844 = vmatprep.mubr.msk.f32.mxu0 %vm6846_vm9, %v6847_v26  ;;  %v1971_v32 = vld [vmem:[%s7158_s9 + $0x90] sm:$0xff]  ;;  %v6255_v0 = vpack.c.bf16 %v2036_v55, %v2033_v54  ;;  %v2048_v47 = vld [vmem:[%s7158_s9 + $0x2f8] sm:$0xff] }
 0xfbb   :  { %v6185_v41 = vpack.c.bf16 %v1974_v33, %v1971_v32  ;;  %6236 = vmatprep.subr.bf16.mxu0 %v6235_v43  ;;  %v2004_v32 = vld [vmem:[%s7158_s9 + $0x198] sm:$0xff]  ;;  %v2030_v43 = vld [vmem:[%s7158_s9 + $0x268] sm:$0xff] }
 0xfbc   :  { %v2008_v33 = vld [vmem:[%s7158_s9 + $0x1b8] sm:$0xff] }
 0xfbd   :  { %6186 = vmatpush1.bf16.msra.mxu1 %v6185_v41  ;;  %v2027_v41 = vld [vmem:[%s7158_s9 + $0x250] sm:$0xff]  ;;  %v6207_v45 = vpack.c.bf16 %v2011_v35, %v2008_v33  ;;  %v2038_v33 = vld [vmem:[%s7158_s9 + $0x2a8] sm:$0xff] }
 0xfbe   :  { %6188 = vmatprep.subr.bf16.mxu1 %v6187_v44  ;;  %v6205_v44 = vpack.c.bf16 %v2004_v32, %v2001_v31  ;;  %v6251_v51 = vpack.c.bf16 %v2030_v43, %v2027_v41  ;;  %v2031_v31 = vld [vmem:[%s7158_s9 + $0x270] sm:$0xff]  ;;  %v2034_v32 = vld [vmem:[%s7158_s9 + $0x288] sm:$0xff]  ;;  %v2044_v43 = vld [vmem:[%s7158_s9 + $0x2d8] sm:$0xff] }
 0xfbf   :  { %v6225_v35 = vpack.c.bf16 %v2034_v32, %v2031_v31 }
 0xfc1   :  { %6190 = vmatpush1.bf16.msra.mxu1 %v6189_v49  ;;  %v6249_v49 = vpack.c.bf16 %v1976_v40, %v1973_v38  ;;  %v2037_v38 = vld [vmem:[%s7158_s9 + $0x2a0] sm:$0xff]  ;;  %v2040_v40 = vld [vmem:[%s7158_s9 + $0x2b8] sm:$0xff] }
 0xfc2   :  { %6192 = vmatprep.subr.bf16.mxu1 %v6191_v50  ;;  %v2017_v50 = vld [vmem:[%s7158_s9 + $0x200] sm:$0xff]  ;;  %v6229_v41 = vpack.c.bf16 %v2040_v40, %v2037_v38 }
 0xfc3   :  { %v6211_v57 = vpack.c.bf16 %v2017_v50, %v2014_v48  ;;  %v2043_v48 = vld [vmem:[%s7158_s9 + $0x2d0] sm:$0xff] }
 0xfc5   :  { %6194 = vmatpush1.bf16.msra.mxu1 %v6193_v59  ;;  %v2016_v59 = vld [vmem:[%s7158_s9 + $0x1f8] sm:$0xff] }
 0xfc6   :  { %6196 = vmatprep.subr.bf16.mxu1 %v6195_v61  ;;  %v6253_v61 = vpack.c.bf16 %v1982_v53, %v1979_v52  ;;  %v1997_v52 = vld [vmem:[%s7158_s9 + $0x160] sm:$0xff]  ;;  %v2000_v53 = vld [vmem:[%s7158_s9 + $0x178] sm:$0xff] }
 0xfc7   :  { %v6265_v54 = vpack.c.bf16 %v2000_v53, %v1997_v52 }
 0xfc9   :  { %6198 = vmatpush1.bf16.msra.mxu1 %v6197_v17 }
 0xfca   :  { %6200 = vmatprep.subr.bf16.mxu1 %v6199_v18  ;;  %v2029_v18 = vld [vmem:[%s7158_s9 + $0x260] sm:$0xff] }
 0xfcb   :  { %v6219_v22 = vpack.c.bf16 %v2029_v18, %v2026_v16 }
0x101e   :  { %v1861_v34 = vpop.xlane.xlu1 %1860 }
0x101f   :  { %6768 = vrcp.f32 %v1861_v34  ;;  %v6245_v34 = vpack.c.bf16 %v1970_v27, %v1967_v24  ;;  %v2028_v24 = vld [vmem:[%s7158_s9 + $0x258] sm:$0xff] }
0x1029   :  { %v6769_v60 = vpop.eup %6768 }
0x102a   :  { %v1863_v5 = vmul.f32 %v6769_v60, %v7147_v62  ;;  %v1998_v62 = vld [vmem:[%s7158_s9 + $0x168] sm:$0xff]  ;;  %v2020_v60 = vld [vmem:[%s7158_s9 + $0x218] sm:$0xff] }
0x102b   :  { %v6201_v30 = vpack.c.bf16 %v1998_v62, %v1995_v19  ;;  %v6215_v12 = vpack.c.bf16 %v2023_v63, %v2020_v60  ;;  %v1991_v62 = vld [vmem:[%s7158_s9 + $0x130] sm:$0xff] }
0x102c   :  { %5845 = vmatmul.mubr.msk.f32.vlgmr.msra.gmra.mrb[18].mxu0 %vm1692_vm5, %v1863_v5  ;;  %v2039_v5 = vld [vmem:[%s7158_s9 + $0x2b0] sm:$0xff]  ;;  %v6261_v27 = vpack.c.bf16 %v1994_v20, %v1991_v62 }
0x102d   :  { %6238 = vmatpush3.bf16.msra.mxu0 %v6237_v2  ;;  %6202 = vmatpush1.bf16.msra.mxu1 %v6201_v30  ;;  %v1988_v2 = vld [vmem:[%s7158_s9 + $0x118] sm:$0xff]  ;;  %v6259_v19 = vpack.c.bf16 %v2042_v8, %v2039_v5 }
0x102e   :  { %6240 = vmatprep.subr.bf16.mxu0 %v6239_v11  ;;  %6204 = vmatprep.subr.bf16.mxu1 %v6203_v25  ;;  %v6213_v11 = vpack.c.bf16 %v2016_v59, %v2013_v58  ;;  %v6257_v17 = vpack.c.bf16 %v1988_v2, %v1985_v1  ;;  %v6223_v25 = vpack.c.bf16 %v2035_v29, %v2032_v28 }
0x1031   :  { %6242 = vmatpush3.bf16.msra.mxu0 %v6241_v21  ;;  %6206 = vmatpush1.bf16.msra.mxu1 %v6205_v44  ;;  %v6217_v21 = vpack.c.bf16 %v2022_v15, %v2019_v14  ;;  %v2047_v44 = vld [vmem:[%s7158_s9 + $0x2f0] sm:$0xff] }
0x1032   :  { %6244 = vmatprep.subr.bf16.mxu0 %v6243_v23  ;;  %6208 = vmatprep.subr.bf16.mxu1 %v6207_v45  ;;  %v2025_v23 = vld [vmem:[%s7158_s9 + $0x240] sm:$0xff]  ;;  %v6231_v46 = vpack.c.bf16 %v2047_v44, %v2044_v43 }
0x1033   :  { %v6221_v30 = vpack.c.bf16 %v2028_v24, %v2025_v23  ;;  %v2045_v45 = vld [vmem:[%s7158_s9 + $0x2e0] sm:$0xff] }
0x1034   :  { %v6263_v50 = vpack.c.bf16 %v2048_v47, %v2045_v45 }
0x1035   :  { %6246 = vmatpush3.bf16.msra.mxu0 %v6245_v34  ;;  %6210 = vmatpush1.bf16.msra.mxu1 %v6209_v56  ;;  %v2041_v34 = vld [vmem:[%s7158_s9 + $0x2c0] sm:$0xff] }
0x1036   :  { %6248 = vmatprep.subr.bf16.mxu0 %v6247_v36  ;;  %6212 = vmatprep.subr.bf16.mxu1 %v6211_v57  ;;  %v6227_v36 = vpack.c.bf16 %v2041_v34, %v2038_v33  ;;  %v1941_v57 = vlaneseq }
0x1038   :  { %v7263_v58 = vshrl.u32 %v1941_v57, 7  ;;  %v2624_v57 = vld [vmem:[%s7312_s26] sm:$0xff] }
0x1039   :  { %6250 = vmatpush3.bf16.msra.mxu0 %v6249_v49  ;;  %6214 = vmatpush1.bf16.msra.mxu1 %v6213_v11  ;;  %v2046_v49 = vld [vmem:[%s7158_s9 + $0x2e8] sm:$0xff]  ;;  %s5320_s9 = sld [smem:[%s7847_s0 + %s6868_s4]]  }
0x103a   :  { %6252 = vmatprep.subr.bf16.mxu0 %v6251_v51  ;;  %6216 = vmatprep.subr.bf16.mxu1 %v6215_v12  ;;  %v6233_v51 = vpack.c.bf16 %v2046_v49, %v2043_v48  ;;  %v7266_v59 = vsub.s32 1, %v7263_v58  ;;  %v7269_v60 = vsub.s32 0, %v7263_v58 }
0x103d   :  { %6254 = vmatpush3.bf16.msra.mxu0 %v6253_v61  ;;  %6218 = vmatpush1.bf16.msra.mxu1 %v6217_v21  ;;  %v1456_v61 = vld [vmem:[%s5316_s18] sm:$0x3]  ;;  %s6870_s18 = smov 21  }
0x103e   :  { %6256 = vmatprep.subr.bf16.mxu0 %v6255_v0  ;;  %6220 = vmatprep.subr.bf16.mxu1 %v6219_v22  ;;  %v1948_v63 = vrot.slane %v1456_v61, %v7266_v59  ;;  %v1944_v0 = vrot.slane %v1456_v61, %v7269_v60  ;;  %v2626_v61 = vld [vmem:[%s7312_s26 + $0x10] sm:$0xff]  ;;  %s5322_s21 = sld [smem:[%s7847_s0 + %s6870_s18]]  }
0x1041   :  { %6258 = vmatpush3.bf16.msra.mxu0 %v6257_v17  ;;  %6222 = vmatpush1.bf16.msra.mxu1 %v6221_v30 }
0x1042   :  { %6260 = vmatprep.subr.bf16.mxu0 %v6259_v19  ;;  %6224 = vmatprep.subr.bf16.mxu1 %v6223_v25 }
0x1045   :  { %6262 = vmatpush3.bf16.msra.mxu0 %v6261_v27  ;;  %6226 = vmatpush1.bf16.msra.mxu1 %v6225_v35 }
0x1046   :  { %6228 = vmatprep.subr.bf16.mxu1 %v6227_v36  ;;  %6264 = vmatprep.subr.bf16.mxu0 %v6263_v50 }
0x1049   :  { %6230 = vmatpush1.bf16.msra.mxu1 %v6229_v41  ;;  %6266 = vmatpush3.bf16.msra.mxu0 %v6265_v54 }
0x104a   :  { %6232 = vmatprep.subr.bf16.mxu1 %v6231_v46  ;;  %5847 = vmatprep.subr.mxu0 %v6847_v26 }
0x104d   :  { %6234 = vmatpush1.bf16.msra.mxu1 %v6233_v51 }
0x104e   :  { %5867 = vmatprep.subr.mxu1 %v6847_v26 }
0x108c   :  { %v1766_v55 = vpop.f32.mrb[16].mxu0 }
0x108d   :  { %v5836_v56 = vpop.f32.mrb[17].mxu0  ;;  %v1951_v8 = vadd.f32 %v1944_v0, %v1766_v55  ;;  %v2625_v55 = vld [vmem:[%s7312_s26 + $0x8] sm:$0xff] }
0x108e   :  { %v2627_v56 = vld [vmem:[%s7312_s26 + $0x18] sm:$0xff]  ;;  %v2629_v0 = vld [vmem:[%s7312_s26 + $0x28] sm:$0xff] }
0x10ff   :  { %v1936_v1 = vpop.f32.mrb[18].mxu0 }
0x1100   :  { %v1952_v2 = vadd.f32 %v1948_v63, %v1936_v1  ;;  %v5846_v5 = vpop.f32.mrb[19].mxu0  ;;  %v2631_v1 = vld [vmem:[%s7312_s26 + $0x38] sm:$0xff] }
0x1102   :  { %2114 = vmatprep.mubr.f32.mxu1 %v1952_v2  ;;  %2185 = vmatprep.mubr.f32.mxu0 %v1952_v2 }
0x1103   :  { %2115 = vmatmul.mubr.f32.vlgmr.msra.gmra.mrb[20].mxu1 %v1951_v8  ;;  %2186 = vmatmul.mubr.f32.vlgmr.msra.gmra.mrb[20].mxu0 %v1951_v8  ;;  %v6267_v8 = vpack.c.bf16 %v2627_v56, %v2625_v55  ;;  %v2659_v55 = vld [vmem:[%s7312_s26 + $0x118] sm:$0xff] }
0x1104   :  { %5849 = vmatprep.mubr.msk.f32.mxu0 %vm6846_vm9, %v6847_v26  ;;  %5869 = vmatprep.mubr.msk.f32.mxu1 %vm6846_vm9, %v6847_v26 }
0x11d6   :  { %v2116_v11 = vpop.f32.mrb[20].mxu1  ;;  %v5523_v12 = vpop.f32.mrb[20].mxu0 }
0x11d7   :  { %v2118_v14 = vpop.f32.mrb[21].mxu1  ;;  %v5524_v15 = vpop.f32.mrb[21].mxu0 }
0x11d8   :  { %v5525_v16 = vadd.f32 %v5524_v15, %v5523_v12  ;;  %v2543_v12 = vld [vmem:[%s5309_s30] sm:$0xff]  ;;  %v6271_v15 = vpack.c.bf16 %v2631_v1, %v2629_v0  ;;  %v2661_v0 = vld [vmem:[%s7312_s26 + $0x128] sm:$0xff]  ;;  %v2663_v1 = vld [vmem:[%s7312_s26 + $0x138] sm:$0xff] }
0x11da   :  { %2265 = vperm.xlu1 %6693, %v5525_v16   ;;  %5848 = vmatpush3.xpose.msk.msra.mxu0 %vm234_vm2, %v5525_v16 }
0x11db   :  { %5852 = vmatprep.subr.mxu0 %v6847_v26 }
0x11dd   :  { %5850 = vmatmul.mubr.msk.f32.vlgmr.msra.gmra.mrb[22].mxu0 %vm234_vm2, %v6840_v9 }
0x11de   :  { %5853 = vmatpush3.msk.msra.mxu0 %vm1696_vm15, %v2116_v11  ;;  %5854 = vmatprep.mubr.msk.f32.mxu0 %vm6846_vm9, %v6847_v26 }
0x11df   :  { %5857 = vmatprep.subr.mxu0 %v6847_v26  ;;  %6696 = vset.pattern.permute.xlu1 %v6856_v7 }
0x1259   :  { %v2266_v17 = vpop.permute.xlu1 %2265 }
0x12b0   :  { %v2260_v18 = vpop.f32.mrb[22].mxu0 }
0x12b1   :  { %v2268_v19 = vadd.f32 %v2266_v17, %v2260_v18  ;;  %v5851_v62 = vpop.f32.mrb[23].mxu0  ;;  %v2630_v17 = vld [vmem:[%s7312_s26 + $0x30] sm:$0xff]  ;;  %v2633_v18 = vld [vmem:[%s7312_s26 + $0x48] sm:$0xff] }
0x12b3   :  { %vm2269_vm6 = vcmp.gt.f32.partialorder %v2268_v19, 0.0  ;;  %v2270_v20 = vmul.f32 0.2, %v2268_v19 }
0x12b5   :  { %v2271_v21 = vsel %vm2269_vm6, %v2268_v19, %v2270_v20  ;;  %v2635_v19 = vld [vmem:[%s7312_s26 + $0x58] sm:$0xff] }
0x12b6   :  { %v2272_v22 = vadd.f32 %v2271_v21, %v7140_v42  ;;  %v6275_v20 = vpack.c.bf16 %v2635_v19, %v2633_v18  ;;  %v2632_v21 = vld [vmem:[%s7312_s26 + $0x40] sm:$0xff]  ;;  %v2666_v18 = vld [vmem:[%s7312_s26 + $0x150] sm:$0xff]  ;;  %v2669_v19 = vld [vmem:[%s7312_s26 + $0x168] sm:$0xff] }
0x12b8   :  { %v2273_v23 = vsel %vm1680_vm1, %v2272_v22, -inf }
0x12b9   :  { %2274 = vmax.xlane.f32.xlu1 %v2273_v23  ;;  %v2637_v23 = vld [vmem:[%s7312_s26 + $0x68] sm:$0xff] }
0x1346   :  { %v2275_v24 = vpop.xlane.xlu1 %2274 }
0x1347   :  { %v2276_v27 = vsub.f32 %v2272_v22, %v2275_v24  ;;  %v2634_v22 = vld [vmem:[%s7312_s26 + $0x50] sm:$0xff]  ;;  %v2639_v24 = vld [vmem:[%s7312_s26 + $0x78] sm:$0xff] }
0x1349   :  { %v2277_v28 = vmul.f32 1.442695, %v2276_v27  ;;  %v6277_v27 = vpack.c.bf16 %v2634_v22, %v2632_v21  ;;  %v2668_v22 = vld [vmem:[%s7312_s26 + $0x160] sm:$0xff] }
0x134b   :  { %6770 = vpow2.f32 %v2277_v28  ;;  %v6279_v28 = vpack.c.bf16 %v2639_v24, %v2637_v23  ;;  %v2670_v23 = vld [vmem:[%s7312_s26 + $0x170] sm:$0xff]  ;;  %v2673_v24 = vld [vmem:[%s7312_s26 + $0x188] sm:$0xff] }
0x1355   :  { %v6771_v29 = vpop.eup %6770 }
0x1356   :  { %v2279_v30 = vsel %vm1680_vm1, %v6771_v29, 0.0 }
0x1357   :  { %2280 = vadd.xlane.f32.xlu0 %v2279_v30  ;;  %v2638_v30 = vld [vmem:[%s7312_s26 + $0x70] sm:$0xff] }
0x136d   :  { %2360 = vrot.lane.b32.xlu0 %v5525_v16, %s6855_s8 }
0x1371   :  { %2435 = vperm.xlu0 %6694, %v5525_v16   ;;  %v2628_v16 = vld [vmem:[%s7312_s26 + $0x20] sm:$0xff] }
0x1372   :  { %v6273_v62 = vpack.c.bf16 %v2630_v17, %v2628_v16  ;;  %v2664_v17 = vld [vmem:[%s7312_s26 + $0x140] sm:$0xff] }
0x1375   :  { %6695 = vset.pattern.permute.xlu0 %v6853_v10 }
0x13e4   :  { %v2281_v7 = vpop.xlane.xlu0 %2280 }
0x13e5   :  { %6772 = vrcp.f32 %v2281_v7  ;;  %v2641_v7 = vld [vmem:[%s7312_s26 + $0x88] sm:$0xff] }
0x13e8   :  { %v2361_v32 = vpop.permute.xlu0 %2360 }
0x13ef   :  { %v6773_v25 = vpop.eup %6772 }
0x13f0   :  { %v2283_v31 = vmul.f32 %v6773_v25, %v6771_v29  ;;  %v2436_v34 = vpop.permute.xlu0 %2435  ;;  %v2636_v29 = vld [vmem:[%s7312_s26 + $0x60] sm:$0xff]  ;;  %v2643_v25 = vld [vmem:[%s7312_s26 + $0x98] sm:$0xff] }
0x13f2   :  { %5855 = vmatmul.mubr.msk.f32.vlgmr.msra.gmra.mrb[24].mxu0 %vm1692_vm5, %v2283_v31  ;;  %v6281_v31 = vpack.c.bf16 %v2638_v30, %v2636_v29  ;;  %v2672_v30 = vld [vmem:[%s7312_s26 + $0x180] sm:$0xff] }
0x13f3   :  { %5858 = vmatpush3.xpose.msk.msra.mxu0 %vm234_vm2, %v2361_v32  ;;  %5859 = vmatprep.mubr.msk.f32.mxu0 %vm6846_vm9, %v6847_v26  ;;  %v6283_v32 = vpack.c.bf16 %v2643_v25, %v2641_v7  ;;  %v2674_v7 = vld [vmem:[%s7312_s26 + $0x190] sm:$0xff]  ;;  %v2677_v25 = vld [vmem:[%s7312_s26 + $0x1a8] sm:$0xff] }
0x13f4   :  { %5862 = vmatprep.subr.mxu0 %v6847_v26 }
0x13f6   :  { %5860 = vmatmul.mubr.msk.f32.vlgmr.msra.gmra.mrb[26].mxu0 %vm234_vm2, %v6840_v9 }
0x13f7   :  { %5863 = vmatpush3.msk.msra.mxu0 %vm1696_vm15, %v2118_v14  ;;  %5864 = vmatprep.mubr.msk.f32.mxu0 %vm6846_vm9, %v6847_v26  ;;  %v6269_v14 = vpack.c.bf16 %v2626_v61, %v2624_v57  ;;  %v2656_v61 = vld [vmem:[%s7312_s26 + $0x100] sm:$0xff] }
0x14c5   :  { %v2356_v10 = vpop.f32.mrb[24].mxu0 }
0x14c6   :  { %v5856_v33 = vpop.f32.mrb[25].mxu0 }
0x14c7   :  { %v2642_v33 = vld [vmem:[%s7312_s26 + $0x90] sm:$0xff] }
0x14c9   :  { %v2430_v35 = vpop.f32.mrb[26].mxu0 }
0x14ca   :  { %v2438_v36 = vadd.f32 %v2436_v34, %v2430_v35  ;;  %v5861_v38 = vpop.f32.mrb[27].mxu0  ;;  %v2645_v34 = vld [vmem:[%s7312_s26 + $0xa8] sm:$0xff]  ;;  %v2647_v35 = vld [vmem:[%s7312_s26 + $0xb8] sm:$0xff] }
0x14cb   :  { %v6287_v38 = vpack.c.bf16 %v2647_v35, %v2645_v34  ;;  %v2678_v34 = vld [vmem:[%s7312_s26 + $0x1b0] sm:$0xff]  ;;  %v2681_v35 = vld [vmem:[%s7312_s26 + $0x1c8] sm:$0xff] }
0x14cc   :  { %vm2439_vm7 = vcmp.gt.f32.partialorder %v2438_v36, 0.0  ;;  %v2440_v40 = vmul.f32 0.2, %v2438_v36 }
0x14ce   :  { %v2441_v41 = vsel %vm2439_vm7, %v2438_v36, %v2440_v40  ;;  %v2644_v40 = vld [vmem:[%s7312_s26 + $0xa0] sm:$0xff] }
0x14cf   :  { %v2442_v43 = vadd.f32 %v2441_v41, %v7140_v42  ;;  %v2049_v42 = vld [vmem:[%s5318_s22] sm:$0x3]  ;;  %v2646_v41 = vld [vmem:[%s7312_s26 + $0xb0] sm:$0xff]  ;;  %s6871_s22 = smov 22  }
0x14d0   :  { %v2538_v53 = vrot.slane %v2049_v42, %v7266_v59  ;;  %v2534_v54 = vrot.slane %v2049_v42, %v7269_v60  ;;  %v2652_v42 = vld [vmem:[%s7312_s26 + $0xe0] sm:$0xff]  ;;  %s7535_s25 = sld [smem:[%s7847_s0 + %s6871_s22]]  }
0x14d1   :  { %v2443_v44 = vsel %vm1680_vm1, %v2442_v43, -inf }
0x14d2   :  { %2444 = vmax.xlane.f32.xlu1 %v2443_v44  ;;  %v2541_v11 = vadd.f32 %v2534_v54, %v2356_v10  ;;  %v2640_v10 = vld [vmem:[%s7312_s26 + $0x80] sm:$0xff]  ;;  %v2651_v44 = vld [vmem:[%s7312_s26 + $0xd8] sm:$0xff]  ;;  %v2657_v54 = vld [vmem:[%s7312_s26 + $0x108] sm:$0xff] }
0x14d3   :  { %v6285_v36 = vpack.c.bf16 %v2642_v33, %v2640_v10  ;;  %v6299_v57 = vpack.c.bf16 %v2659_v55, %v2657_v54  ;;  %v2676_v33 = vld [vmem:[%s7312_s26 + $0x1a0] sm:$0xff] }
0x155f   :  { %v2445_v45 = vpop.xlane.xlu1 %2444 }
0x1560   :  { %v2446_v46 = vsub.f32 %v2442_v43, %v2445_v45  ;;  %v2649_v43 = vld [vmem:[%s7312_s26 + $0xc8] sm:$0xff]  ;;  %v6289_v45 = vpack.c.bf16 %v2646_v41, %v2644_v40  ;;  %v2680_v41 = vld [vmem:[%s7312_s26 + $0x1c0] sm:$0xff] }
0x1562   :  { %v2447_v47 = vmul.f32 1.442695, %v2446_v46  ;;  %v6291_v46 = vpack.c.bf16 %v2651_v44, %v2649_v43  ;;  %v2682_v43 = vld [vmem:[%s7312_s26 + $0x1d0] sm:$0xff]  ;;  %v2685_v44 = vld [vmem:[%s7312_s26 + $0x1e8] sm:$0xff] }
0x1564   :  { %6774 = vpow2.f32 %v2447_v47  ;;  %v2648_v47 = vld [vmem:[%s7312_s26 + $0xc0] sm:$0xff] }
0x156e   :  { %v6775_v48 = vpop.eup %6774 }
0x156f   :  { %v2449_v49 = vsel %vm1680_vm1, %v6775_v48, 0.0 }
0x1570   :  { %2450 = vadd.xlane.f32.xlu1 %v2449_v49  ;;  %v2653_v49 = vld [vmem:[%s7312_s26 + $0xe8] sm:$0xff] }
0x15fd   :  { %v2451_v50 = vpop.xlane.xlu1 %2450 }
0x15fe   :  { %6776 = vrcp.f32 %v2451_v50  ;;  %v2655_v50 = vld [vmem:[%s7312_s26 + $0xf8] sm:$0xff] }
0x1608   :  { %v6777_v51 = vpop.eup %6776 }
0x1609   :  { %v2453_v52 = vmul.f32 %v6777_v51, %v6775_v48  ;;  %v2650_v48 = vld [vmem:[%s7312_s26 + $0xd0] sm:$0xff] }
0x160a   :  { %v6293_v51 = vpack.c.bf16 %v2650_v48, %v2648_v47  ;;  %v2684_v48 = vld [vmem:[%s7312_s26 + $0x1e0] sm:$0xff] }
0x160b   :  { %5865 = vmatmul.mubr.msk.f32.vlgmr.msra.gmra.mrb[28].mxu0 %vm1692_vm5, %v2453_v52  ;;  %v6295_v52 = vpack.c.bf16 %v2655_v50, %v2653_v49  ;;  %v2686_v49 = vld [vmem:[%s7312_s26 + $0x1f0] sm:$0xff] }
0x160c   :  { %2617 = vmatprep.mubr.f32.mxu0 %v6847_v26  ;;  %v6329_v50 = vpack.c.bf16 %v2686_v49, %v2684_v48 }
0x16de   :  { %v2526_v63 = vpop.f32.mrb[28].mxu0 }
0x16df   :  { %v2542_v2 = vadd.f32 %v2538_v53, %v2526_v63  ;;  %v5866_v5 = vpop.f32.mrb[29].mxu0  ;;  %v2654_v53 = vld [vmem:[%s7312_s26 + $0xf0] sm:$0xff] }
0x16e0   :  { %v6297_v56 = vpack.c.bf16 %v2654_v53, %v2652_v42  ;;  %v2658_v63 = vld [vmem:[%s7312_s26 + $0x110] sm:$0xff]  ;;  %v6303_v5 = vpack.c.bf16 %v2663_v1, %v2661_v0  ;;  %v7398_v0 = vld [vmem:[%s7011_s7] sm:$0xff]  ;;  %s6867_s7 = smov 20  }
0x16e1   :  { %5378 = vmatprep.subr.msk.mxu0 %vm1696_vm15, %v2542_v2  ;;  %v6301_v2 = vpack.c.bf16 %v2658_v63, %v2656_v61  ;;  %s7422_s3 = sld [smem:[%s7847_s0 + %s6867_s7]]  }
0x16e2   :  { %5379 = vmatpush1.msk.msra.mxu0 %vm1696_vm15, %v2541_v11  ;;  %v2662_v11 = vld [vmem:[%s7312_s26 + $0x130] sm:$0xff] }
0x16e3   :  { %5380 = vmatmul.mubr.msk.f32.vlgmr.msra.gmra.mrb[30].mxu0 %vm1692_vm5, %v2543_v12  ;;  %6268 = vmatprep.subr.bf16.mxu0 %v6267_v8  ;;  %v2660_v8 = vld [vmem:[%s7312_s26 + $0x120] sm:$0xff]  ;;  %v2665_v12 = vld [vmem:[%s7312_s26 + $0x148] sm:$0xff] }
0x16e4   :  { %6270 = vmatpush1.bf16.msra.mxu0 %v6269_v14  ;;  %v2667_v14 = vld [vmem:[%s7312_s26 + $0x158] sm:$0xff] }
0x16e5   :  { %6272 = vmatprep.subr.bf16.mxu0 %v6271_v15  ;;  %v6305_v15 = vpack.c.bf16 %v2662_v11, %v2660_v8  ;;  %v6307_v16 = vpack.c.bf16 %v2667_v14, %v2665_v12 }
0x16e7   :  { %v3113_v48 = vld [vmem:[%s7422_s3 + $0x20] sm:$0xff]  ;;  %v3115_v49 = vld [vmem:[%s7422_s3 + $0x30] sm:$0xff] }
0x16e8   :  { %6274 = vmatpush1.bf16.msra.mxu0 %v6273_v62  ;;  %v2671_v62 = vld [vmem:[%s7312_s26 + $0x178] sm:$0xff] }
0x16e9   :  { %6276 = vmatprep.subr.bf16.mxu0 %v6275_v20  ;;  %v6309_v20 = vpack.c.bf16 %v2666_v18, %v2664_v17  ;;  %v6311_v21 = vpack.c.bf16 %v2671_v62, %v2669_v19 }
0x16ec   :  { %6278 = vmatpush1.bf16.msra.mxu0 %v6277_v27  ;;  %v2675_v27 = vld [vmem:[%s7312_s26 + $0x198] sm:$0xff] }
0x16ed   :  { %6280 = vmatprep.subr.bf16.mxu0 %v6279_v28  ;;  %v6313_v28 = vpack.c.bf16 %v2670_v23, %v2668_v22  ;;  %v6315_v29 = vpack.c.bf16 %v2675_v27, %v2673_v24 }
0x16f0   :  { %6282 = vmatpush1.bf16.msra.mxu0 %v6281_v31  ;;  %v2679_v31 = vld [vmem:[%s7312_s26 + $0x1b8] sm:$0xff] }
0x16f1   :  { %6284 = vmatprep.subr.bf16.mxu0 %v6283_v32  ;;  %v6317_v32 = vpack.c.bf16 %v2674_v7, %v2672_v30  ;;  %v6319_v10 = vpack.c.bf16 %v2679_v31, %v2677_v25 }
0x16f4   :  { %6286 = vmatpush1.bf16.msra.mxu0 %v6285_v36  ;;  %v2683_v36 = vld [vmem:[%s7312_s26 + $0x1d8] sm:$0xff] }
0x16f5   :  { %6288 = vmatprep.subr.bf16.mxu0 %v6287_v38  ;;  %v6321_v38 = vpack.c.bf16 %v2678_v34, %v2676_v33  ;;  %v6323_v40 = vpack.c.bf16 %v2683_v36, %v2681_v35  ;;  %v3110_v36 = vld [vmem:[%s7422_s3 + $0x8] sm:$0xff] }
0x16f8   :  { %6290 = vmatpush1.bf16.msra.mxu0 %v6289_v45  ;;  %v2687_v45 = vld [vmem:[%s7312_s26 + $0x1f8] sm:$0xff] }
0x16f9   :  { %6292 = vmatprep.subr.bf16.mxu0 %v6291_v46  ;;  %v6325_v46 = vpack.c.bf16 %v2682_v43, %v2680_v41  ;;  %v6327_v47 = vpack.c.bf16 %v2687_v45, %v2685_v44  ;;  %v3111_v43 = vld [vmem:[%s7422_s3 + $0x10] sm:$0xff]  ;;  %v3114_v44 = vld [vmem:[%s7422_s3 + $0x28] sm:$0xff]  ;;  %v3116_v45 = vld [vmem:[%s7422_s3 + $0x38] sm:$0xff] }
0x16fc   :  { %6294 = vmatpush1.bf16.msra.mxu0 %v6293_v51 }
0x16fd   :  { %6296 = vmatprep.subr.bf16.mxu0 %v6295_v52 }
0x1700   :  { %6298 = vmatpush1.bf16.msra.mxu0 %v6297_v56 }
0x1701   :  { %6300 = vmatprep.subr.bf16.mxu0 %v6299_v57 }
0x1704   :  { %6302 = vmatpush1.bf16.msra.mxu0 %v6301_v2 }
0x1705   :  { %6304 = vmatprep.subr.bf16.mxu0 %v6303_v5 }
0x1708   :  { %6306 = vmatpush1.bf16.msra.mxu0 %v6305_v15 }
0x1709   :  { %6308 = vmatprep.subr.bf16.mxu0 %v6307_v16 }
0x170c   :  { %6310 = vmatpush1.bf16.msra.mxu0 %v6309_v20 }
0x170d   :  { %6312 = vmatprep.subr.bf16.mxu0 %v6311_v21 }
0x1710   :  { %6314 = vmatpush1.bf16.msra.mxu0 %v6313_v28 }
0x1711   :  { %6316 = vmatprep.subr.bf16.mxu0 %v6315_v29 }
0x1714   :  { %6318 = vmatpush1.bf16.msra.mxu0 %v6317_v32 }
0x1715   :  { %6320 = vmatprep.subr.bf16.mxu0 %v6319_v10 }
0x1718   :  { %6322 = vmatpush1.bf16.msra.mxu0 %v6321_v38  ;;  %v3112_v38 = vld [vmem:[%s7422_s3 + $0x18] sm:$0xff] }
0x1719   :  { %6324 = vmatprep.subr.bf16.mxu0 %v6323_v40  ;;  %v3109_v40 = vld [vmem:[%s7422_s3] sm:$0xff]  ;;  %v6331_v41 = vpack.c.bf16 %v3112_v38, %v3110_v36  ;;  %v3143_v38 = vld [vmem:[%s7422_s3 + $0x110] sm:$0xff] }
0x171a   :  { %v3141_v36 = vld [vmem:[%s7422_s3 + $0x100] sm:$0xff] }
0x171c   :  { %6326 = vmatpush1.bf16.msra.mxu0 %v6325_v46  ;;  %v6333_v46 = vpack.c.bf16 %v3111_v43, %v3109_v40  ;;  %v3146_v40 = vld [vmem:[%s7422_s3 + $0x128] sm:$0xff]  ;;  %v6365_v43 = vpack.c.bf16 %v3143_v38, %v3141_v36 }
0x171d   :  { %6328 = vmatprep.subr.bf16.mxu0 %v6327_v47  ;;  %v6335_v47 = vpack.c.bf16 %v3116_v45, %v3114_v44  ;;  %v3145_v45 = vld [vmem:[%s7422_s3 + $0x120] sm:$0xff] }
0x1720   :  { %6330 = vmatpush1.bf16.msra.mxu0 %v6329_v50  ;;  %v3118_v50 = vld [vmem:[%s7422_s3 + $0x48] sm:$0xff] }
0x1721   :  { %5887 = vmatprep.subr.mxu0 %v6847_v26 }
0x17b6   :  { %v2619_v51 = vpop.f32.mrb[30].mxu0 }
0x17b7   :  { %v2621_v52 = vpop.f32.mrb[31].mxu0 }
0x17b8   :  { %2753 = vmatprep.mubr.f32.mxu0 %v2621_v52  ;;  %v6337_v52 = vpack.c.bf16 %v3115_v49, %v3113_v48  ;;  %v3152_v48 = vld [vmem:[%s7422_s3 + $0x158] sm:$0xff] }
0x17b9   :  { %2754 = vmatmul.mubr.f32.vlgmr.msra.gmra.mrb[32].mxu0 %v2619_v51  ;;  %v3120_v51 = vld [vmem:[%s7422_s3 + $0x58] sm:$0xff] }
0x17ba   :  { %5889 = vmatprep.mubr.msk.f32.mxu0 %vm6846_vm9, %v6847_v26 }
0x188c   :  { %v2755_v42 = vpop.f32.mrb[32].mxu0 }
0x188d   :  { %v2757_v53 = vpop.f32.mrb[33].mxu0 }
0x188e   :  { %2834 = vperm.xlu0 %6695, %v2757_v53   ;;  %5868 = vmatpush3.xpose.msk.msra.mxu1 %vm234_vm2, %v2757_v53 }
0x188f   :  { %5872 = vmatprep.subr.mxu1 %v6847_v26 }
0x1891   :  { %5870 = vmatmul.mubr.msk.f32.vlgmr.msra.gmra.mrb[22].mxu1 %vm234_vm2, %v6840_v9 }
0x1892   :  { %2926 = vrot.lane.b32.xlu0 %v2757_v53, %s6855_s8  ;;  %5873 = vmatpush3.msra.mxu1 %v2755_v42 }
0x1893   :  { %5874 = vmatprep.mubr.msk.f32.mxu1 %vm6846_vm9, %v6847_v26  ;;  %5877 = vmatprep.subr.mxu1 %v6847_v26 }
0x190d   :  { %v2835_v54 = vpop.permute.xlu0 %2834 }
0x1911   :  { %v2927_v18 = vpop.permute.xlu0 %2926 }
0x1964   :  { %v2829_v55 = vpop.f32.mrb[22].mxu1 }
0x1965   :  { %v2837_v56 = vadd.f32 %v2835_v54, %v2829_v55  ;;  %v5871_v57 = vpop.f32.mrb[23].mxu1  ;;  %v3119_v54 = vld [vmem:[%s7422_s3 + $0x50] sm:$0xff]  ;;  %v3122_v55 = vld [vmem:[%s7422_s3 + $0x68] sm:$0xff] }
0x1967   :  { %vm2838_vm12 = vcmp.gt.f32.partialorder %v2837_v56, 0.0  ;;  %v2839_v61 = vmul.f32 0.2, %v2837_v56 }
0x1969   :  { %v2840_v63 = vsel %vm2838_vm12, %v2837_v56, %v2839_v61  ;;  %v3124_v56 = vld [vmem:[%s7422_s3 + $0x78] sm:$0xff] }
0x196a   :  { %v2841_v1 = vadd.f32 %v7398_v0, %v2840_v63  ;;  %v6343_v61 = vpack.c.bf16 %v3124_v56, %v3122_v55  ;;  %v3121_v63 = vld [vmem:[%s7422_s3 + $0x60] sm:$0xff] }
0x196b   :  { %v3153_v56 = vld [vmem:[%s7422_s3 + $0x160] sm:$0xff] }
0x196c   :  { %v2842_v2 = vsel %vm991_vm13, %v2841_v1, -inf }
0x196d   :  { %2843 = vmax.xlane.f32.xlu1 %v2842_v2  ;;  %v3126_v2 = vld [vmem:[%s7422_s3 + $0x88] sm:$0xff] }
0x19fa   :  { %v2844_v5 = vpop.xlane.xlu1 %2843 }
0x19fb   :  { %v2845_v8 = vsub.f32 %v2841_v1, %v2844_v5  ;;  %v3123_v1 = vld [vmem:[%s7422_s3 + $0x70] sm:$0xff]  ;;  %v3128_v5 = vld [vmem:[%s7422_s3 + $0x98] sm:$0xff] }
0x19fd   :  { %v2846_v11 = vmul.f32 1.442695, %v2845_v8  ;;  %v6345_v8 = vpack.c.bf16 %v3123_v1, %v3121_v63  ;;  %v3160_v63 = vld [vmem:[%s7422_s3 + $0x198] sm:$0xff] }
0x19ff   :  { %6778 = vpow2.f32 %v2846_v11  ;;  %v6347_v11 = vpack.c.bf16 %v3128_v5, %v3126_v2  ;;  %v3157_v5 = vld [vmem:[%s7422_s3 + $0x180] sm:$0xff] }
0x1a09   :  { %v6779_v12 = vpop.eup %6778 }
0x1a0a   :  { %v2848_v14 = vsel %vm991_vm13, %v6779_v12, 0.0 }
0x1a0b   :  { %2849 = vadd.xlane.f32.xlu1 %v2848_v14  ;;  %v3127_v14 = vld [vmem:[%s7422_s3 + $0x90] sm:$0xff] }
0x1a1c   :  { %3001 = vperm.xlu1 %6696, %v2757_v53   ;;  %v3117_v53 = vld [vmem:[%s7422_s3 + $0x40] sm:$0xff] }
0x1a1d   :  { %v6341_v57 = vpack.c.bf16 %v3119_v54, %v3117_v53  ;;  %v3156_v53 = vld [vmem:[%s7422_s3 + $0x178] sm:$0xff] }
0x1a98   :  { %v2850_v15 = vpop.xlane.xlu1 %2849 }
0x1a99   :  { %6780 = vrcp.f32 %v2850_v15  ;;  %v3130_v15 = vld [vmem:[%s7422_s3 + $0xa8] sm:$0xff] }
0x1a9c   :  { %v3002_v20 = vpop.permute.xlu1 %3001 }
0x1aa3   :  { %v6781_v16 = vpop.eup %6780 }
0x1aa4   :  { %v2852_v17 = vmul.f32 %v6781_v16, %v6779_v12  ;;  %v3125_v12 = vld [vmem:[%s7422_s3 + $0x80] sm:$0xff]  ;;  %v3132_v16 = vld [vmem:[%s7422_s3 + $0xb8] sm:$0xff] }
0x1aa6   :  { %5875 = vmatmul.mubr.msk.f32.vlgmr.msra.gmra.mrb[24].mxu1 %vm991_vm13, %v2852_v17  ;;  %v6349_v17 = vpack.c.bf16 %v3127_v14, %v3125_v12  ;;  %v3164_v12 = vld [vmem:[%s7422_s3 + $0x1b8] sm:$0xff] }
0x1aa7   :  { %5878 = vmatpush3.xpose.msk.msra.mxu1 %vm234_vm2, %v2927_v18  ;;  %5879 = vmatprep.mubr.msk.f32.mxu1 %vm6846_vm9, %v6847_v26  ;;  %v6351_v18 = vpack.c.bf16 %v3132_v16, %v3130_v15  ;;  %v3161_v16 = vld [vmem:[%s7422_s3 + $0x1a0] sm:$0xff] }
0x1aa8   :  { %5882 = vmatprep.subr.mxu1 %v6847_v26 }
0x1aaa   :  { %5880 = vmatmul.mubr.msk.f32.vlgmr.msra.gmra.mrb[26].mxu1 %vm234_vm2, %v6840_v9 }
0x1aab   :  { %5884 = vmatprep.mubr.msk.f32.mxu1 %vm6846_vm9, %v6847_v26 }
0x1b79   :  { %v7412_v19 = vpop.f32.mrb[24].mxu1 }
0x1b7a   :  { %v5876_v62 = vpop.f32.mrb[25].mxu1 }
0x1b7b   :  { %v3129_v62 = vld [vmem:[%s7422_s3 + $0xa0] sm:$0xff] }
0x1b7d   :  { %v2996_v21 = vpop.f32.mrb[26].mxu1 }
0x1b7e   :  { %v3004_v22 = vadd.f32 %v3002_v20, %v2996_v21  ;;  %v5881_v23 = vpop.f32.mrb[27].mxu1  ;;  %v3131_v20 = vld [vmem:[%s7422_s3 + $0xb0] sm:$0xff]  ;;  %v3134_v21 = vld [vmem:[%s7422_s3 + $0xc8] sm:$0xff] }
0x1b7f   :  { %v6353_v23 = vpack.c.bf16 %v3131_v20, %v3129_v62  ;;  %v3168_v62 = vld [vmem:[%s7422_s3 + $0x1d8] sm:$0xff] }
0x1b80   :  { %vm3005_vm14 = vcmp.gt.f32.partialorder %v3004_v22, 0.0  ;;  %v3006_v24 = vmul.f32 0.2, %v3004_v22 }
0x1b82   :  { %v3007_v27 = vsel %vm3005_vm14, %v3004_v22, %v3006_v24  ;;  %v3136_v22 = vld [vmem:[%s7422_s3 + $0xd8] sm:$0xff] }
0x1b83   :  { %v3008_v28 = vadd.f32 %v7398_v0, %v3007_v27  ;;  %v6355_v24 = vpack.c.bf16 %v3136_v22, %v3134_v21  ;;  %v3133_v27 = vld [vmem:[%s7422_s3 + $0xc0] sm:$0xff] }
0x1b84   :  { %v3165_v22 = vld [vmem:[%s7422_s3 + $0x1c0] sm:$0xff] }
0x1b85   :  { %v3009_v29 = vsel %vm991_vm13, %v3008_v28, -inf }
0x1b86   :  { %3010 = vmax.xlane.f32.xlu0 %v3009_v29  ;;  %v3138_v29 = vld [vmem:[%s7422_s3 + $0xe8] sm:$0xff] }
0x1b9c   :  { %3021 = vrot.lane.b32.xlu0 %v2755_v42, %s6841_s10  ;;  %v6339_v42 = vpack.c.bf16 %v3120_v51, %v3118_v50  ;;  %v3149_v51 = vld [vmem:[%s7422_s3 + $0x140] sm:$0xff] }
0x1c13   :  { %v3011_v30 = vpop.xlane.xlu0 %3010 }
0x1c14   :  { %v3012_v7 = vsub.f32 %v3008_v28, %v3011_v30  ;;  %v3135_v28 = vld [vmem:[%s7422_s3 + $0xd0] sm:$0xff]  ;;  %v3140_v30 = vld [vmem:[%s7422_s3 + $0xf8] sm:$0xff] }
0x1c16   :  { %v3013_v25 = vmul.f32 1.442695, %v3012_v7  ;;  %v6357_v7 = vpack.c.bf16 %v3135_v28, %v3133_v27  ;;  %v3170_v27 = vld [vmem:[%s7422_s3 + $0x1e8] sm:$0xff]  ;;  %v3172_v28 = vld [vmem:[%s7422_s3 + $0x1f8] sm:$0xff] }
0x1c17   :  { %v3022_v31 = vpop.permute.xlu0 %3021 }
0x1c18   :  { %6782 = vpow2.f32 %v3013_v25  ;;  %5883 = vmatpush3.msra.mxu1 %v3022_v31  ;;  %v6359_v25 = vpack.c.bf16 %v3140_v30, %v3138_v29  ;;  %v3137_v31 = vld [vmem:[%s7422_s3 + $0xe0] sm:$0xff]  ;;  %v6391_v29 = vpack.c.bf16 %v3172_v28, %v3170_v27  ;;  %v3678_v28 = vld [vmem:[%s7535_s25 + $0x8] sm:$0xff] }
0x1c19   :  { %6332 = vmatprep.subr.bf16.mxu1 %v6331_v41  ;;  %v3148_v41 = vld [vmem:[%s7422_s3 + $0x138] sm:$0xff]  ;;  %v3169_v30 = vld [vmem:[%s7422_s3 + $0x1e0] sm:$0xff] }
0x1c1a   :  { %v6367_v44 = vpack.c.bf16 %v3148_v41, %v3146_v40  ;;  %v3677_v27 = vld [vmem:[%s7535_s25] sm:$0xff] }
0x1c22   :  { %v6783_v32 = vpop.eup %6782 }
0x1c23   :  { %v3015_v10 = vsel %vm991_vm13, %v6783_v32, 0.0 }
0x1c24   :  { %3016 = vadd.xlane.f32.xlu1 %v3015_v10  ;;  %v3142_v10 = vld [vmem:[%s7422_s3 + $0x108] sm:$0xff] }
0x1cb1   :  { %v3017_v33 = vpop.xlane.xlu1 %3016 }
0x1cb2   :  { %6784 = vrcp.f32 %v3017_v33  ;;  %v3144_v33 = vld [vmem:[%s7422_s3 + $0x118] sm:$0xff] }
0x1cbc   :  { %v6785_v34 = vpop.eup %6784 }
0x1cbd   :  { %v3019_v35 = vmul.f32 %v6785_v34, %v6783_v32  ;;  %v3139_v32 = vld [vmem:[%s7422_s3 + $0xf0] sm:$0xff] }
0x1cbe   :  { %v6361_v34 = vpack.c.bf16 %v3139_v32, %v3137_v31 }
0x1cbf   :  { %5885 = vmatmul.mubr.msk.f32.vlgmr.msra.gmra.mrb[28].mxu1 %vm991_vm13, %v3019_v35  ;;  %v6363_v35 = vpack.c.bf16 %v3144_v33, %v3142_v10  ;;  %v5387_v10 = vld [vmem:[%s5320_s9] ss:$0 sm:$0xff]  ;;  %s6876_s9 = smov 25  }
0x1cc0   :  { %6334 = vmatpush1.bf16.msra.mxu1 %v6333_v46  ;;  %v3147_v46 = vld [vmem:[%s7422_s3 + $0x130] sm:$0xff]  ;;  %s5326_s13 = sld [smem:[%s7847_s0 + %s6876_s9]]  }
0x1cc1   :  { %6336 = vmatprep.subr.bf16.mxu1 %v6335_v47  ;;  %v3150_v47 = vld [vmem:[%s7422_s3 + $0x148] sm:$0xff]  ;;  %v6369_v49 = vpack.c.bf16 %v3147_v46, %v3145_v45 }
0x1cc2   :  { %v6371_v50 = vpack.c.bf16 %v3152_v48, %v3150_v47 }
0x1cc4   :  { %6338 = vmatpush1.bf16.msra.mxu1 %v6337_v52  ;;  %v3151_v52 = vld [vmem:[%s7422_s3 + $0x150] sm:$0xff] }
0x1cc5   :  { %6340 = vmatprep.subr.bf16.mxu1 %v6339_v42  ;;  %v3154_v42 = vld [vmem:[%s7422_s3 + $0x168] sm:$0xff]  ;;  %v6373_v54 = vpack.c.bf16 %v3151_v52, %v3149_v51 }
0x1cc6   :  { %v6375_v55 = vpack.c.bf16 %v3156_v53, %v3154_v42 }
0x1cc8   :  { %6342 = vmatpush1.bf16.msra.mxu1 %v6341_v57  ;;  %v3155_v57 = vld [vmem:[%s7422_s3 + $0x170] sm:$0xff] }
0x1cc9   :  { %6344 = vmatprep.subr.bf16.mxu1 %v6343_v61  ;;  %v3158_v61 = vld [vmem:[%s7422_s3 + $0x188] sm:$0xff]  ;;  %v6377_v1 = vpack.c.bf16 %v3155_v57, %v3153_v56 }
0x1cca   :  { %v6379_v2 = vpack.c.bf16 %v3160_v63, %v3158_v61 }
0x1ccc   :  { %6346 = vmatpush1.bf16.msra.mxu1 %v6345_v8  ;;  %v3159_v8 = vld [vmem:[%s7422_s3 + $0x190] sm:$0xff] }
0x1ccd   :  { %6348 = vmatprep.subr.bf16.mxu1 %v6347_v11  ;;  %v3162_v11 = vld [vmem:[%s7422_s3 + $0x1a8] sm:$0xff]  ;;  %v6381_v14 = vpack.c.bf16 %v3159_v8, %v3157_v5 }
0x1cce   :  { %v6383_v15 = vpack.c.bf16 %v3164_v12, %v3162_v11 }
0x1cd0   :  { %6350 = vmatpush1.bf16.msra.mxu1 %v6349_v17  ;;  %v3163_v17 = vld [vmem:[%s7422_s3 + $0x1b0] sm:$0xff] }
0x1cd1   :  { %6352 = vmatprep.subr.bf16.mxu1 %v6351_v18  ;;  %v3166_v18 = vld [vmem:[%s7422_s3 + $0x1c8] sm:$0xff]  ;;  %v6385_v20 = vpack.c.bf16 %v3163_v17, %v3161_v16 }
0x1cd2   :  { %v6387_v21 = vpack.c.bf16 %v3168_v62, %v3166_v18 }
0x1cd4   :  { %6354 = vmatpush1.bf16.msra.mxu1 %v6353_v23  ;;  %v3167_v23 = vld [vmem:[%s7422_s3 + $0x1d0] sm:$0xff] }
0x1cd5   :  { %6356 = vmatprep.subr.bf16.mxu1 %v6355_v24  ;;  %v6389_v24 = vpack.c.bf16 %v3167_v23, %v3165_v22 }
0x1cd8   :  { %6358 = vmatpush1.bf16.msra.mxu1 %v6357_v7  ;;  %v3171_v7 = vld [vmem:[%s7422_s3 + $0x1f0] sm:$0xff]  ;;  %s6875_s3 = smov 28  }
0x1cd9   :  { %6360 = vmatprep.subr.bf16.mxu1 %v6359_v25  ;;  %v6393_v25 = vpack.c.bf16 %v3171_v7, %v3169_v30  ;;  %v3679_v7 = vld [vmem:[%s7535_s25 + $0x10] sm:$0xff]  ;;  %s7728_s6 = sld [smem:[%s7847_s0 + %s6875_s3]]  }
0x1cdc   :  { %6362 = vmatpush1.bf16.msra.mxu1 %v6361_v34 }
0x1cdd   :  { %6364 = vmatprep.subr.bf16.mxu1 %v6363_v35 }
0x1ce0   :  { %6366 = vmatpush1.bf16.msra.mxu1 %v6365_v43 }
0x1ce1   :  { %6368 = vmatprep.subr.bf16.mxu1 %v6367_v44 }
0x1ce4   :  { %6370 = vmatpush1.bf16.msra.mxu1 %v6369_v49 }
0x1ce5   :  { %6372 = vmatprep.subr.bf16.mxu1 %v6371_v50 }
0x1ce8   :  { %6374 = vmatpush1.bf16.msra.mxu1 %v6373_v54 }
0x1ce9   :  { %6376 = vmatprep.subr.bf16.mxu1 %v6375_v55 }
0x1cec   :  { %6378 = vmatpush1.bf16.msra.mxu1 %v6377_v1 }
0x1ced   :  { %6380 = vmatprep.subr.bf16.mxu1 %v6379_v2 }
0x1cf0   :  { %6382 = vmatpush1.bf16.msra.mxu1 %v6381_v14 }
0x1cf1   :  { %6384 = vmatprep.subr.bf16.mxu1 %v6383_v15 }
0x1cf4   :  { %6386 = vmatpush1.bf16.msra.mxu1 %v6385_v20 }
0x1cf5   :  { %6388 = vmatprep.subr.bf16.mxu1 %v6387_v21 }
0x1cf8   :  { %6390 = vmatpush1.bf16.msra.mxu1 %v6389_v24  ;;  %v5394_v24 = vld [vmem:[%s5322_s21] ss:$0 sm:$0xff]  ;;  %s6878_s21 = smov 27  }
0x1cf9   :  { %6392 = vmatprep.subr.bf16.mxu1 %v6391_v29  ;;  %s5328_s24 = sld [smem:[%s7847_s0 + %s6878_s21]]  }
0x1cfc   :  { %6394 = vmatpush1.bf16.msra.mxu1 %v6393_v25  ;;  %v3680_v25 = vld [vmem:[%s7535_s25 + $0x18] sm:$0xff] }
0x1d92   :  { %v3093_v31 = vpop.f32.mrb[28].mxu1 }
0x1d93   :  { %3098 = vrot.lane.b32.xlu1 %v3093_v31, %s6841_s10  ;;  %v5886_v32 = vpop.f32.mrb[29].mxu1 }
0x1d94   :  { %v6395_v32 = vpack.c.bf16 %v3678_v28, %v3677_v27 }
0x1e05   :  { %v3099_v33 = vpop.permute.xlu1 %3098 }
0x1e06   :  { %v3101_v34 = vsel %vm834_vm11, %v7412_v19, %v3099_v33  ;;  %v6399_v33 = vpack.c.bf16 %v3680_v25, %v3679_v7 }
0x1e07   :  { %v3108_v35 = vadd.f32 %v5387_v10, %v3101_v34  ;;  %v3681_v34 = vld [vmem:[%s7535_s25 + $0x20] sm:$0xff] }
0x1e09   :  { %3238 = vmatprep.mubr.f32.mxu1 %v3108_v35  ;;  %v3682_v35 = vld [vmem:[%s7535_s25 + $0x28] sm:$0xff] }
0x1e0a   :  { %3239 = vmatmul.mubr.f32.vlgmr.msra.gmra.mrb[30].mxu1 %v7060_v6 }
0x1e0b   :  { %5951 = vmatprep.mubr.msk.f32.mxu1 %vm234_vm2, %v6840_v9 }
0x1edd   :  { %v3240_v36 = vpop.f32.mrb[30].mxu1 }
0x1ede   :  { %v3242_v38 = vpop.f32.mrb[31].mxu1 }
0x1edf   :  { %3319 = vperm.xlu0 %6695, %v3242_v38   ;;  %5888 = vmatpush3.xpose.msk.msra.mxu0 %vm234_vm2, %v3242_v38 }
0x1ee0   :  { %5892 = vmatprep.subr.mxu0 %v6847_v26 }
0x1ee2   :  { %5890 = vmatmul.mubr.msk.f32.vlgmr.msra.gmra.mrb[34].mxu0 %vm234_vm2, %v6840_v9 }
0x1ee3   :  { %5893 = vmatpush3.msra.mxu0 %v3240_v36  ;;  %5894 = vmatprep.mubr.msk.f32.mxu0 %vm6846_vm9, %v6847_v26 }
0x1ee4   :  { %5897 = vmatprep.subr.mxu0 %v6847_v26  ;;  %6702 = vset.pattern.permute.xlu0 %v6839_v4 }
0x1f5e   :  { %v3320_v6 = vpop.permute.xlu0 %3319 }
0x1fb5   :  { %v3314_v19 = vpop.f32.mrb[34].mxu0 }
0x1fb6   :  { %v3322_v40 = vadd.f32 %v3320_v6, %v3314_v19  ;;  %v5891_v41 = vpop.f32.mrb[35].mxu0  ;;  %v3684_v6 = vld [vmem:[%s7535_s25 + $0x38] sm:$0xff] }
0x1fb7   :  { %v3686_v41 = vld [vmem:[%s7535_s25 + $0x48] sm:$0xff] }
0x1fb8   :  { %vm3323_vm15 = vcmp.gt.f32.partialorder %v3322_v40, 0.0  ;;  %v3324_v43 = vmul.f32 0.2, %v3322_v40 }
0x1fba   :  { %v3325_v44 = vsel %vm3323_vm15, %v3322_v40, %v3324_v43  ;;  %v3685_v40 = vld [vmem:[%s7535_s25 + $0x40] sm:$0xff] }
0x1fbb   :  { %v3326_v45 = vadd.f32 %v7398_v0, %v3325_v44  ;;  %v6411_v43 = vpack.c.bf16 %v3686_v41, %v3685_v40  ;;  %v3687_v44 = vld [vmem:[%s7535_s25 + $0x50] sm:$0xff] }
0x1fbd   :  { %v3327_v46 = vsel %vm991_vm13, %v3326_v45, -inf }
0x1fbe   :  { %3328 = vmax.xlane.f32.xlu0 %v3327_v46 }
0x1fd4   :  { %3411 = vrot.lane.b32.xlu0 %v3242_v38, %s6855_s8  ;;  %s6869_s8 = smov 9  }
0x1fd5   :  { %s5310_s14 = sld [smem:[%s7847_s0 + %s6869_s8]]  }
0x1fdb   :  { %v3595_v10 = vld [vmem:[%s5310_s14 + $0x8] sm:$0xff] }
0x204b   :  { %v3329_v47 = vpop.xlane.xlu0 %3328 }
0x204c   :  { %v3330_v48 = vsub.f32 %v3326_v45, %v3329_v47  ;;  %v3688_v45 = vld [vmem:[%s7535_s25 + $0x58] sm:$0xff]  ;;  %v3689_v47 = vld [vmem:[%s7535_s25 + $0x60] sm:$0xff] }
0x204d   :  { %v6415_v46 = vpack.c.bf16 %v3688_v45, %v3687_v44 }
0x204e   :  { %v3331_v49 = vmul.f32 1.442695, %v3330_v48  ;;  %v3690_v48 = vld [vmem:[%s7535_s25 + $0x68] sm:$0xff] }
0x204f   :  { %v3412_v54 = vpop.permute.xlu0 %3411 }
0x2050   :  { %6786 = vpow2.f32 %v3331_v49  ;;  %v6419_v49 = vpack.c.bf16 %v3690_v48, %v3689_v47 }
0x205a   :  { %v6787_v50 = vpop.eup %6786 }
0x205b   :  { %v3333_v51 = vsel %vm991_vm13, %v6787_v50, 0.0 }
0x205c   :  { %3334 = vadd.xlane.f32.xlu1 %v3333_v51  ;;  %v3692_v51 = vld [vmem:[%s7535_s25 + $0x78] sm:$0xff] }
0x206d   :  { %3486 = vperm.xlu1 %6696, %v3242_v38   ;;  %v3683_v38 = vld [vmem:[%s7535_s25 + $0x30] sm:$0xff] }
0x206e   :  { %v6407_v19 = vpack.c.bf16 %v3684_v6, %v3683_v38 }
0x2071   :  { %6703 = vset.pattern.permute.xlu1 %v6839_v4 }
0x20e9   :  { %v3335_v52 = vpop.xlane.xlu1 %3334 }
0x20ea   :  { %6788 = vrcp.f32 %v3335_v52 }
0x20ed   :  { %v3487_v57 = vpop.permute.xlu1 %3486 }
0x20f4   :  { %v6789_v42 = vpop.eup %6788 }
0x20f5   :  { %v3337_v53 = vmul.f32 %v6789_v42, %v6787_v50  ;;  %v3691_v50 = vld [vmem:[%s7535_s25 + $0x70] sm:$0xff]  ;;  %s6879_s25 = smov 29  }
0x20f6   :  { %v6423_v52 = vpack.c.bf16 %v3692_v51, %v3691_v50  ;;  %s5330_s27 = sld [smem:[%s7847_s0 + %s6879_s25]]  }
0x20f7   :  { %5895 = vmatmul.mubr.msk.f32.vlgmr.msra.gmra.mrb[36].mxu0 %vm991_vm13, %v3337_v53 }
0x20f8   :  { %5898 = vmatpush3.xpose.msk.msra.mxu0 %vm234_vm2, %v3412_v54  ;;  %5899 = vmatprep.mubr.msk.f32.mxu0 %vm6846_vm9, %v6847_v26 }
0x20f9   :  { %5902 = vmatprep.subr.mxu0 %v6847_v26 }
0x20fb   :  { %5900 = vmatmul.mubr.msk.f32.vlgmr.msra.gmra.mrb[38].mxu0 %vm234_vm2, %v6840_v9 }
0x20fc   :  { %5904 = vmatprep.mubr.msk.f32.mxu0 %vm6846_vm9, %v6847_v26 }
0x21ca   :  { %v3407_v55 = vpop.f32.mrb[36].mxu0 }
0x21cb   :  { %v5896_v56 = vpop.f32.mrb[37].mxu0 }
0x21ce   :  { %v3481_v61 = vpop.f32.mrb[38].mxu0 }
0x21cf   :  { %v3489_v63 = vadd.f32 %v3487_v57, %v3481_v61  ;;  %v5901_v1 = vpop.f32.mrb[39].mxu0 }
0x21d1   :  { %vm3490_vm0 = vcmp.gt.f32.partialorder %v3489_v63, 0.0  ;;  %v3491_v2 = vmul.f32 0.2, %v3489_v63 }
0x21d3   :  { %v3492_v5 = vsel %vm3490_vm0, %v3489_v63, %v3491_v2 }
0x21d4   :  { %v3493_v8 = vadd.f32 %v7398_v0, %v3492_v5  ;;  %v3594_v0 = vld [vmem:[%s5310_s14] sm:$0xff]  ;;  %s6877_s14 = smov 30  }
0x21d5   :  { %s7812_s20 = sld [smem:[%s7847_s0 + %s6877_s14]]  }
0x21d6   :  { %v3494_v11 = vsel %vm991_vm13, %v3493_v8, -inf }
0x21d7   :  { %3495 = vmax.xlane.f32.xlu0 %v3494_v11 }
0x21ed   :  { %3506 = vrot.lane.b32.xlu0 %v3240_v36, %s6841_s10  ;;  %v6403_v36 = vpack.c.bf16 %v3682_v35, %v3681_v34 }
0x2264   :  { %v3496_v12 = vpop.xlane.xlu0 %3495 }
0x2265   :  { %v3497_v14 = vsub.f32 %v3493_v8, %v3496_v12 }
0x2267   :  { %v3498_v15 = vmul.f32 1.442695, %v3497_v14 }
0x2268   :  { %v3507_v16 = vpop.permute.xlu0 %3506 }
0x2269   :  { %6790 = vpow2.f32 %v3498_v15  ;;  %5903 = vmatpush3.msra.mxu0 %v3507_v16 }
0x2273   :  { %v6791_v17 = vpop.eup %6790 }
0x2274   :  { %v3500_v18 = vsel %vm991_vm13, %v6791_v17, 0.0 }
0x2275   :  { %3501 = vadd.xlane.f32.xlu1 %v3500_v18 }
0x2302   :  { %v3502_v62 = vpop.xlane.xlu1 %3501 }
0x2303   :  { %6792 = vrcp.f32 %v3502_v62  ;;  %v7570_v62 = vld [vmem:[%s6926_s15 + $0x8] sm:$0xff] }
0x230d   :  { %v6793_v20 = vpop.eup %6792 }
0x230e   :  { %v3504_v21 = vmul.f32 %v6793_v20, %v6791_v17 }
0x2310   :  { %5905 = vmatmul.mubr.msk.f32.vlgmr.msra.gmra.mrb[40].mxu0 %vm991_vm13, %v3504_v21 }
0x2311   :  { %5909 = vmatprep.mubr.msk.f32.mxu0 %vm991_vm13, %v3594_v0  ;;  %v7574_v0 = vld [vmem:[%s6926_s15] sm:$0xff]  ;;  %s6872_s15 = smov 24  }
0x2312   :  { %s7611_s28 = sld [smem:[%s7847_s0 + %s6872_s15]]  }
0x23e3   :  { %v3578_v22 = vpop.f32.mrb[40].mxu0 }
0x23e4   :  { %3583 = vrot.lane.b32.xlu1 %v3578_v22, %s6841_s10  ;;  %v5906_v23 = vpop.f32.mrb[41].mxu0 }
0x2456   :  { %v3584_v29 = vpop.permute.xlu1 %3583 }
0x2457   :  { %v3586_v30 = vsel %vm834_vm11, %v3407_v55, %v3584_v29 }
0x2458   :  { %v3593_v31 = vadd.f32 %v5394_v24, %v3586_v30 }
0x245a   :  { %5907 = vmatprep.subr.mxu0 %v3593_v31 }
0x245b   :  { %5908 = vmatpush3.msra.mxu0 %v3593_v31 }
0x245c   :  { %5910 = vmatmul.mubr.msk.f32.vlgmr.msra.gmra.mrb[42].mxu0 %vm991_vm13, %v3595_v10  ;;  %6396 = vmatprep.subr.bf16.mxu0 %v6395_v32 }
0x245d   :  { %6398 = vmatpush3.bf16.msra.mxu0 %v6395_v32 }
0x245e   :  { %6400 = vmatprep.subr.bf16.mxu0 %v6399_v33 }
0x2461   :  { %6402 = vmatpush3.bf16.msra.mxu0 %v6399_v33 }
0x2462   :  { %6404 = vmatprep.subr.bf16.mxu0 %v6403_v36 }
0x2465   :  { %6406 = vmatpush3.bf16.msra.mxu0 %v6403_v36 }
0x2466   :  { %6408 = vmatprep.subr.bf16.mxu0 %v6407_v19 }
0x2469   :  { %6410 = vmatpush3.bf16.msra.mxu0 %v6407_v19 }
0x246a   :  { %6412 = vmatprep.subr.bf16.mxu0 %v6411_v43 }
0x246d   :  { %6414 = vmatpush3.bf16.msra.mxu0 %v6411_v43 }
0x246e   :  { %6416 = vmatprep.subr.bf16.mxu0 %v6415_v46 }
0x2471   :  { %6418 = vmatpush3.bf16.msra.mxu0 %v6415_v46 }
0x2472   :  { %6420 = vmatprep.subr.bf16.mxu0 %v6419_v49 }
0x2475   :  { %6422 = vmatpush3.bf16.msra.mxu0 %v6419_v49 }
0x2476   :  { %6424 = vmatprep.subr.bf16.mxu0 %v6423_v52 }
0x2479   :  { %6426 = vmatpush3.bf16.msra.mxu0 %v6423_v52 }
0x252f   :  { %v5911_v42 = vpop.f32.mrb[42].mxu0 }
0x2530   :  { %v3668_v53 = vpop.f32.mrb[43].mxu0 }
0x2531   :  { %5944 = vmatprep.mubr.f32.mxu0 %v3668_v53 }
0x2532   :  { %5945 = vmatmul.mubr.f32.vlgmr.msra.gmra.mrb[44].mxu0 %v5911_v42 }
0x2533   :  { %6014 = vmatprep.mubr.msk.f32.mxu0 %vm234_vm2, %v6840_v9 }
0x2605   :  { %v5946_v54 = vpop.f32.mrb[44].mxu0 }
0x2606   :  { %v3760_v55 = vpop.f32.mrb[45].mxu0  ;;  %3859 = vperm.xlu1 %6703, %v5946_v54  }
0x2607   :  { %v7557_v56 = vpack.i.bf16 %v5946_v54, %v3760_v55  ;;  %v6433_v57 = vpack.c.bf16 %v5946_v54, %v3760_v55 }
0x2609   :  { %6698 = vrot.lane.b32.xlu0 %v7557_v56, %s6841_s10 }
0x260a   :  { %6710 = vset.pattern.permute.xlu1 %v6838_v3 }
0x260d   :  { %3855 = vperm.xlu0 %6702, %v3760_v55  }
0x2611   :  { %6709 = vset.pattern.permute.xlu0 %v6838_v3 }
0x267b   :  { %v6699_v61 = vpop.permute.xlu0 %6698 }
0x267c   :  { %v6701_v63 = vunpack.i.h.bf16 %v6699_v61  ;;  %v6700_v1 = vunpack.i.l.bf16 %v6699_v61 }
0x267e   :  { %v6427_v2 = vpack.c.bf16 %v6701_v63, %v6700_v1 }
0x2680   :  { %6429 = vmatprep.subr.msk.bf16.mxu1 %vm6905_vm3, %v6427_v2 }
0x2681   :  { %6432 = vmatpush3.bf16.xpose.msk.msra.mxu1 %vm6905_vm3, %v6427_v2 }
0x2682   :  { %6434 = vmatprep.subr.bf16.mxu1 %v6433_v57 }
0x2685   :  { %v3860_v5 = vpop.permute.xlu1 %3859 }
0x2688   :  { %5952 = vmatmul.mubr.msk.f32.vlgmr.msra.gmra.mrb[32].mxu1 %vm234_vm2, %v6840_v9 }
0x2689   :  { %6436 = vmatpush3.bf16.msra.mxu1 %v6433_v57 }
0x268c   :  { %v3856_v11 = vpop.permute.xlu0 %3855 }
0x275b   :  { %v5953_v8 = vpop.f32.mrb[32].mxu1 }
0x275c   :  { %v3863_v12 = vadd.f32 %v5953_v8, %v3860_v5  ;;  %v3845_v14 = vpop.f32.mrb[33].mxu1 }
0x275d   :  { %v3862_v15 = vadd.f32 %v3856_v11, %v3845_v14 }
0x275e   :  { %vm3865_vm9 = vcmp.gt.f32.partialorder %v3863_v12, 0.0  ;;  %v3867_v16 = vmul.f32 0.2, %v3863_v12 }
0x275f   :  { %vm3864_vm13 = vcmp.gt.f32.partialorder %v3862_v15, 0.0  ;;  %v3866_v17 = vmul.f32 0.2, %v3862_v15 }
0x2760   :  { %v3869_v18 = vsel %vm3865_vm9, %v3863_v12, %v3867_v16 }
0x2761   :  { %v3871_v20 = vadd.f32 %v7570_v62, %v3869_v18  ;;  %v3868_v21 = vsel %vm3864_vm13, %v3862_v15, %v3866_v17 }
0x2762   :  { %v3870_v22 = vadd.f32 %v7574_v0, %v3868_v21 }
0x2763   :  { %v3875_v23 = vsel %vm335_vm8, %v3871_v20, -inf }
0x2764   :  { %3876 = vmax.xlane.f32.xlu1 %v3875_v23  ;;  %v3872_v24 = vsel %vm335_vm8, %v3870_v22, -inf }
0x2765   :  { %3873 = vmax.xlane.f32.xlu0 %v3872_v24 }
0x2775   :  { %6705 = vrot.lane.b32.xlu1 %v7557_v56, %s6842_s11 }
0x2779   :  { %4063 = vperm.xlu1 %6710, %v5946_v54  }
0x277d   :  { %6726 = vset.pattern.permute.xlu1 %v6839_v4 }
0x27f1   :  { %v3877_v27 = vpop.xlane.xlu1 %3876 }
0x27f2   :  { %v3879_v28 = vsub.f32 %v3871_v20, %v3877_v27  ;;  %v3874_v29 = vpop.xlane.xlu0 %3873 }
0x27f3   :  { %v3878_v30 = vsub.f32 %v3870_v22, %v3874_v29 }
0x27f4   :  { %v3882_v7 = vmul.f32 1.442695, %v3879_v28 }
0x27f5   :  { %v3880_v25 = vmul.f32 1.442695, %v3878_v30  ;;  %v6706_v31 = vpop.permute.xlu1 %6705 }
0x27f6   :  { %v6708_v32 = vunpack.i.h.bf16 %v6706_v31  ;;  %v6707_v10 = vunpack.i.l.bf16 %v6706_v31  ;;  %v4214_v31 = vld [vmem:[%s7611_s28 + $0x8] sm:$0xff] }
0x27f7   :  { %6794 = vpow2.f32 %v3880_v25  ;;  %v4213_v25 = vld [vmem:[%s7611_s28] sm:$0xff] }
0x27f8   :  { %v6437_v33 = vpack.c.bf16 %v6708_v32, %v6707_v10  ;;  %6796 = vpow2.f32 %v3882_v7  ;;  %v4215_v32 = vld [vmem:[%s7611_s28 + $0x10] sm:$0xff]  ;;  %v6447_v10 = vpack.c.bf16 %v4214_v31, %v4213_v25 }
0x27f9   :  { %v4064_v46 = vpop.permute.xlu1 %4063 }
0x27fa   :  { %6439 = vmatprep.subr.msk.bf16.mxu1 %vm6905_vm3, %v6437_v33 }
0x2801   :  { %v6795_v34 = vpop.eup %6794 }
0x2802   :  { %v3884_v35 = vsel %vm335_vm8, %v6795_v34, 0.0  ;;  %v6797_v36 = vpop.eup %6796 }
0x2803   :  { %3885 = vadd.xlane.f32.xlu0 %v3884_v35  ;;  %v3887_v4 = vsel %vm335_vm8, %v6797_v36, 0.0  ;;  %v4217_v35 = vld [vmem:[%s7611_s28 + $0x20] sm:$0xff] }
0x2807   :  { %3888 = vadd.xlane.f32.xlu0 %v3887_v4 }
0x281d   :  { %4059 = vperm.xlu0 %6709, %v3760_v55  }
0x2890   :  { %v3886_v38 = vpop.xlane.xlu0 %3885 }
0x2891   :  { %6798 = vrcp.f32 %v3886_v38  ;;  %v4219_v38 = vld [vmem:[%s7611_s28 + $0x30] sm:$0xff] }
0x2894   :  { %v3889_v6 = vpop.xlane.xlu0 %3888 }
0x2895   :  { %6800 = vrcp.f32 %v3889_v6  ;;  %v4220_v6 = vld [vmem:[%s7611_s28 + $0x38] sm:$0xff] }
0x289b   :  { %v6799_v19 = vpop.eup %6798 }
0x289c   :  { %v3892_v40 = vmul.f32 %v6799_v19, %v6795_v34  ;;  %v4060_v48 = vpop.permute.xlu0 %4059  ;;  %v6459_v19 = vpack.c.bf16 %v4220_v6, %v4219_v38 }
0x289e   :  { %5958 = vmatprep.mubr.msk.f32.mxu1 %vm335_vm8, %v3892_v40  ;;  %v4221_v40 = vld [vmem:[%s7611_s28 + $0x40] sm:$0xff] }
0x289f   :  { %v6801_v41 = vpop.eup %6800 }
0x28a0   :  { %v3893_v43 = vmul.f32 %v6801_v41, %v6797_v36  ;;  %v4218_v36 = vld [vmem:[%s7611_s28 + $0x28] sm:$0xff] }
0x28a1   :  { %v6455_v4 = vpack.c.bf16 %v4218_v36, %v4217_v35  ;;  %v4222_v41 = vld [vmem:[%s7611_s28 + $0x48] sm:$0xff] }
0x28a2   :  { %5959 = vmatmul.mubr.msk.f32.vlgmr.msra.gmra.mrb[34].mxu1 %vm335_vm8, %v3893_v43  ;;  %v6463_v43 = vpack.c.bf16 %v4222_v41, %v4221_v40 }
0x28a3   :  { %6442 = vmatpush3.bf16.xpose.msk.msra.mxu1 %vm6905_vm3, %v6437_v33  ;;  %5965 = vmatprep.mubr.msk.f32.mxu1 %vm234_vm2, %v6840_v9  ;;  %v4216_v33 = vld [vmem:[%s7611_s28 + $0x18] sm:$0xff] }
0x28a4   :  { %v6451_v34 = vpack.c.bf16 %v4216_v33, %v4215_v32 }
0x28aa   :  { %5966 = vmatmul.mubr.msk.f32.vlgmr.msra.gmra.mrb[36].mxu1 %vm234_vm2, %v6840_v9 }
0x2975   :  { %v7594_v44 = vpop.f32.mrb[34].mxu1 }
0x2976   :  { %v7596_v45 = vpop.f32.mrb[35].mxu1 }
0x297d   :  { %v5967_v47 = vpop.f32.mrb[36].mxu1 }
0x297e   :  { %v4067_v49 = vadd.f32 %v5967_v47, %v4064_v46  ;;  %v4049_v50 = vpop.f32.mrb[37].mxu1  ;;  %v4223_v46 = vld [vmem:[%s7611_s28 + $0x50] sm:$0xff]  ;;  %v4224_v47 = vld [vmem:[%s7611_s28 + $0x58] sm:$0xff] }
0x297f   :  { %v4066_v51 = vadd.f32 %v4060_v48, %v4049_v50  ;;  %v6467_v48 = vpack.c.bf16 %v4224_v47, %v4223_v46  ;;  %v4226_v50 = vld [vmem:[%s7611_s28 + $0x68] sm:$0xff] }
0x2980   :  { %vm4069_vm1 = vcmp.gt.f32.partialorder %v4067_v49, 0.0  ;;  %v4071_v52 = vmul.f32 0.2, %v4067_v49 }
0x2981   :  { %vm4068_vm4 = vcmp.gt.f32.partialorder %v4066_v51, 0.0  ;;  %v4070_v42 = vmul.f32 0.2, %v4066_v51 }
0x2982   :  { %v4073_v53 = vsel %vm4069_vm1, %v4067_v49, %v4071_v52  ;;  %v4225_v49 = vld [vmem:[%s7611_s28 + $0x60] sm:$0xff]  ;;  %v4227_v52 = vld [vmem:[%s7611_s28 + $0x70] sm:$0xff] }
0x2983   :  { %v4075_v54 = vadd.f32 %v7570_v62, %v4073_v53  ;;  %v4072_v55 = vsel %vm4068_vm4, %v4066_v51, %v4070_v42  ;;  %v6471_v51 = vpack.c.bf16 %v4226_v50, %v4225_v49  ;;  %v4228_v42 = vld [vmem:[%s7611_s28 + $0x78] sm:$0xff]  ;;  %s6880_s28 = smov 31  }
0x2984   :  { %v4074_v57 = vadd.f32 %v7574_v0, %v4072_v55  ;;  %v6475_v53 = vpack.c.bf16 %v4228_v42, %v4227_v52  ;;  %s5332_s7 = sld [smem:[%s7847_s0 + %s6880_s28]]  }
0x2985   :  { %v4079_v61 = vsel %vm335_vm8, %v4075_v54, -inf }
0x2986   :  { %4080 = vmax.xlane.f32.xlu0 %v4079_v61  ;;  %v4076_v63 = vsel %vm335_vm8, %v4074_v57, -inf }
0x2987   :  { %4077 = vmax.xlane.f32.xlu1 %v4076_v63 }
0x2a13   :  { %v4081_v1 = vpop.xlane.xlu0 %4080 }
0x2a14   :  { %v4083_v2 = vsub.f32 %v4075_v54, %v4081_v1  ;;  %v4078_v5 = vpop.xlane.xlu1 %4077  ;;  %v5409_v54 = vld [vmem:[%s5324_s1] ss:$0 sm:$0xff] }
0x2a15   :  { %v4082_v8 = vsub.f32 %v4074_v57, %v4078_v5 }
0x2a16   :  { %v4086_v11 = vmul.f32 1.442695, %v4083_v2 }
0x2a17   :  { %v4084_v12 = vmul.f32 1.442695, %v4082_v8 }
0x2a18   :  { %6802 = vpow2.f32 %v4086_v11 }
0x2a19   :  { %6804 = vpow2.f32 %v4084_v12 }
0x2a22   :  { %v6803_v14 = vpop.eup %6802 }
0x2a23   :  { %v4091_v15 = vsel %vm335_vm8, %v6803_v14, 0.0  ;;  %v6805_v16 = vpop.eup %6804 }
0x2a24   :  { %4092 = vadd.xlane.f32.xlu1 %v4091_v15  ;;  %v4088_v17 = vsel %vm335_vm8, %v6805_v16, 0.0 }
0x2a28   :  { %4089 = vadd.xlane.f32.xlu1 %v4088_v17 }
0x2a39   :  { %6712 = vrot.lane.b32.xlu1 %v7557_v56, %s6844_s16 }
0x2ab1   :  { %v4093_v18 = vpop.xlane.xlu1 %4092 }
0x2ab2   :  { %6806 = vrcp.f32 %v4093_v18 }
0x2ab5   :  { %v4090_v20 = vpop.xlane.xlu1 %4089 }
0x2ab6   :  { %6808 = vrcp.f32 %v4090_v20 }
0x2ab9   :  { %v6713_v21 = vpop.permute.xlu1 %6712 }
0x2aba   :  { %v6715_v22 = vunpack.i.h.bf16 %v6713_v21  ;;  %v6714_v23 = vunpack.i.l.bf16 %v6713_v21 }
0x2abc   :  { %v6443_v24 = vpack.c.bf16 %v6715_v22, %v6714_v23  ;;  %v6807_v27 = vpop.eup %6806 }
0x2abd   :  { %v4097_v30 = vmul.f32 %v6807_v27, %v6803_v14 }
0x2abe   :  { %6444 = vmatprep.subr.bf16.mxu1 %v6443_v24 }
0x2abf   :  { %6446 = vmatpush3.bf16.msra.mxu1 %v6443_v24 }
0x2ac0   :  { %v6809_v28 = vpop.eup %6808  ;;  %6448 = vmatprep.subr.bf16.mxu1 %v6447_v10 }
0x2ac1   :  { %v4096_v29 = vmul.f32 %v6809_v28, %v6805_v16 }
0x2ac3   :  { %5972 = vmatprep.mubr.msk.f32.mxu1 %vm335_vm8, %v4096_v29 }
0x2ac4   :  { %5973 = vmatmul.mubr.msk.f32.vlgmr.msra.gmra.mrb[38].mxu1 %vm335_vm8, %v4097_v30 }
0x2ac5   :  { %6450 = vmatpush3.bf16.msra.mxu1 %v6447_v10 }
0x2ac6   :  { %6452 = vmatprep.subr.bf16.mxu1 %v6451_v34 }
0x2ac9   :  { %6454 = vmatpush3.bf16.msra.mxu1 %v6451_v34 }
0x2aca   :  { %6456 = vmatprep.subr.bf16.mxu1 %v6455_v4 }
0x2acd   :  { %6458 = vmatpush3.bf16.msra.mxu1 %v6455_v4 }
0x2ace   :  { %6460 = vmatprep.subr.bf16.mxu1 %v6459_v19 }
0x2ad1   :  { %6462 = vmatpush3.bf16.msra.mxu1 %v6459_v19 }
0x2ad2   :  { %6464 = vmatprep.subr.bf16.mxu1 %v6463_v43 }
0x2ad5   :  { %6466 = vmatpush3.bf16.msra.mxu1 %v6463_v43 }
0x2ad6   :  { %6468 = vmatprep.subr.bf16.mxu1 %v6467_v48 }
0x2ad9   :  { %6470 = vmatpush3.bf16.msra.mxu1 %v6467_v48 }
0x2ada   :  { %6472 = vmatprep.subr.bf16.mxu1 %v6471_v51 }
0x2add   :  { %6474 = vmatpush3.bf16.msra.mxu1 %v6471_v51 }
0x2ade   :  { %6476 = vmatprep.subr.bf16.mxu1 %v6475_v53 }
0x2ae1   :  { %6478 = vmatpush3.bf16.msra.mxu1 %v6475_v53 }
0x2b97   :  { %v5974_v56 = vpop.f32.mrb[38].mxu1 }
0x2b98   :  { %4189 = vrot.lane.b32.xlu1 %v5974_v56, %s6848_s17  ;;  %v4176_v7 = vpop.f32.mrb[39].mxu1 }
0x2b99   :  { %4187 = vrot.lane.b32.xlu0 %v4176_v7, %s6848_s17 }
0x2c0a   :  { %v4190_v55 = vpop.permute.xlu1 %4189 }
0x2c0b   :  { %v4194_v57 = vsel %vm657_vm10, %v7594_v44, %v4190_v55  ;;  %v4188_v61 = vpop.permute.xlu0 %4187 }
0x2c0c   :  { %v4202_v63 = vadd.f32 %v5409_v54, %v4194_v57  ;;  %v4193_v1 = vsel %vm657_vm10, %v7596_v45, %v4188_v61 }
0x2c0d   :  { %v4201_v2 = vadd.f32 %v5409_v54, %v4193_v1 }
0x2c0f   :  { %v6716_v5 = vpack.i.bf16 %v4202_v63, %v4201_v2 }
0x2c11   :  { %6717 = vrot.lane.b32.xlu1 %v6716_v5, %s6841_s10 }
0x2c83   :  { %v6718_v8 = vpop.permute.xlu1 %6717 }
0x2c84   :  { %v6720_v11 = vunpack.i.h.bf16 %v6718_v8  ;;  %v6719_v12 = vunpack.i.l.bf16 %v6718_v8 }
0x2c86   :  { %v4211_v14 = vsel %vm834_vm11, %v6972_v39, %v6719_v12  ;;  %v4212_v15 = vsel %vm834_vm11, %v6969_v37, %v6720_v11 }
0x2c87   :  { %6007 = vmatprep.mubr.f32.mxu1 %v4211_v14 }
0x2c88   :  { %6008 = vmatmul.mubr.f32.vlgmr.msra.gmra.mrb[40].mxu1 %v4212_v15 }
0x2c89   :  { %4940 = vmatprep.mubr.f32.mxu1 %v6847_v26 }
0x2d5b   :  { %v6009_v44 = vpop.f32.mrb[40].mxu1 }
0x2d5c   :  { %v4296_v16 = vpop.f32.mrb[41].mxu1 }
0x2d5d   :  { %v7644_v45 = vpack.i.bf16 %v6009_v44, %v4296_v16  ;;  %v6485_v17 = vpack.c.bf16 %v6009_v44, %v4296_v16 }
0x2d5f   :  { %6722 = vrot.lane.b32.xlu1 %v7644_v45, %s6841_s10  ;;  %s6874_s10 = smov 26  }
0x2d60   :  { %s7691_s2 = sld [smem:[%s7847_s0 + %s6874_s10]]  }
0x2d63   :  { %4391 = vperm.xlu1 %6726, %v4296_v16  }
0x2d67   :  { %4395 = vperm.xlu1 %6726, %v6009_v44  }
0x2d6b   :  { %6732 = vset.pattern.permute.xlu1 %v6838_v3 }
0x2dd1   :  { %v6723_v39 = vpop.permute.xlu1 %6722 }
0x2dd2   :  { %v6725_v18 = vunpack.i.h.bf16 %v6723_v39  ;;  %v6724_v20 = vunpack.i.l.bf16 %v6723_v39 }
0x2dd4   :  { %v6479_v37 = vpack.c.bf16 %v6725_v18, %v6724_v20 }
0x2dd6   :  { %6481 = vmatprep.subr.msk.bf16.mxu0 %vm6905_vm3, %v6479_v37 }
0x2dd7   :  { %6484 = vmatpush3.bf16.xpose.msk.msra.mxu0 %vm6905_vm3, %v6479_v37 }
0x2dd8   :  { %6486 = vmatprep.subr.bf16.mxu0 %v6485_v17 }
0x2dde   :  { %6015 = vmatmul.mubr.msk.f32.vlgmr.msra.gmra.mrb[46].mxu0 %vm234_vm2, %v6840_v9 }
0x2ddf   :  { %6488 = vmatpush3.bf16.msra.mxu0 %v6485_v17 }
0x2de2   :  { %v4392_v21 = vpop.permute.xlu1 %4391 }
0x2de6   :  { %v4396_v22 = vpop.permute.xlu1 %4395 }
0x2eb1   :  { %v6016_v23 = vpop.f32.mrb[46].mxu0 }
0x2eb2   :  { %v4399_v24 = vadd.f32 %v6016_v23, %v4396_v22  ;;  %v4381_v3 = vpop.f32.mrb[47].mxu0 }
0x2eb3   :  { %v4398_v27 = vadd.f32 %v4392_v21, %v4381_v3 }
0x2eb4   :  { %vm4401_vm5 = vcmp.gt.f32.partialorder %v4399_v24, 0.0  ;;  %v4403_v28 = vmul.f32 0.2, %v4399_v24 }
0x2eb5   :  { %vm4400_vm6 = vcmp.gt.f32.partialorder %v4398_v27, 0.0  ;;  %v4402_v29 = vmul.f32 0.2, %v4398_v27 }
0x2eb6   :  { %v4405_v30 = vsel %vm4401_vm5, %v4399_v24, %v4403_v28 }
0x2eb7   :  { %v4407_v56 = vadd.f32 %v7570_v62, %v4405_v30  ;;  %v4404_v7 = vsel %vm4400_vm6, %v4398_v27, %v4402_v29 }
0x2eb8   :  { %v4406_v25 = vadd.f32 %v7574_v0, %v4404_v7  ;;  %v4740_v7 = vld [vmem:[%s7691_s2 + $0x8] sm:$0xff] }
0x2eb9   :  { %v4411_v31 = vsel %vm335_vm8, %v4407_v56, -inf }
0x2eba   :  { %4412 = vmax.xlane.f32.xlu1 %v4411_v31  ;;  %v4408_v32 = vsel %vm335_vm8, %v4406_v25, -inf  ;;  %v4742_v31 = vld [vmem:[%s7691_s2 + $0x18] sm:$0xff] }
0x2ebb   :  { %4409 = vmax.xlane.f32.xlu0 %v4408_v32 }
0x2ecb   :  { %4595 = vperm.xlu1 %6732, %v4296_v16  }
0x2ecf   :  { %4599 = vperm.xlu1 %6732, %v6009_v44  }
0x2f47   :  { %v4413_v10 = vpop.xlane.xlu1 %4412 }
0x2f48   :  { %v4415_v33 = vsub.f32 %v4407_v56, %v4413_v10  ;;  %v4410_v34 = vpop.xlane.xlu0 %4409  ;;  %v4746_v10 = vld [vmem:[%s7691_s2 + $0x38] sm:$0xff] }
0x2f49   :  { %v4414_v35 = vsub.f32 %v4406_v25, %v4410_v34  ;;  %v4744_v25 = vld [vmem:[%s7691_s2 + $0x28] sm:$0xff]  ;;  %v4743_v34 = vld [vmem:[%s7691_s2 + $0x20] sm:$0xff] }
0x2f4a   :  { %v4418_v36 = vmul.f32 1.442695, %v4415_v33  ;;  %v6499_v32 = vpack.c.bf16 %v4744_v25, %v4740_v7  ;;  %v4739_v33 = vld [vmem:[%s7691_s2] sm:$0xff]  ;;  %v4962_v7 = vld [vmem:[%s7728_s6 + $0x8] sm:$0xff] }
0x2f4b   :  { %v4416_v4 = vmul.f32 1.442695, %v4414_v35  ;;  %v4596_v55 = vpop.permute.xlu1 %4595  ;;  %v6515_v35 = vpack.c.bf16 %v4746_v10, %v4742_v31  ;;  %v4993_v25 = vld [vmem:[%s7728_s6 + $0x100] sm:$0xff]  ;;  %v4994_v31 = vld [vmem:[%s7728_s6 + $0x108] sm:$0xff] }
0x2f4c   :  { %6810 = vpow2.f32 %v4418_v36  ;;  %v6501_v36 = vpack.c.bf16 %v4743_v34, %v4739_v33  ;;  %v4980_v34 = vld [vmem:[%s7728_s6 + $0x98] sm:$0xff] }
0x2f4d   :  { %6812 = vpow2.f32 %v4416_v4  ;;  %v4741_v4 = vld [vmem:[%s7691_s2 + $0x10] sm:$0xff]  ;;  %6516 = vmatprep.subr.bf16.mxu1 %v6515_v35 }
0x2f4e   :  { %v5011_v35 = vld [vmem:[%s7728_s6 + $0x190] sm:$0xff] }
0x2f4f   :  { %v4600_v57 = vpop.permute.xlu1 %4599 }
0x2f56   :  { %v6811_v38 = vpop.eup %6810 }
0x2f57   :  { %v4423_v6 = vsel %vm335_vm8, %v6811_v38, 0.0  ;;  %v6813_v19 = vpop.eup %6812 }
0x2f58   :  { %4424 = vadd.xlane.f32.xlu0 %v4423_v6  ;;  %v4420_v40 = vsel %vm335_vm8, %v6813_v19, 0.0  ;;  %v4748_v6 = vld [vmem:[%s7691_s2 + $0x48] sm:$0xff] }
0x2f5c   :  { %4421 = vadd.xlane.f32.xlu0 %v4420_v40  ;;  %v4752_v40 = vld [vmem:[%s7691_s2 + $0x68] sm:$0xff] }
0x2f72   :  { %6728 = vrot.lane.b32.xlu0 %v7644_v45, %s6842_s11  ;;  %s5333_s11 = sld [smem:[%s7847_s0 + %s6848_s17]]  }
0x2fe5   :  { %v4425_v41 = vpop.xlane.xlu0 %4424 }
0x2fe6   :  { %6814 = vrcp.f32 %v4425_v41  ;;  %v4750_v41 = vld [vmem:[%s7691_s2 + $0x58] sm:$0xff] }
0x2fe9   :  { %v4422_v43 = vpop.xlane.xlu0 %4421 }
0x2fea   :  { %6816 = vrcp.f32 %v4422_v43  ;;  %v4754_v43 = vld [vmem:[%s7691_s2 + $0x78] sm:$0xff] }
0x2fed   :  { %v6729_v46 = vpop.permute.xlu0 %6728 }
0x2fee   :  { %v6731_v47 = vunpack.i.h.bf16 %v6729_v46  ;;  %v6730_v48 = vunpack.i.l.bf16 %v6729_v46  ;;  %v6503_v46 = vpack.c.bf16 %v4752_v40, %v4748_v6  ;;  %v4963_v40 = vld [vmem:[%s7728_s6 + $0x10] sm:$0xff] }
0x2ff0   :  { %v6489_v49 = vpack.c.bf16 %v6731_v47, %v6730_v48  ;;  %v6815_v50 = vpop.eup %6814  ;;  %v6519_v47 = vpack.c.bf16 %v4754_v43, %v4750_v41  ;;  %v4747_v48 = vld [vmem:[%s7691_s2 + $0x40] sm:$0xff]  ;;  %v4964_v41 = vld [vmem:[%s7728_s6 + $0x18] sm:$0xff] }
0x2ff1   :  { %v4429_v42 = vmul.f32 %v6815_v50, %v6811_v38  ;;  %v4745_v38 = vld [vmem:[%s7691_s2 + $0x30] sm:$0xff] }
0x2ff2   :  { %6491 = vmatprep.subr.msk.bf16.mxu0 %vm6905_vm3, %v6489_v49  ;;  %v4749_v50 = vld [vmem:[%s7691_s2 + $0x50] sm:$0xff] }
0x2ff4   :  { %v6817_v51 = vpop.eup %6816 }
0x2ff5   :  { %v4428_v52 = vmul.f32 %v6817_v51, %v6813_v19  ;;  %v6517_v19 = vpack.c.bf16 %v4745_v38, %v4741_v4 }
0x2ff7   :  { %6021 = vmatprep.mubr.msk.f32.mxu0 %vm335_vm8, %v4428_v52  ;;  %6518 = vmatpush1.bf16.msra.mxu1 %v6517_v19  ;;  %v4753_v52 = vld [vmem:[%s7691_s2 + $0x70] sm:$0xff]  ;;  %v6565_v19 = vpack.c.bf16 %v4994_v31, %v4993_v25 }
0x2ff8   :  { %6022 = vmatmul.mubr.msk.f32.vlgmr.msra.gmra.mrb[48].mxu0 %vm335_vm8, %v4429_v42  ;;  %v4756_v42 = vld [vmem:[%s7691_s2 + $0x88] sm:$0xff]  ;;  %6520 = vmatprep.subr.bf16.mxu1 %v6519_v47  ;;  %v4971_v31 = vld [vmem:[%s7728_s6 + $0x50] sm:$0xff] }
0x2ff9   :  { %6494 = vmatpush3.bf16.xpose.msk.msra.mxu0 %vm6905_vm3, %v6489_v49  ;;  %6028 = vmatprep.mubr.msk.f32.mxu0 %vm234_vm2, %v6840_v9  ;;  %v4751_v49 = vld [vmem:[%s7691_s2 + $0x60] sm:$0xff] }
0x2ffa   :  { %v6505_v51 = vpack.c.bf16 %v4751_v49, %v4747_v48  ;;  %v4995_v48 = vld [vmem:[%s7728_s6 + $0x110] sm:$0xff]  ;;  %v4996_v49 = vld [vmem:[%s7728_s6 + $0x118] sm:$0xff] }
0x3000   :  { %6029 = vmatmul.mubr.msk.f32.vlgmr.msra.gmra.mrb[50].mxu0 %vm234_vm2, %v6840_v9 }
0x30cb   :  { %v7673_v53 = vpop.f32.mrb[48].mxu0 }
0x30cc   :  { %v7675_v54 = vpop.f32.mrb[49].mxu0 }
0x30d3   :  { %v6030_v61 = vpop.f32.mrb[50].mxu0 }
0x30d4   :  { %v4603_v63 = vadd.f32 %v6030_v61, %v4600_v57  ;;  %v4585_v1 = vpop.f32.mrb[51].mxu0  ;;  %v6521_v57 = vpack.c.bf16 %v4753_v52, %v4749_v50  ;;  %v4981_v50 = vld [vmem:[%s7728_s6 + $0xa0] sm:$0xff]  ;;  %v5014_v52 = vld [vmem:[%s7728_s6 + $0x1a8] sm:$0xff] }
0x30d5   :  { %v4602_v2 = vadd.f32 %v4596_v55, %v4585_v1  ;;  %v4760_v55 = vld [vmem:[%s7691_s2 + $0xa8] sm:$0xff]  ;;  %v4762_v1 = vld [vmem:[%s7691_s2 + $0xb8] sm:$0xff] }
0x30d6   :  { %vm4605_vm7 = vcmp.gt.f32.partialorder %v4603_v63, 0.0  ;;  %v4607_v5 = vmul.f32 0.2, %v4603_v63  ;;  %v6507_v61 = vpack.c.bf16 %v4760_v55, %v4756_v42  ;;  %6522 = vmatpush1.bf16.msra.mxu1 %v6521_v57  ;;  %v6537_v42 = vpack.c.bf16 %v4964_v41, %v4963_v40  ;;  %v4965_v57 = vld [vmem:[%s7728_s6 + $0x20] sm:$0xff] }
0x30d7   :  { %vm4604_vm12 = vcmp.gt.f32.partialorder %v4602_v2, 0.0  ;;  %v4606_v13 = vmul.f32 0.2, %v4602_v2  ;;  %v6569_v55 = vpack.c.bf16 %v4996_v49, %v4995_v48  ;;  %v5005_v48 = vld [vmem:[%s7728_s6 + $0x160] sm:$0xff] }
0x30d8   :  { %v4609_v8 = vsel %vm4605_vm7, %v4603_v63, %v4607_v5  ;;  %v4758_v63 = vld [vmem:[%s7691_s2 + $0x98] sm:$0xff] }
0x30d9   :  { %v4611_v11 = vadd.f32 %v7570_v62, %v4609_v8  ;;  %v4608_v12 = vsel %vm4604_vm12, %v4602_v2, %v4606_v13  ;;  %v4755_v2 = vld [vmem:[%s7691_s2 + $0x80] sm:$0xff]  ;;  %v6523_v5 = vpack.c.bf16 %v4762_v1, %v4758_v63  ;;  %v4757_v8 = vld [vmem:[%s7691_s2 + $0x90] sm:$0xff] }
0x30da   :  { %v4610_v9 = vadd.f32 %v7574_v0, %v4608_v12  ;;  %v4759_v13 = vld [vmem:[%s7691_s2 + $0xa0] sm:$0xff] }
0x30db   :  { %v4615_v14 = vsel %vm335_vm8, %v4611_v11, -inf  ;;  %v6509_v12 = vpack.c.bf16 %v4759_v13, %v4755_v2  ;;  %6524 = vmatprep.subr.bf16.mxu1 %v6523_v5  ;;  %v4997_v2 = vld [vmem:[%s7728_s6 + $0x120] sm:$0xff]  ;;  %v4998_v5 = vld [vmem:[%s7728_s6 + $0x128] sm:$0xff]  ;;  %v4983_v13 = vld [vmem:[%s7728_s6 + $0xb0] sm:$0xff] }
0x30dc   :  { %4616 = vmax.xlane.f32.xlu0 %v4615_v14  ;;  %v4612_v15 = vsel %vm335_vm8, %v4610_v9, -inf  ;;  %v4764_v14 = vld [vmem:[%s7691_s2 + $0xc8] sm:$0xff] }
0x30dd   :  { %4613 = vmax.xlane.f32.xlu1 %v4612_v15  ;;  %v4768_v15 = vld [vmem:[%s7691_s2 + $0xe8] sm:$0xff] }
0x30ee   :  { %6734 = vrot.lane.b32.xlu1 %v7644_v45, %s6844_s16 }
0x3169   :  { %v4617_v44 = vpop.xlane.xlu0 %4616 }
0x316a   :  { %v4619_v16 = vsub.f32 %v4611_v11, %v4617_v44  ;;  %v4614_v17 = vpop.xlane.xlu1 %4613  ;;  %v4761_v11 = vld [vmem:[%s7691_s2 + $0xb0] sm:$0xff]  ;;  %v4766_v44 = vld [vmem:[%s7691_s2 + $0xd8] sm:$0xff] }
0x316b   :  { %v4618_v39 = vsub.f32 %v4610_v9, %v4614_v17  ;;  %v6525_v9 = vpack.c.bf16 %v4761_v11, %v4757_v8  ;;  %v4770_v17 = vld [vmem:[%s7691_s2 + $0xf8] sm:$0xff]  ;;  %v5015_v8 = vld [vmem:[%s7728_s6 + $0x1b0] sm:$0xff] }
0x316c   :  { %v4622_v18 = vmul.f32 1.442695, %v4619_v16  ;;  %v6511_v16 = vpack.c.bf16 %v4768_v15, %v4764_v14  ;;  %v5016_v11 = vld [vmem:[%s7728_s6 + $0x1b8] sm:$0xff]  ;;  %v4967_v14 = vld [vmem:[%s7728_s6 + $0x30] sm:$0xff] }
0x316d   :  { %v4620_v20 = vmul.f32 1.442695, %v4618_v39  ;;  %6526 = vmatpush1.bf16.msra.mxu1 %v6525_v9  ;;  %v4763_v39 = vld [vmem:[%s7691_s2 + $0xc0] sm:$0xff]  ;;  %v6573_v9 = vpack.c.bf16 %v4998_v5, %v4997_v2  ;;  %v4968_v15 = vld [vmem:[%s7728_s6 + $0x38] sm:$0xff]  ;;  %v5007_v2 = vld [vmem:[%s7728_s6 + $0x170] sm:$0xff] }
0x316e   :  { %v6735_v37 = vpop.permute.xlu1 %6734  ;;  %v5008_v5 = vld [vmem:[%s7728_s6 + $0x178] sm:$0xff] }
0x316f   :  { %6818 = vpow2.f32 %v4620_v20  ;;  %v6737_v62 = vunpack.i.h.bf16 %v6735_v37  ;;  %v6736_v21 = vunpack.i.l.bf16 %v6735_v37  ;;  %v6527_v20 = vpack.c.bf16 %v4770_v17, %v4766_v44  ;;  %v4999_v17 = vld [vmem:[%s7728_s6 + $0x130] sm:$0xff] }
0x3170   :  { %6820 = vpow2.f32 %v4622_v18  ;;  %v4767_v18 = vld [vmem:[%s7691_s2 + $0xe0] sm:$0xff] }
0x3171   :  { %v6495_v0 = vpack.c.bf16 %v6737_v62, %v6736_v21  ;;  %v6513_v37 = vpack.c.bf16 %v4767_v18, %v4763_v39  ;;  %v4765_v62 = vld [vmem:[%s7691_s2 + $0xd0] sm:$0xff]  ;;  %6528 = vmatprep.subr.bf16.mxu1 %v6527_v20  ;;  %v5000_v39 = vld [vmem:[%s7728_s6 + $0x138] sm:$0xff]  ;;  %v4985_v18 = vld [vmem:[%s7728_s6 + $0xc0] sm:$0xff] }
0x3172   :  { %v4769_v21 = vld [vmem:[%s7691_s2 + $0xf0] sm:$0xff]  ;;  %v4986_v20 = vld [vmem:[%s7728_s6 + $0xc8] sm:$0xff] }
0x3173   :  { %6496 = vmatprep.subr.bf16.mxu0 %v6495_v0 }
0x3174   :  { %6498 = vmatpush3.bf16.msra.mxu0 %v6495_v0  ;;  %v6529_v0 = vpack.c.bf16 %v4769_v21, %v4765_v62  ;;  %v5018_v62 = vld [vmem:[%s7728_s6 + $0x1c8] sm:$0xff]  ;;  %v6545_v21 = vpack.c.bf16 %v4968_v15, %v4967_v14  ;;  %v4787_v14 = vsub.s32 3, %v7263_v58 }
0x3175   :  { %6500 = vmatprep.subr.bf16.mxu0 %v6499_v32  ;;  %v4979_v32 = vld [vmem:[%s7728_s6 + $0x90] sm:$0xff] }
0x3176   :  { %6530 = vmatpush1.bf16.msra.mxu1 %v6529_v0  ;;  %v6577_v0 = vpack.c.bf16 %v5000_v39, %v4999_v17 }
0x3179   :  { %v6819_v22 = vpop.eup %6818 }
0x317a   :  { %v4624_v23 = vsel %vm335_vm8, %v6819_v22, 0.0  ;;  %v6821_v24 = vpop.eup %6820 }
0x317b   :  { %4625 = vadd.xlane.f32.xlu0 %v4624_v23  ;;  %v4627_v45 = vsel %vm335_vm8, %v6821_v24, 0.0 }
0x317f   :  { %4628 = vadd.xlane.f32.xlu0 %v4627_v45  ;;  %v4978_v45 = vld [vmem:[%s7728_s6 + $0x88] sm:$0xff] }
0x3208   :  { %v4626_v3 = vpop.xlane.xlu0 %4625 }
0x3209   :  { %6822 = vrcp.f32 %v4626_v3  ;;  %v5009_v3 = vld [vmem:[%s7728_s6 + $0x180] sm:$0xff] }
0x320c   :  { %v4629_v27 = vpop.xlane.xlu0 %4628 }
0x320d   :  { %6824 = vrcp.f32 %v4629_v27 }
0x3213   :  { %v6823_v28 = vpop.eup %6822 }
0x3214   :  { %v4632_v29 = vmul.f32 %v6823_v28, %v6819_v22  ;;  %v5010_v28 = vld [vmem:[%s7728_s6 + $0x188] sm:$0xff] }
0x3216   :  { %6035 = vmatprep.mubr.msk.f32.mxu0 %vm335_vm8, %v4632_v29  ;;  %v6563_v29 = vpack.c.bf16 %v5010_v28, %v5009_v3  ;;  %v5001_v3 = vld [vmem:[%s7728_s6 + $0x140] sm:$0xff]  ;;  %v4987_v28 = vld [vmem:[%s7728_s6 + $0xd0] sm:$0xff] }
0x3217   :  { %v6825_v30 = vpop.eup %6824 }
0x3218   :  { %v4633_v56 = vmul.f32 %v6825_v30, %v6821_v24  ;;  %v4977_v24 = vld [vmem:[%s7728_s6 + $0x80] sm:$0xff]  ;;  %6564 = vmatprep.subr.bf16.mxu1 %v6563_v29  ;;  %v4988_v29 = vld [vmem:[%s7728_s6 + $0xd8] sm:$0xff] }
0x3219   :  { %v6531_v27 = vpack.c.bf16 %v4978_v45, %v4977_v24  ;;  %v5422_v30 = vld [vmem:[%s5326_s13] ss:$0 sm:$0xff]  ;;  %v6547_v24 = vpack.c.bf16 %v4986_v20, %v4985_v18 }
0x321a   :  { %6036 = vmatmul.mubr.msk.f32.vlgmr.msra.gmra.mrb[52].mxu0 %vm335_vm8, %v4633_v56  ;;  %v4961_v56 = vld [vmem:[%s7728_s6] sm:$0xff] }
0x321b   :  { %4863 = vmatprep.mubr.f32.mxu0 %v6847_v26  ;;  %6502 = vmatpush1.bf16.msra.mxu0 %v6501_v36  ;;  %v5012_v36 = vld [vmem:[%s7728_s6 + $0x198] sm:$0xff]  ;;  %v6533_v6 = vpack.c.bf16 %v4962_v7, %v4961_v56 }
0x321c   :  { %6504 = vmatprep.subr.bf16.mxu0 %v6503_v46  ;;  %v6535_v46 = vpack.c.bf16 %v4980_v34, %v4979_v32  ;;  %v6567_v47 = vpack.c.bf16 %v5012_v36, %v5011_v35  ;;  %v5020_v56 = vld [vmem:[%s7728_s6 + $0x1d8] sm:$0xff]  ;;  %v5003_v34 = vld [vmem:[%s7728_s6 + $0x150] sm:$0xff]  ;;  %v4989_v36 = vld [vmem:[%s7728_s6 + $0xe0] sm:$0xff] }
0x321d   :  { %v4972_v32 = vld [vmem:[%s7728_s6 + $0x58] sm:$0xff] }
0x321e   :  { %v5004_v35 = vld [vmem:[%s7728_s6 + $0x158] sm:$0xff] }
0x321f   :  { %6506 = vmatpush1.bf16.msra.mxu0 %v6505_v51  ;;  %v5013_v51 = vld [vmem:[%s7728_s6 + $0x1a0] sm:$0xff]  ;;  %v6585_v40 = vpack.c.bf16 %v5004_v35, %v5003_v34 }
0x3220   :  { %6508 = vmatprep.subr.bf16.mxu0 %v6507_v61  ;;  %v4966_v61 = vld [vmem:[%s7728_s6 + $0x28] sm:$0xff]  ;;  %v6571_v1 = vpack.c.bf16 %v5014_v52, %v5013_v51  ;;  %v4991_v51 = vld [vmem:[%s7728_s6 + $0xf0] sm:$0xff]  ;;  %v4992_v52 = vld [vmem:[%s7728_s6 + $0xf8] sm:$0xff] }
0x3223   :  { %6510 = vmatpush1.bf16.msra.mxu0 %v6509_v12  ;;  %v6541_v12 = vpack.c.bf16 %v4966_v61, %v4965_v57  ;;  %v4975_v57 = vld [vmem:[%s7728_s6 + $0x70] sm:$0xff]  ;;  %v4976_v61 = vld [vmem:[%s7728_s6 + $0x78] sm:$0xff] }
0x3224   :  { %6512 = vmatprep.subr.bf16.mxu0 %v6511_v16  ;;  %v6575_v16 = vpack.c.bf16 %v5016_v11, %v5015_v8  ;;  %v5185_v8 = vld [vmem:[%s7812_s20 + $0x8] sm:$0xff] }
0x3227   :  { %6514 = vmatpush1.bf16.msra.mxu0 %v6513_v37  ;;  %v5017_v37 = vld [vmem:[%s7728_s6 + $0x1c0] sm:$0xff] }
0x3228   :  { %6532 = vmatprep.subr.bf16.mxu0 %v6531_v27  ;;  %v6579_v45 = vpack.c.bf16 %v5018_v62, %v5017_v37  ;;  %v5002_v27 = vld [vmem:[%s7728_s6 + $0x148] sm:$0xff] }
0x3229   :  { %v6581_v25 = vpack.c.bf16 %v5002_v27, %v5001_v3 }
0x32ed   :  { %v6037_v22 = vpop.f32.mrb[52].mxu0 }
0x32ee   :  { %4725 = vrot.lane.b32.xlu1 %v6037_v22, %s6848_s17  ;;  %v4712_v23 = vpop.f32.mrb[53].mxu0  ;;  %v4969_v22 = vld [vmem:[%s7728_s6 + $0x40] sm:$0xff] }
0x32ef   :  { %4723 = vrot.lane.b32.xlu0 %v4712_v23, %s6848_s17  ;;  %v4970_v23 = vld [vmem:[%s7728_s6 + $0x48] sm:$0xff] }
0x32f0   :  { %v6549_v7 = vpack.c.bf16 %v4970_v23, %v4969_v22  ;;  %v5187_v22 = vld [vmem:[%s7812_s20 + $0x18] sm:$0xff] }
0x3360   :  { %v4726_v10 = vpop.permute.xlu1 %4725 }
0x3361   :  { %v4724_v33 = vpop.permute.xlu0 %4723  ;;  %v4730_v43 = vsel %vm657_vm10, %v7673_v53, %v4726_v10  ;;  %v6551_v10 = vpack.c.bf16 %v4988_v29, %v4987_v28 }
0x3362   :  { %v4729_v4 = vsel %vm657_vm10, %v7675_v54, %v4724_v33  ;;  %v4982_v54 = vld [vmem:[%s7728_s6 + $0xa8] sm:$0xff]  ;;  %v4738_v53 = vadd.f32 %v5422_v30, %v4730_v43 }
0x3363   :  { %v4737_v38 = vadd.f32 %v5422_v30, %v4729_v4  ;;  %v6539_v63 = vpack.c.bf16 %v4982_v54, %v4981_v50  ;;  %v5019_v30 = vld [vmem:[%s7728_s6 + $0x1d0] sm:$0xff]  ;;  %v4990_v4 = vld [vmem:[%s7728_s6 + $0xe8] sm:$0xff] }
0x3364   :  { %v6583_v33 = vpack.c.bf16 %v5020_v56, %v5019_v30  ;;  %v6555_v41 = vpack.c.bf16 %v4990_v4, %v4989_v36  ;;  %v5006_v50 = vld [vmem:[%s7728_s6 + $0x168] sm:$0xff] }
0x3365   :  { %5423 = vmatmul.mubr.msk.f32.vlgmr.msra.gmra.mrb[54].mxu0 %vm834_vm11, %v4737_v38  ;;  %5425 = vmatmul.mubr.msk.f32.vlgmr.msra.gmra.mrb[42].mxu1 %vm834_vm11, %v4737_v38  ;;  %v5021_v38 = vld [vmem:[%s7728_s6 + $0x1e0] sm:$0xff]  ;;  %v6589_v54 = vpack.c.bf16 %v5006_v50, %v5005_v48  ;;  %v5197_v50 = vld [vmem:[%s7812_s20 + $0x68] sm:$0xff] }
0x3366   :  { %4869 = vmatprep.mubr.f32.mxu0 %v6847_v26  ;;  %4946 = vmatprep.mubr.f32.mxu1 %v6847_v26  ;;  %v4984_v26 = vld [vmem:[%s7728_s6 + $0xb8] sm:$0xff] }
0x3367   :  { %6534 = vmatpush3.bf16.msra.mxu0 %v6533_v6  ;;  %6566 = vmatpush3.bf16.msra.mxu1 %v6565_v19  ;;  %v6543_v44 = vpack.c.bf16 %v4984_v26, %v4983_v13  ;;  %v5022_v6 = vld [vmem:[%s7728_s6 + $0x1e8] sm:$0xff]  ;;  %v6553_v19 = vpack.c.bf16 %v4972_v32, %v4971_v31  ;;  %v6593_v13 = vpack.c.bf16 %v5008_v5, %v5007_v2  ;;  %v5184_v26 = vld [vmem:[%s7812_s20] sm:$0xff] }
0x3368   :  { %6536 = vmatprep.subr.bf16.mxu0 %v6535_v46  ;;  %6568 = vmatprep.subr.bf16.mxu1 %v6567_v47  ;;  %v6587_v43 = vpack.c.bf16 %v5022_v6, %v5021_v38  ;;  %v4973_v46 = vld [vmem:[%s7728_s6 + $0x60] sm:$0xff]  ;;  %v4974_v47 = vld [vmem:[%s7728_s6 + $0x68] sm:$0xff]  ;;  %v6595_v11 = vpack.c.bf16 %v5185_v8, %v5184_v26  ;;  %v5190_v38 = vld [vmem:[%s7812_s20 + $0x30] sm:$0xff] }
0x3369   :  { %5424 = vmatmul.mubr.msk.f32.gmra.mrb[56].mxu0 %vm834_vm11, %v4738_v53  ;;  %5426 = vmatmul.mubr.msk.f32.gmra.mrb[44].mxu1 %vm834_vm11, %v4738_v53  ;;  %v6557_v49 = vpack.c.bf16 %v4974_v47, %v4973_v46  ;;  %v5023_v53 = vld [vmem:[%s7728_s6 + $0x1f0] sm:$0xff]  ;;  %v5188_v32 = vld [vmem:[%s7812_s20 + $0x20] sm:$0xff]  ;;  %v5191_v6 = vld [vmem:[%s7812_s20 + $0x38] sm:$0xff] }
0x336a   :  { %v5194_v46 = vld [vmem:[%s7812_s20 + $0x50] sm:$0xff]  ;;  %v5195_v47 = vld [vmem:[%s7812_s20 + $0x58] sm:$0xff] }
0x336b   :  { %6538 = vmatpush3.bf16.msra.mxu0 %v6537_v42  ;;  %6570 = vmatpush3.bf16.msra.mxu1 %v6569_v55  ;;  %v6559_v42 = vpack.c.bf16 %v4992_v52, %v4991_v51  ;;  %v5024_v55 = vld [vmem:[%s7728_s6 + $0x1f8] sm:$0xff]  ;;  %v6615_v48 = vpack.c.bf16 %v5195_v47, %v5194_v46  ;;  %v5198_v51 = vld [vmem:[%s7812_s20 + $0x70] sm:$0xff] }
0x336c   :  { %6540 = vmatprep.subr.bf16.mxu0 %v6539_v63  ;;  %6572 = vmatprep.subr.bf16.mxu1 %v6571_v1  ;;  %v6591_v63 = vpack.c.bf16 %v5024_v55, %v5023_v53  ;;  %v6561_v1 = vpack.c.bf16 %v4976_v61, %v4975_v57  ;;  %v5199_v52 = vld [vmem:[%s7812_s20 + $0x78] sm:$0xff]  ;;  %v5427_v57 = vld [vmem:[%s5330_s27] ss:$0 sm:$0xff] }
0x336d   :  { %v6623_v53 = vpack.c.bf16 %v5199_v52, %v5198_v51 }
0x336f   :  { %6542 = vmatpush3.bf16.msra.mxu0 %v6541_v12  ;;  %6574 = vmatpush3.bf16.msra.mxu1 %v6573_v9  ;;  %v4783_v12 = vsub.s32 2, %v7263_v58  ;;  %v4771_v9 = vld [vmem:[%s5328_s24] sm:$0xf] }
0x3370   :  { %6544 = vmatprep.subr.bf16.mxu0 %v6543_v44  ;;  %6576 = vmatprep.subr.bf16.mxu1 %v6575_v16  ;;  %v4776_v15 = vrot.slane %v4771_v9, %v7269_v60  ;;  %v4780_v16 = vrot.slane %v4771_v9, %v7266_v59  ;;  %v4788_v17 = vrot.slane %v4771_v9, %v4787_v14 }
0x3371   :  { %v4784_v44 = vrot.slane %v4771_v9, %v4783_v12 }
0x3373   :  { %6546 = vmatpush3.bf16.msra.mxu0 %v6545_v21  ;;  %6578 = vmatpush3.bf16.msra.mxu1 %v6577_v0  ;;  %v5186_v0 = vld [vmem:[%s7812_s20 + $0x10] sm:$0xff] }
0x3374   :  { %6548 = vmatprep.subr.bf16.mxu0 %v6547_v24  ;;  %6580 = vmatprep.subr.bf16.mxu1 %v6579_v45  ;;  %v6599_v27 = vpack.c.bf16 %v5187_v22, %v5186_v0 }
0x3377   :  { %6550 = vmatpush3.bf16.msra.mxu0 %v6549_v7  ;;  %6582 = vmatpush3.bf16.msra.mxu1 %v6581_v25 }
0x3378   :  { %6552 = vmatprep.subr.bf16.mxu0 %v6551_v10  ;;  %6584 = vmatprep.subr.bf16.mxu1 %v6583_v33  ;;  %v5189_v10 = vld [vmem:[%s7812_s20 + $0x28] sm:$0xff] }
0x3379   :  { %v6603_v4 = vpack.c.bf16 %v5189_v10, %v5188_v32 }
0x337b   :  { %6554 = vmatpush3.bf16.msra.mxu0 %v6553_v19  ;;  %6586 = vmatpush3.bf16.msra.mxu1 %v6585_v40  ;;  %v6607_v19 = vpack.c.bf16 %v5191_v6, %v5190_v38  ;;  %v5192_v40 = vld [vmem:[%s7812_s20 + $0x40] sm:$0xff] }
0x337c   :  { %6556 = vmatprep.subr.bf16.mxu0 %v6555_v41  ;;  %6588 = vmatprep.subr.bf16.mxu1 %v6587_v43  ;;  %v5193_v41 = vld [vmem:[%s7812_s20 + $0x48] sm:$0xff] }
0x337d   :  { %v6611_v43 = vpack.c.bf16 %v5193_v41, %v5192_v40 }
0x337f   :  { %6558 = vmatpush3.bf16.msra.mxu0 %v6557_v49  ;;  %6590 = vmatpush3.bf16.msra.mxu1 %v6589_v54  ;;  %v5196_v49 = vld [vmem:[%s7812_s20 + $0x60] sm:$0xff] }
0x3380   :  { %6560 = vmatprep.subr.bf16.mxu0 %v6559_v42  ;;  %6592 = vmatprep.subr.bf16.mxu1 %v6591_v63  ;;  %v6619_v54 = vpack.c.bf16 %v5197_v50, %v5196_v49 }
0x3383   :  { %6562 = vmatpush3.bf16.msra.mxu0 %v6561_v1  ;;  %6594 = vmatpush3.bf16.msra.mxu1 %v6593_v13 }
0x3384   :  { %6596 = vmatprep.subr.bf16.mxu0 %v6595_v11 }
0x3438   :  { %v4865_v39 = vpop.f32.mrb[54].mxu0  ;;  %v4942_v18 = vpop.f32.mrb[42].mxu1 }
0x3439   :  { %v4866_v20 = vadd.f32 %v4865_v39, %v4776_v15  ;;  %v4943_v37 = vadd.f32 %v4942_v18, %v4784_v44  ;;  %v4867_v62 = vpop.f32.mrb[55].mxu0  ;;  %v4944_v21 = vpop.f32.mrb[43].mxu1  ;;  %v5428_v39 = vld [vmem:[%s5332_s7] ss:$0 sm:$0xff] }
0x343a   :  { %v4868_v23 = vadd.f32 %v4867_v62, %v4780_v16  ;;  %v4945_v24 = vadd.f32 %v4944_v21, %v4788_v17 }
0x343b   :  { %v4953_v28 = vmax.f32 %v4866_v20, 0.0  ;;  %v4955_v59 = vmax.f32 %v4943_v37, 0.0 }
0x343c   :  { %v4954_v45 = vmax.f32 %v4868_v23, 0.0  ;;  %v4956_v58 = vmax.f32 %v4945_v24, 0.0  ;;  %v4871_v3 = vpop.f32.mrb[56].mxu0  ;;  %v4948_v60 = vpop.f32.mrb[44].mxu1 }
0x343d   :  { %v4872_v29 = vadd.f32 %v4871_v3, %v4776_v15  ;;  %v4949_v30 = vadd.f32 %v4948_v60, %v4784_v44  ;;  %v4873_v56 = vpop.f32.mrb[57].mxu0  ;;  %v4950_v7 = vpop.f32.mrb[45].mxu1 }
0x343e   :  { %v4874_v25 = vadd.f32 %v4873_v56, %v4780_v16  ;;  %v4951_v31 = vadd.f32 %v4950_v7, %v4788_v17  ;;  %5096 = vmatprep.mubr.f32.mxu0 %v4954_v45  ;;  %5171 = vmatprep.mubr.f32.mxu1 %v4956_v58 }
0x343f   :  { %5097 = vmatmul.mubr.f32.vlgmr.msra.gmra.mrb[58].mxu0 %v4953_v28  ;;  %5172 = vmatmul.mubr.f32.vlgmr.msra.gmra.mrb[46].mxu1 %v4955_v59  ;;  %v4957_v35 = vmax.f32 %v4872_v29, 0.0  ;;  %v4959_v36 = vmax.f32 %v4949_v30, 0.0 }
0x3440   :  { %v4958_v33 = vmax.f32 %v4874_v25, 0.0  ;;  %v4960_v34 = vmax.f32 %v4951_v31, 0.0  ;;  %6598 = vmatpush3.bf16.msra.mxu0 %v6595_v11 }
0x3441   :  { %6600 = vmatprep.subr.bf16.mxu0 %v6599_v27 }
0x3442   :  { %5101 = vmatprep.mubr.f32.mxu0 %v4958_v33  ;;  %5176 = vmatprep.mubr.f32.mxu1 %v4960_v34 }
0x3443   :  { %5102 = vmatmul.mubr.f32.gmra.mrb[60].mxu0 %v4957_v35  ;;  %5177 = vmatmul.mubr.f32.gmra.mrb[48].mxu1 %v4959_v36 }
0x3444   :  { %6602 = vmatpush3.bf16.msra.mxu0 %v6599_v27 }
0x3445   :  { %6604 = vmatprep.subr.bf16.mxu0 %v6603_v4 }
0x3448   :  { %6606 = vmatpush3.bf16.msra.mxu0 %v6603_v4 }
0x3449   :  { %6608 = vmatprep.subr.bf16.mxu0 %v6607_v19 }
0x344c   :  { %6610 = vmatpush3.bf16.msra.mxu0 %v6607_v19 }
0x344d   :  { %6612 = vmatprep.subr.bf16.mxu0 %v6611_v43 }
0x3450   :  { %6614 = vmatpush3.bf16.msra.mxu0 %v6611_v43 }
0x3451   :  { %6616 = vmatprep.subr.bf16.mxu0 %v6615_v48 }
0x3454   :  { %6618 = vmatpush3.bf16.msra.mxu0 %v6615_v48 }
0x3455   :  { %6620 = vmatprep.subr.bf16.mxu0 %v6619_v54 }
0x3458   :  { %6622 = vmatpush3.bf16.msra.mxu0 %v6619_v54 }
0x3459   :  { %6624 = vmatprep.subr.bf16.mxu0 %v6623_v53 }
0x345c   :  { %6626 = vmatpush3.bf16.msra.mxu0 %v6623_v53 }
0x3512   :  { %v5653_v42 = vpop.f32.mrb[58].mxu0  ;;  %v5691_v55 = vpop.f32.mrb[46].mxu1 }
0x3513   :  { %v5654_v61 = vpop.f32.mrb[59].mxu0  ;;  %v5692_v63 = vpop.f32.mrb[47].mxu1 }
0x3514   :  { %v5655_v1 = vadd.f32 %v5654_v61, %v5653_v42  ;;  %v5693_v2 = vadd.f32 %v5692_v63, %v5691_v55 }
0x3516   :  { %v5099_v5 = vadd.f32 %v5655_v1, %v5427_v57  ;;  %v5656_v13 = vpop.f32.mrb[60].mxu0  ;;  %v5694_v26 = vpop.f32.mrb[48].mxu1 }
0x3517   :  { %v5657_v8 = vpop.f32.mrb[61].mxu0  ;;  %v5695_v11 = vpop.f32.mrb[49].mxu1 }
0x3518   :  { %v5174_v12 = vadd.f32 %v5693_v2, %v5099_v5  ;;  %v5658_v9 = vadd.f32 %v5657_v8, %v5656_v13  ;;  %v5696_v14 = vadd.f32 %v5695_v11, %v5694_v26 }
0x351a   :  { %v5182_v15 = vmax.f32 %v5174_v12, 0.0  ;;  %v5104_v44 = vadd.f32 %v5658_v9, %v5427_v57 }
0x351c   :  { %v5179_v16 = vadd.f32 %v5696_v14, %v5104_v44  ;;  %6070 = vmatprep.mubr.f32.mxu0 %v5182_v15 }
0x351e   :  { %v5183_v17 = vmax.f32 %v5179_v16, 0.0 }
0x3520   :  { %6071 = vmatmul.mubr.f32.vlgmr.msra.gmra.mrb[62].mxu0 %v5183_v17 }
0x35f3   :  { %v6072_v18 = vpop.f32.mrb[62].mxu0 }
0x35f4   :  { %v5279_v20 = vadd.f32 %v6072_v18, %v5428_v39  ;;  %v5273_v37 = vpop.f32.mrb[63].mxu0 }
0x35f5   :  { %v5274_v62 = vadd.f32 %v5428_v39, %v5273_v37 }
0x35f6   :  { %6826 = vtanh.f32 %v5279_v20 }
0x35f7   :  { %6828 = vtanh.f32 %v5274_v62 }
0x3600   :  { %v6827_v21 = vpop.eup %6826 }
0x3601   :  { %v6829_v0 = vpop.eup %6828  ;;  %v5285_v22 = vmul.f32 %v6827_v21, %v6827_v21 }
0x3602   :  { %v5284_v23 = vmul.f32 %v6829_v0, %v6829_v0 }
0x3603   :  { %5288 = vadd.xlane.f32.xlu0 %v5285_v22 }
0x3604   :  { %5286 = vadd.xlane.f32.xlu1 %v5284_v23 }
0x3690   :  { %v5289_v24 = vpop.xlane.xlu0 %5288 }
0x3691   :  { %v5291_v45 = vmax.f32 %v5289_v24, 1e-24  ;;  %v5287_v58 = vpop.xlane.xlu1 %5286 }
0x3692   :  { %v5290_v3 = vmax.f32 %v5287_v58, 1e-24 }
0x3693   :  { %6830 = vrsqrt.f32 %v5291_v45 }
0x3694   :  { %6832 = vrsqrt.f32 %v5290_v3 }
0x369d   :  { %v6831_v60 = vpop.eup %6830 }
0x369e   :  { %v6833_v27 = vpop.eup %6832  ;;  %v5295_v28 = vmul.f32 %v6831_v60, %v6827_v21 }
0x369f   :  { %v5294_v59 = vmul.f32 %v6833_v27, %v6829_v0 }
0x36a0   :  { %5297 = vst [vmem:[%s5333_s11 + $0x8] sm:$0xff] %v5295_v28 }
0x36a1   :  { %5296 = vst [vmem:[%s5333_s11] sm:$0xff] %v5294_v59 }

</bundles_post_ra>
